<compile_context>
chip_gen: v5e
topology: v5e:2x2
jax: 0.10.0
libtpu: 0.0.40
codegen_flags: <defaults>
</compile_context>

<pallas_src>
import functools

import jax
import jax.numpy as jnp
from jax.experimental import pallas as pl
from jax.experimental.pallas import tpu as pltpu

LANE = 128


def _pad_up(c: int) -> int:
    return ((c + LANE - 1) // LANE) * LANE


def _vmem_limit_bytes() -> int:
    """~half of physical VMEM: 64 MiB on 128-MiB parts (v5e/v6e), 32 MiB on v7x."""
    try:
        cap = int(pltpu.get_tpu_info().vmem_capacity_bytes)
    except Exception:
        cap = 64 * 1024 * 1024
    return max(32 * 1024 * 1024, min(cap // 2, 100 * 1024 * 1024))


def _bottleneck_kernel(x_ref, w1_ref, sb1_ref, w2_ref, sb2_ref, w3_ref, sb3_ref,
                       o_ref, pad_ref, *, H, W, C_w):
    """One image per grid step.  All tensors are spatially flattened (H*W rows).

    x_ref:   (1, HW, Ci_p) bf16
    w1_ref:  (Ci_p, C_w)   bf16        sb1_ref: (2, C_w)  f32  [scale; bias]
    w2_ref:  (3, 3*C_w, C_w) bf16 (per-dy slabs, dx-major)   sb2_ref: (2, C_w) f32
    w3_ref:  (C_w, Co_p)   bf16        sb3_ref: (2, Co_p) f32
    o_ref:   (1, HW, Co_p) bf16
    pad_ref: ((H+2)*W, C_w) bf16 row-halo scratch
    """
    HW = H * W
    f32 = jnp.float32
    bf16 = jnp.bfloat16

    # ---- conv1 (1x1) -> BN1 (f32 scale/bias) -> ReLU -------------------------------
    h1 = jnp.dot(x_ref[0], w1_ref[...], preferred_element_type=f32)     # (HW, C_w) f32
    h1 = jnp.maximum(h1 * sb1_ref[0:1, :] + sb1_ref[1:2, :], 0.0)

    # ---- conv2 (3x3, pad=1, stride=1): 3 accumulating matmuls, one per dy ----------
    # Row-halo scratch (bf16), flattened row-major: one zero image-row above & below.
    # Only the two halo rows are re-zeroed; the interior is fully overwritten.
    zero_row = jnp.zeros((W, C_w), bf16)
    pad_ref[pl.ds(0, W), :] = zero_row
    pad_ref[pl.ds((H + 1) * W, W), :] = zero_row
    pad_ref[pl.ds(W, HW), :] = h1.astype(bf16)

    # Cheap (HW, 1) column-id masks; broadcast inside jnp.where.
    col = jax.lax.broadcasted_iota(jnp.int32, (HW, 1), 0) % W
    not_left = col >= 1          # dx == 0 tap needs column x-1
    not_right = col <= W - 2     # dx == 2 tap needs column x+1

    h2 = jnp.zeros((HW, C_w), f32)
    for dy in range(3):
        # 8-aligned sublane slice (start = dy*W, W % 8 == 0) -> no relayout copy.
        base = pad_ref[pl.ds(dy * W, HW), :]                 # (HW, C_w) bf16
        base_f32 = base.astype(f32)                          # roll + mask in f32 (VPU/XLU)
        left = jnp.where(not_left, pltpu.roll(base_f32, shift=1, axis=0), 0.0)
        right = jnp.where(not_right, pltpu.roll(base_f32, shift=HW - 1, axis=0), 0.0)
        taps = jnp.concatenate(
            [left.astype(bf16), base, right.astype(bf16)], axis=-1)      # (HW, 3*C_w)
        h2 = h2 + jnp.dot(taps, w2_ref[dy], preferred_element_type=f32)  # (HW, C_w)
    h2 = jnp.maximum(h2 * sb2_ref[0:1, :] + sb2_ref[1:2, :], 0.0)

    # ---- conv3 (1x1) -> BN3 -> + identity -> ReLU ----------------------------------
    h3 = jnp.dot(h2.astype(bf16), w3_ref[...], preferred_element_type=f32)  # (HW, Co_p)
    h3 = h3 * sb3_ref[0:1, :] + sb3_ref[1:2, :]
    # Residual re-loaded here (kept out of the live set during conv2), upcast to f32.
    o_ref[0] = jnp.maximum(h3 + x_ref[0].astype(f32), 0.0).astype(o_ref.dtype)


def _prepare_weights(p, Cin, Cw, Cout, Ci_p, Cw_p, Co_p):
    """Zero-pad channels to lane width, cast conv weights to bf16, keep BN scale/bias
    in f32 (applied post-matmul inside the kernel)."""
    f32, bf16 = jnp.float32, jnp.bfloat16

    w1 = jnp.zeros((Ci_p, Cw_p), f32).at[:Cin, :Cw].set(p["w1"]).astype(bf16)
    w2 = jnp.zeros((3, 3, Cw_p, Cw_p), f32).at[:, :, :Cw, :Cw].set(p["w2"])
    w2 = w2.reshape(3, 3 * Cw_p, Cw_p).astype(bf16)        # per-dy slab, dx-major then Cin
    w3 = jnp.zeros((Cw_p, Co_p), f32).at[:Cw, :Cout].set(p["w3"]).astype(bf16)

    def sb(scale_row, bias_row, c, c_p):
        out = jnp.zeros((2, c_p), f32)
        return out.at[0, :c].set(scale_row[0]).at[1, :c].set(bias_row[0])

    sb1 = sb(p["s1"], p["b1"], Cw, Cw_p)
    sb2 = sb(p["s2"], p["b2"], Cw, Cw_p)
    sb3 = sb(p["s3"], p["b3"], Cout, Co_p)
    return w1, sb1, w2, sb2, w3, sb3


def bottleneck_pallas_flat(x_flat, w1, sb1, w2, sb2, w3, sb3, *, H, W):
    """Kernel-native contract: x_flat is (N, H*W, Ci_p) bf16, channels-last,
    lane-padded, spatially flattened.  Returns (N, H*W, Co_p) bf16 in the same layout
    (no wrapper-side HBM layout passes)."""
    N, HW, Ci_p = x_flat.shape
    Cw_p = w1.shape[1]
    Co_p = w3.shape[1]
    assert HW == H * W
    assert W % 8 == 0, "W must be a multiple of 8 (8-aligned dy slices are load-bearing)"
    assert x_flat.dtype == jnp.bfloat16

    kernel = functools.partial(_bottleneck_kernel, H=H, W=W, C_w=Cw_p)

    grid_spec = pltpu.PrefetchScalarGridSpec(
        num_scalar_prefetch=0,
        grid=(N,),
        in_specs=[
            pl.BlockSpec((1, HW, Ci_p), lambda b: (b, 0, 0)),        # x (bf16)
            pl.BlockSpec((Ci_p, Cw_p), lambda b: (0, 0)),            # w1 (bf16)
            pl.BlockSpec((2, Cw_p), lambda b: (0, 0)),               # bn1 scale/bias (f32)
            pl.BlockSpec((3, 3 * Cw_p, Cw_p), lambda b: (0, 0, 0)),  # w2 per-dy slabs (bf16)
            pl.BlockSpec((2, Cw_p), lambda b: (0, 0)),               # bn2 scale/bias (f32)
            pl.BlockSpec((Cw_p, Co_p), lambda b: (0, 0)),            # w3 (bf16)
            pl.BlockSpec((2, Co_p), lambda b: (0, 0)),               # bn3 scale/bias (f32)
        ],
        out_specs=pl.BlockSpec((1, HW, Co_p), lambda b: (b, 0, 0)),
        # bf16 row-halo scratch for conv2 (flattened (H+2)*W rows).
        scratch_shapes=[pltpu.VMEM(((H + 2) * W, Cw_p), jnp.bfloat16)],
    )

    return pl.pallas_call(
        kernel,
        out_shape=jax.ShapeDtypeStruct((N, HW, Co_p), jnp.bfloat16),
        grid_spec=grid_spec,
        compiler_params=pltpu.CompilerParams(
            dimension_semantics=("parallel",),       # batch axis: megacore-shardable
            vmem_limit_bytes=_vmem_limit_bytes(),
        ),
    )(x_flat, w1, sb1, w2, sb2, w3, sb3)


def bottleneck_pallas(x_nchw, params):
    """NCHW/f32 convenience wrapper matching the PyTorch module's layout.
    The transpose/pad/reshape passes here are XLA-side and exist only for the demo;
    production callers should hold activations in the kernel layout and call
    `bottleneck_pallas_flat` directly (no extra HBM passes)."""
    N, Cin, H, W = x_nchw.shape
    Cw = params["w1"].shape[1]
    Cout = params["w3"].shape[1]
    assert Cin == Cout, "no downsample: inplanes must equal planes * expansion"
    Ci_p, Cw_p, Co_p = _pad_up(Cin), _pad_up(Cw), _pad_up(Cout)

    x = jnp.transpose(x_nchw, (0, 2, 3, 1)).astype(jnp.bfloat16)   # NCHW -> NHWC, bf16
    x = jnp.pad(x, ((0, 0), (0, 0), (0, 0), (0, Ci_p - Cin)))
    x_flat = x.reshape(N, H * W, Ci_p)

    w1, sb1, w2, sb2, w3, sb3 = _prepare_weights(params, Cin, Cw, Cout, Ci_p, Cw_p, Co_p)
    out = bottleneck_pallas_flat(x_flat, w1, sb1, w2, sb2, w3, sb3, H=H, W=W)

    out = out.reshape(N, H, W, Co_p)[..., :Cout].astype(jnp.float32)
    return jnp.transpose(out, (0, 3, 1, 2))                         # back to NCHW


def _fold_bn(gamma, beta, mean, var, eps=1e-5):
    scale = gamma / jnp.sqrt(var + eps)
    bias = beta - mean * scale
    return scale[None, :], bias[None, :]


def make_params(key, inplanes, planes, expansion=2):
    width = planes                                       # groups=1, base_width=64
    cout = planes * expansion
    ks = jax.random.split(key, 12)

    def bn(kg, kb, km, kv, c):
        gamma = jax.random.uniform(kg, (c,), minval=0.5, maxval=1.5)
        beta = jax.random.uniform(kb, (c,), minval=-0.2, maxval=0.2)
        mean = jax.random.uniform(km, (c,), minval=-0.1, maxval=0.1)
        var = jax.random.uniform(kv, (c,), minval=0.5, maxval=1.5)
        return _fold_bn(gamma, beta, mean, var)

    w1 = jax.random.normal(ks[0], (inplanes, width)) * 0.1      # 1x1: (Cin, Cw)
    w2 = jax.random.normal(ks[1], (3, 3, width, width)) * 0.1   # 3x3: HWIO
    w3 = jax.random.normal(ks[2], (width, cout)) * 0.1          # 1x1: (Cw, Cout)
    s1, b1 = bn(ks[3], ks[4], ks[5], ks[6], width)
    s2, b2 = bn(ks[7], ks[8], ks[9], ks[10], width)
    s3, b3 = bn(ks[11], ks[3], ks[5], ks[7], cout)
    f32 = lambda a: a.astype(jnp.float32)
    return {"w1": f32(w1), "s1": f32(s1), "b1": f32(b1),
            "w2": f32(w2), "s2": f32(s2), "b2": f32(b2),
            "w3": f32(w3), "s3": f32(s3), "b3": f32(b3)}


def ref_forward(x_nhwc, p):
    """Plain-JAX f32 reference (lax conv) mirroring the PyTorch forward."""
    def conv(x, w, pad):
        return jax.lax.conv_general_dilated(
            x, w, window_strides=(1, 1), padding=[(pad, pad), (pad, pad)],
            dimension_numbers=("NHWC", "HWIO", "NHWC"))
    h = conv(x_nhwc, p["w1"][None, None], 0)
    h = jnp.maximum(h * p["s1"][0] + p["b1"][0], 0.0)
    h = conv(h, p["w2"], 1)
    h = jnp.maximum(h * p["s2"][0] + p["b2"][0], 0.0)
    h = conv(h, p["w3"][None, None], 0)
    h = h * p["s3"][0] + p["b3"][0]
    return jnp.maximum(h + x_nhwc, 0.0)


if __name__ == "__main__":
    # Bottleneck(kernel_size=3, inplanes=8, planes=4) => width=4, out channels = 8
    N, inplanes, planes, H, W = 2, 8, 4, 16, 16

    key = jax.random.PRNGKey(0)
    kx, kp = jax.random.split(key)
    x_nchw = jax.random.normal(kx, (N, inplanes, H, W), dtype=jnp.float32)
    params = make_params(kp, inplanes, planes)

    out_nchw = bottleneck_pallas(x_nchw, params)
    jax.block_until_ready(out_nchw)

    x_nhwc = jnp.transpose(x_nchw, (0, 2, 3, 1))
    ref = jnp.transpose(ref_forward(x_nhwc, params), (0, 3, 1, 2))
    assert out_nchw.shape == (N, planes * 2, H, W)
    # bf16 activation I/O + bf16 MXU operands vs f32 reference -> loosened tolerance.
    assert jnp.allclose(out_nchw, ref, atol=5e-2, rtol=5e-2), "mismatch vs JAX reference"

    print("KERNEL_OK")
</pallas_src>

<mosaic_0001>
module attributes {stable_mosaic.version = 11 : i64} {
  func.func @_bottleneck_kernel(%arg0: i32, %arg1: memref<1x256x128xbf16, #tpu.memory_space<vmem>>, %arg2: memref<128x128xbf16, #tpu.memory_space<vmem>>, %arg3: memref<2x128xf32, #tpu.memory_space<vmem>>, %arg4: memref<3x384x128xbf16, #tpu.memory_space<vmem>>, %arg5: memref<2x128xf32, #tpu.memory_space<vmem>>, %arg6: memref<128x128xbf16, #tpu.memory_space<vmem>>, %arg7: memref<2x128xf32, #tpu.memory_space<vmem>>, %arg8: memref<1x256x128xbf16, #tpu.memory_space<vmem>>, %arg9: memref<288x128xbf16, #tpu.memory_space<vmem>>) attributes {dimension_semantics = [#tpu.dimension_semantics<parallel>], iteration_bounds = array<i64: 2>, scalar_prefetch = 0 : i64, scratch_operands = 1 : i64, tpu.core_type = #tpu.core_type<tc>, window_params = [{transform_indices = @transform_0, window_bounds = array<i64: 1, 256, 128>}, {pipeline_mode = #tpu.pipeline_mode<synchronous>, transform_indices = @transform_1, window_bounds = array<i64: 128, 128>}, {pipeline_mode = #tpu.pipeline_mode<synchronous>, transform_indices = @transform_2, window_bounds = array<i64: 2, 128>}, {pipeline_mode = #tpu.pipeline_mode<synchronous>, transform_indices = @transform_3, window_bounds = array<i64: 3, 384, 128>}, {pipeline_mode = #tpu.pipeline_mode<synchronous>, transform_indices = @transform_4, window_bounds = array<i64: 2, 128>}, {pipeline_mode = #tpu.pipeline_mode<synchronous>, transform_indices = @transform_5, window_bounds = array<i64: 128, 128>}, {pipeline_mode = #tpu.pipeline_mode<synchronous>, transform_indices = @transform_6, window_bounds = array<i64: 2, 128>}, {transform_indices = @transform_7, window_bounds = array<i64: 1, 256, 128>}]} {
    %c0 = arith.constant 0 : index
    %c0_0 = arith.constant 0 : index
    %c0_1 = arith.constant 0 : index
    %0 = vector.load %arg1[%c0, %c0_0, %c0_1] : memref<1x256x128xbf16, #tpu.memory_space<vmem>>, vector<1x256x128xbf16>
    %1 = vector.shape_cast %0 : vector<1x256x128xbf16> to vector<256x128xbf16>
    %c0_2 = arith.constant 0 : index
    %c0_3 = arith.constant 0 : index
    %2 = vector.load %arg2[%c0_2, %c0_3] : memref<128x128xbf16, #tpu.memory_space<vmem>>, vector<128x128xbf16>
    %cst = arith.constant dense<0.000000e+00> : vector<256x128xf32>
    %3 = tpu.matmul %1, %2, %cst {dimension_numbers = #tpu.dot_dimension_numbers<[1], [0], [0], [1], [0, 0, 1, 1], [], []>} : vector<256x128xbf16>, vector<128x128xbf16>, vector<256x128xf32> -> vector<256x128xf32>
    %c0_4 = arith.constant 0 : index
    %c0_5 = arith.constant 0 : index
    %4 = vector.load %arg3[%c0_4, %c0_5] : memref<2x128xf32, #tpu.memory_space<vmem>>, vector<1x128xf32>
    %5 = vector.broadcast %4 : vector<1x128xf32> to vector<256x128xf32>
    %6 = arith.mulf %3, %5 : vector<256x128xf32>
    %c1 = arith.constant 1 : index
    %c0_6 = arith.constant 0 : index
    %7 = vector.load %arg3[%c1, %c0_6] : memref<2x128xf32, #tpu.memory_space<vmem>>, vector<1x128xf32>
    %8 = vector.broadcast %7 : vector<1x128xf32> to vector<256x128xf32>
    %9 = arith.addf %6, %8 : vector<256x128xf32>
    %cst_7 = arith.constant 0.000000e+00 : f32
    %10 = vector.broadcast %cst_7 : f32 to vector<256x128xf32>
    %11 = arith.maximumf %9, %10 : vector<256x128xf32>
    %cst_8 = arith.constant 0.000000e+00 : bf16
    %12 = vector.broadcast %cst_8 : bf16 to vector<16x128xbf16>
    %c0_9 = arith.constant 0 : index
    %c0_10 = arith.constant 0 : index
    %13 = vector.load %arg9[%c0_9, %c0_10] : memref<288x128xbf16, #tpu.memory_space<vmem>>, vector<16x128xbf16>
    tpu.vector_store %arg9[%c0_9, %c0_10], %12 {strides = array<i32>} : memref<288x128xbf16, #tpu.memory_space<vmem>>, vector<16x128xbf16>,
    %c272 = arith.constant 272 : index
    %c0_11 = arith.constant 0 : index
    %14 = vector.load %arg9[%c272, %c0_11] : memref<288x128xbf16, #tpu.memory_space<vmem>>, vector<16x128xbf16>
    tpu.vector_store %arg9[%c272, %c0_11], %12 {strides = array<i32>} : memref<288x128xbf16, #tpu.memory_space<vmem>>, vector<16x128xbf16>,
    %15 = arith.truncf %11 : vector<256x128xf32> to vector<256x128xbf16>
    %c16 = arith.constant 16 : index
    %c0_12 = arith.constant 0 : index
    %16 = vector.load %arg9[%c16, %c0_12] : memref<288x128xbf16, #tpu.memory_space<vmem>>, vector<256x128xbf16>
    tpu.vector_store %arg9[%c16, %c0_12], %15 {strides = array<i32>} : memref<288x128xbf16, #tpu.memory_space<vmem>>, vector<256x128xbf16>,
    %17 = tpu.iota {dimensions = array<i32: 0>} : vector<256x1xi32>
    %c16_i32 = arith.constant 16 : i32
    %c0_i32 = arith.constant 0 : i32
    %18 = arith.cmpi eq, %c16_i32, %c0_i32 : i32
    %c1_i32 = arith.constant 1 : i32
    %19 = arith.select %18, %c1_i32, %c16_i32 : i32
    %20 = vector.broadcast %19 : i32 to vector<256x1xi32>
    %21 = arith.remsi %17, %20 : vector<256x1xi32>
    %c0_i32_13 = arith.constant 0 : i32
    %22 = vector.broadcast %c0_i32_13 : i32 to vector<256x1xi32>
    %23 = arith.cmpi ne, %21, %22 : vector<256x1xi32>
    %c0_i32_14 = arith.constant 0 : i32
    %24 = vector.broadcast %c0_i32_14 : i32 to vector<256x1xi32>
    %25 = arith.cmpi slt, %21, %24 : vector<256x1xi32>
    %c0_i32_15 = arith.constant 0 : i32
    %26 = arith.cmpi slt, %19, %c0_i32_15 : i32
    %27 = vector.broadcast %26 : i1 to vector<256x1xi1>
    %28 = vector.broadcast %27 : vector<256x1xi1> to vector<256x1xi1>
    %29 = arith.xori %25, %28 : vector<256x1xi1>
    %30 = arith.andi %29, %23 : vector<256x1xi1>
    %31 = vector.broadcast %19 : i32 to vector<256x1xi32>
    %32 = arith.addi %21, %31 : vector<256x1xi32>
    %33 = arith.select %30, %32, %21 : vector<256x1xi1>, vector<256x1xi32>
    %c1_i32_16 = arith.constant 1 : i32
    %34 = vector.broadcast %c1_i32_16 : i32 to vector<256x1xi32>
    %35 = arith.cmpi sge, %33, %34 : vector<256x1xi32>
    %c14_i32 = arith.constant 14 : i32
    %36 = vector.broadcast %c14_i32 : i32 to vector<256x1xi32>
    %37 = arith.cmpi sle, %33, %36 : vector<256x1xi32>
    %cst_17 = arith.constant 0.000000e+00 : f32
    %38 = vector.broadcast %cst_17 : f32 to vector<256x128xf32>
    %c0_18 = arith.constant 0 : index
    %c0_19 = arith.constant 0 : index
    %39 = vector.load %arg9[%c0_18, %c0_19] : memref<288x128xbf16, #tpu.memory_space<vmem>>, vector<256x128xbf16>
    %40 = arith.extf %39 : vector<256x128xbf16> to vector<256x128xf32>
    %c1_i32_20 = arith.constant 1 : i32
    %41 = tpu.dynamic_rotate %40 by %c1_i32_20 dim 0 : vector<256x128xf32>, i32 -> vector<256x128xf32>
    %cst_21 = arith.constant 0.000000e+00 : f32
    %42 = vector.shape_cast %35 : vector<256x1xi1> to vector<256x1xi1>
    %43 = vector.broadcast %42 : vector<256x1xi1> to vector<256x128xi1>
    %44 = vector.broadcast %cst_21 : f32 to vector<256x128xf32>
    %45 = arith.select %43, %41, %44 : vector<256x128xi1>, vector<256x128xf32>
    %c255_i32 = arith.constant 255 : i32
    %46 = tpu.dynamic_rotate %40 by %c255_i32 dim 0 : vector<256x128xf32>, i32 -> vector<256x128xf32>
    %cst_22 = arith.constant 0.000000e+00 : f32
    %47 = vector.shape_cast %37 : vector<256x1xi1> to vector<256x1xi1>
    %48 = vector.broadcast %47 : vector<256x1xi1> to vector<256x128xi1>
    %49 = vector.broadcast %cst_22 : f32 to vector<256x128xf32>
    %50 = arith.select %48, %46, %49 : vector<256x128xi1>, vector<256x128xf32>
    %51 = arith.truncf %45 : vector<256x128xf32> to vector<256x128xbf16>
    %52 = arith.truncf %50 : vector<256x128xf32> to vector<256x128xbf16>
    %53 = tpu.concatenate %51, %39, %52 in 1 : vector<256x128xbf16>, vector<256x128xbf16>, vector<256x128xbf16> -> vector<256x384xbf16>
    %c0_23 = arith.constant 0 : index
    %c0_24 = arith.constant 0 : index
    %c0_25 = arith.constant 0 : index
    %54 = vector.load %arg4[%c0_23, %c0_24, %c0_25] : memref<3x384x128xbf16, #tpu.memory_space<vmem>>, vector<1x384x128xbf16>
    %55 = vector.shape_cast %54 : vector<1x384x128xbf16> to vector<384x128xbf16>
    %cst_26 = arith.constant dense<0.000000e+00> : vector<256x128xf32>
    %56 = tpu.matmul %53, %55, %cst_26 {dimension_numbers = #tpu.dot_dimension_numbers<[1], [0], [0], [1], [0, 0, 1, 1], [], []>} : vector<256x384xbf16>, vector<384x128xbf16>, vector<256x128xf32> -> vector<256x128xf32>
    %57 = arith.addf %38, %56 : vector<256x128xf32>
    %c16_27 = arith.constant 16 : index
    %c0_28 = arith.constant 0 : index
    %58 = vector.load %arg9[%c16_27, %c0_28] : memref<288x128xbf16, #tpu.memory_space<vmem>>, vector<256x128xbf16>
    %59 = arith.extf %58 : vector<256x128xbf16> to vector<256x128xf32>
    %c1_i32_29 = arith.constant 1 : i32
    %60 = tpu.dynamic_rotate %59 by %c1_i32_29 dim 0 : vector<256x128xf32>, i32 -> vector<256x128xf32>
    %cst_30 = arith.constant 0.000000e+00 : f32
    %61 = vector.shape_cast %35 : vector<256x1xi1> to vector<256x1xi1>
    %62 = vector.broadcast %61 : vector<256x1xi1> to vector<256x128xi1>
    %63 = vector.broadcast %cst_30 : f32 to vector<256x128xf32>
    %64 = arith.select %62, %60, %63 : vector<256x128xi1>, vector<256x128xf32>
    %c255_i32_31 = arith.constant 255 : i32
    %65 = tpu.dynamic_rotate %59 by %c255_i32_31 dim 0 : vector<256x128xf32>, i32 -> vector<256x128xf32>
    %cst_32 = arith.constant 0.000000e+00 : f32
    %66 = vector.shape_cast %37 : vector<256x1xi1> to vector<256x1xi1>
    %67 = vector.broadcast %66 : vector<256x1xi1> to vector<256x128xi1>
    %68 = vector.broadcast %cst_32 : f32 to vector<256x128xf32>
    %69 = arith.select %67, %65, %68 : vector<256x128xi1>, vector<256x128xf32>
    %70 = arith.truncf %64 : vector<256x128xf32> to vector<256x128xbf16>
    %71 = arith.truncf %69 : vector<256x128xf32> to vector<256x128xbf16>
    %72 = tpu.concatenate %70, %58, %71 in 1 : vector<256x128xbf16>, vector<256x128xbf16>, vector<256x128xbf16> -> vector<256x384xbf16>
    %c1_33 = arith.constant 1 : index
    %c0_34 = arith.constant 0 : index
    %c0_35 = arith.constant 0 : index
    %73 = vector.load %arg4[%c1_33, %c0_34, %c0_35] : memref<3x384x128xbf16, #tpu.memory_space<vmem>>, vector<1x384x128xbf16>
    %74 = vector.shape_cast %73 : vector<1x384x128xbf16> to vector<384x128xbf16>
    %cst_36 = arith.constant dense<0.000000e+00> : vector<256x128xf32>
    %75 = tpu.matmul %72, %74, %cst_36 {dimension_numbers = #tpu.dot_dimension_numbers<[1], [0], [0], [1], [0, 0, 1, 1], [], []>} : vector<256x384xbf16>, vector<384x128xbf16>, vector<256x128xf32> -> vector<256x128xf32>
    %76 = arith.addf %57, %75 : vector<256x128xf32>
    %c32 = arith.constant 32 : index
    %c0_37 = arith.constant 0 : index
    %77 = vector.load %arg9[%c32, %c0_37] : memref<288x128xbf16, #tpu.memory_space<vmem>>, vector<256x128xbf16>
    %78 = arith.extf %77 : vector<256x128xbf16> to vector<256x128xf32>
    %c1_i32_38 = arith.constant 1 : i32
    %79 = tpu.dynamic_rotate %78 by %c1_i32_38 dim 0 : vector<256x128xf32>, i32 -> vector<256x128xf32>
    %cst_39 = arith.constant 0.000000e+00 : f32
    %80 = vector.shape_cast %35 : vector<256x1xi1> to vector<256x1xi1>
    %81 = vector.broadcast %80 : vector<256x1xi1> to vector<256x128xi1>
    %82 = vector.broadcast %cst_39 : f32 to vector<256x128xf32>
    %83 = arith.select %81, %79, %82 : vector<256x128xi1>, vector<256x128xf32>
    %c255_i32_40 = arith.constant 255 : i32
    %84 = tpu.dynamic_rotate %78 by %c255_i32_40 dim 0 : vector<256x128xf32>, i32 -> vector<256x128xf32>
    %cst_41 = arith.constant 0.000000e+00 : f32
    %85 = vector.shape_cast %37 : vector<256x1xi1> to vector<256x1xi1>
    %86 = vector.broadcast %85 : vector<256x1xi1> to vector<256x128xi1>
    %87 = vector.broadcast %cst_41 : f32 to vector<256x128xf32>
    %88 = arith.select %86, %84, %87 : vector<256x128xi1>, vector<256x128xf32>
    %89 = arith.truncf %83 : vector<256x128xf32> to vector<256x128xbf16>
    %90 = arith.truncf %88 : vector<256x128xf32> to vector<256x128xbf16>
    %91 = tpu.concatenate %89, %77, %90 in 1 : vector<256x128xbf16>, vector<256x128xbf16>, vector<256x128xbf16> -> vector<256x384xbf16>
    %c2 = arith.constant 2 : index
    %c0_42 = arith.constant 0 : index
    %c0_43 = arith.constant 0 : index
    %92 = vector.load %arg4[%c2, %c0_42, %c0_43] : memref<3x384x128xbf16, #tpu.memory_space<vmem>>, vector<1x384x128xbf16>
    %93 = vector.shape_cast %92 : vector<1x384x128xbf16> to vector<384x128xbf16>
    %cst_44 = arith.constant dense<0.000000e+00> : vector<256x128xf32>
    %94 = tpu.matmul %91, %93, %cst_44 {dimension_numbers = #tpu.dot_dimension_numbers<[1], [0], [0], [1], [0, 0, 1, 1], [], []>} : vector<256x384xbf16>, vector<384x128xbf16>, vector<256x128xf32> -> vector<256x128xf32>
    %95 = arith.addf %76, %94 : vector<256x128xf32>
    %c0_45 = arith.constant 0 : index
    %c0_46 = arith.constant 0 : index
    %96 = vector.load %arg5[%c0_45, %c0_46] : memref<2x128xf32, #tpu.memory_space<vmem>>, vector<1x128xf32>
    %97 = vector.broadcast %96 : vector<1x128xf32> to vector<256x128xf32>
    %98 = arith.mulf %95, %97 : vector<256x128xf32>
    %c1_47 = arith.constant 1 : index
    %c0_48 = arith.constant 0 : index
    %99 = vector.load %arg5[%c1_47, %c0_48] : memref<2x128xf32, #tpu.memory_space<vmem>>, vector<1x128xf32>
    %100 = vector.broadcast %99 : vector<1x128xf32> to vector<256x128xf32>
    %101 = arith.addf %98, %100 : vector<256x128xf32>
    %cst_49 = arith.constant 0.000000e+00 : f32
    %102 = vector.broadcast %cst_49 : f32 to vector<256x128xf32>
    %103 = arith.maximumf %101, %102 : vector<256x128xf32>
    %104 = arith.truncf %103 : vector<256x128xf32> to vector<256x128xbf16>
    %c0_50 = arith.constant 0 : index
    %c0_51 = arith.constant 0 : index
    %105 = vector.load %arg6[%c0_50, %c0_51] : memref<128x128xbf16, #tpu.memory_space<vmem>>, vector<128x128xbf16>
    %cst_52 = arith.constant dense<0.000000e+00> : vector<256x128xf32>
    %106 = tpu.matmul %104, %105, %cst_52 {dimension_numbers = #tpu.dot_dimension_numbers<[1], [0], [0], [1], [0, 0, 1, 1], [], []>} : vector<256x128xbf16>, vector<128x128xbf16>, vector<256x128xf32> -> vector<256x128xf32>
    %c0_53 = arith.constant 0 : index
    %c0_54 = arith.constant 0 : index
    %107 = vector.load %arg7[%c0_53, %c0_54] : memref<2x128xf32, #tpu.memory_space<vmem>>, vector<1x128xf32>
    %108 = vector.broadcast %107 : vector<1x128xf32> to vector<256x128xf32>
    %109 = arith.mulf %106, %108 : vector<256x128xf32>
    %c1_55 = arith.constant 1 : index
    %c0_56 = arith.constant 0 : index
    %110 = vector.load %arg7[%c1_55, %c0_56] : memref<2x128xf32, #tpu.memory_space<vmem>>, vector<1x128xf32>
    %111 = vector.broadcast %110 : vector<1x128xf32> to vector<256x128xf32>
    %112 = arith.addf %109, %111 : vector<256x128xf32>
    %c0_57 = arith.constant 0 : index
    %c0_58 = arith.constant 0 : index
    %c0_59 = arith.constant 0 : index
    %113 = vector.load %arg1[%c0_57, %c0_58, %c0_59] : memref<1x256x128xbf16, #tpu.memory_space<vmem>>, vector<1x256x128xbf16>
    %114 = vector.shape_cast %113 : vector<1x256x128xbf16> to vector<256x128xbf16>
    %115 = arith.extf %114 : vector<256x128xbf16> to vector<256x128xf32>
    %116 = arith.addf %112, %115 : vector<256x128xf32>
    %cst_60 = arith.constant 0.000000e+00 : f32
    %117 = vector.broadcast %cst_60 : f32 to vector<256x128xf32>
    %118 = arith.maximumf %116, %117 : vector<256x128xf32>
    %119 = arith.truncf %118 : vector<256x128xf32> to vector<256x128xbf16>
    %c0_61 = arith.constant 0 : index
    %c0_62 = arith.constant 0 : index
    %c0_63 = arith.constant 0 : index
    %120 = vector.load %arg8[%c0_61, %c0_62, %c0_63] : memref<1x256x128xbf16, #tpu.memory_space<vmem>>, vector<1x256x128xbf16>
    %121 = vector.shape_cast %120 : vector<1x256x128xbf16> to vector<256x128xbf16>
    %122 = vector.shape_cast %119 : vector<256x128xbf16> to vector<1x256x128xbf16>
    tpu.vector_store %arg8[%c0_61, %c0_62, %c0_63], %122 {strides = array<i32>} : memref<1x256x128xbf16, #tpu.memory_space<vmem>>, vector<1x256x128xbf16>,
    return
  }
  func.func @transform_0(%arg0: i32) -> (i32, i32, i32) {
    %c0_i32 = arith.constant 0 : i32
    %c0_i32_0 = arith.constant 0 : i32
    %c0_i32_1 = arith.constant 0 : i32
    return %arg0, %c0_i32, %c0_i32_0 : i32, i32, i32
  }
  func.func @transform_1(%arg0: i32) -> (i32, i32) {
    %c0_i32 = arith.constant 0 : i32
    %c0_i32_0 = arith.constant 0 : i32
    %c0_i32_1 = arith.constant 0 : i32
    return %c0_i32, %c0_i32_0 : i32, i32
  }
  func.func @transform_2(%arg0: i32) -> (i32, i32) {
    %c0_i32 = arith.constant 0 : i32
    %c0_i32_0 = arith.constant 0 : i32
    %c0_i32_1 = arith.constant 0 : i32
    return %c0_i32, %c0_i32_0 : i32, i32
  }
  func.func @transform_3(%arg0: i32) -> (i32, i32, i32) {
    %c0_i32 = arith.constant 0 : i32
    %c0_i32_0 = arith.constant 0 : i32
    %c0_i32_1 = arith.constant 0 : i32
    %c0_i32_2 = arith.constant 0 : i32
    return %c0_i32, %c0_i32_0, %c0_i32_1 : i32, i32, i32
  }
  func.func @transform_4(%arg0: i32) -> (i32, i32) {
    %c0_i32 = arith.constant 0 : i32
    %c0_i32_0 = arith.constant 0 : i32
    %c0_i32_1 = arith.constant 0 : i32
    return %c0_i32, %c0_i32_0 : i32, i32
  }
  func.func @transform_5(%arg0: i32) -> (i32, i32) {
    %c0_i32 = arith.constant 0 : i32
    %c0_i32_0 = arith.constant 0 : i32
    %c0_i32_1 = arith.constant 0 : i32
    return %c0_i32, %c0_i32_0 : i32, i32
  }
  func.func @transform_6(%arg0: i32) -> (i32, i32) {
    %c0_i32 = arith.constant 0 : i32
    %c0_i32_0 = arith.constant 0 : i32
    %c0_i32_1 = arith.constant 0 : i32
    return %c0_i32, %c0_i32_0 : i32, i32
  }
  func.func @transform_7(%arg0: i32) -> (i32, i32, i32) {
    %c0_i32 = arith.constant 0 : i32
    %c0_i32_0 = arith.constant 0 : i32
    %c0_i32_1 = arith.constant 0 : i32
    return %arg0, %c0_i32, %c0_i32_0 : i32, i32, i32
  }
}

</mosaic_0001>

<bundles_post_ra>
// kernel: tpu_custom_call.1
= control target key start
LH: loop header
LB: loop body
LE: loop exit
PB: predicated region body
PF: predicated region fallthrough
CT: control target
= control target key end

     0   :  { %s9091_s0 = inlined_call_operand.hbm [shape: bf16[2,256,128], index: 0, kind: input, shape index: {}]   ;;  %s9092_s1 = inlined_call_operand.hbm [shape: bf16[128,128], index: 1, kind: input, shape index: {}]   ;;  %s9093_s2 = inlined_call_operand.hbm [shape: f32[2,128], index: 2, kind: input, shape index: {}]   ;;  %s9094_s3 = inlined_call_operand.hbm [shape: bf16[3,384,128], index: 3, kind: input, shape index: {}]   ;;  %s9095_s4 = inlined_call_operand.vmem [shape: f32[2,128], index: 4, kind: input, shape index: {}]   ;;  %s9096_s5 = inlined_call_operand.hbm [shape: bf16[128,128], index: 5, kind: input, shape index: {}]   ;;  %s9097_s6 = inlined_call_operand.vmem [shape: f32[2,128], index: 6, kind: input, shape index: {}]   ;;  %s9098_s7 = inlined_call_operand.hbm [shape: bf16[2,256,128], index: 7, kind: output, shape index: {}]  }
   0x1   :  { %9253 = sst [smem:[#allocation103_spill]] %s9092_s1 }
   0x2   :  { %12 = vsyncpa [#allocation4], 0 }
   0x3   :  { %14 = vsyncpa [#allocation4 + $0x1], 0 }
   0x4   :  { %15 = vsyncpa [#allocation7], 0 }
   0x5   :  { %16 = vsyncpa [#allocation10], 0 }
   0x6   :  { %17 = vsyncpa [#allocation5], 0 }
   0x7   :  { %19 = vsyncpa [#allocation5 + $0x1], 0  ;;  %s6438_s24 = smov 0   ;;  %s6440_s25 = smov 0  }
   0x8   :  { %s6442_s26 = smov 0   ;;  %s6444_s27 = smov 0  }
   0x9 LB: > { %s6459_s28 = sadd.s32 4294967295, %s6387_s27   ;;  %s5047_s29 = sadd.s32 4294967294, %s6387_s27   ;;  %s6387_s27 = sphi %s6444_s27, %s9816_s27   ;;  %s6383_s26 = sphi %s6442_s26, %s9815_s26   ;;  %s6379_s25 = sphi %s6440_s25, %s9814_s25   ;;  %s6375_s24 = sphi %s6438_s24, %s9813_s24  }
   0xa   : > { %p45_p0 = scmp.ne.s32.totalorder %s6379_s25, %s6375_s24  ;;  %p46_p1 = scmp.eq.s32.totalorder %s6459_s28, 0 }
   0xb   : > { %p195_p2 = scmp.eq.s32.totalorder %s6459_s28, 1  ;;  %p201_p3 = scmp.eq.s32.totalorder %s5047_s29, 1 }
   0xc   : > { %p6468_p4 = por %p46_p1, %p45_p0  ;;  %p5048_p5 = scmp.ge.s32.totalorder %s6387_s27, 1 }
   0xd   : > { %p6473_p6 = por %p201_p3, %p45_p0  ;;  %p208_p7 = scmp.lt.s32.totalorder %s6387_s27, 3 }
   0xe   : > { %s9256_s1 = sld [smem:[#allocation103_spill]]  ;;  %s6389_s13 = smov [#allocation6]  }
   0xf   : > { %p6481_p8 = pnand %p5048_p5, %p208_p7  ;;  %s221_s14 = sshll.u32 %s6389_s13, 4  ;;  %s222_s14 = int_to_ptr.vmem [resolvable:$true] %s221_s14 }
  0x10   : > { %s245_s18 = sshll.u32 %s9094_s3, 4  ;;  %s9099_s19 = smov 64   ;;  %s246_s18 = int_to_ptr.hbm [resolvable:$true] %s245_s18 }
  0x11   : > { %p6070_p9 = pneg %p6481_p8  ;;  %s9100_s20 = smov 4  }
  0x12   : > { %s6392_s21 = smov [#allocation9]   ;;  %s234_s9 = sshll.u32 %s9093_s2, 4  ;;  %s235_s9 = int_to_ptr.hbm [resolvable:$true] %s234_s9 }
  0x13   : > { %p6489_p10 = pnand %p6070_p9, %p46_p1  ;;  %s247_s22 = sshll.u32 %s6392_s21, 4  ;;  %s248_s22 = int_to_ptr.vmem [resolvable:$true] %s247_s22 }
  0x14   : > { %s219_s11 = sshll.u32 %s9256_s1, 4  ;;  %s262_s13 = sshll.u32 %s9096_s5, 4  ;;  %s220_s11 = int_to_ptr.hbm [resolvable:$true] %s219_s11  ;;  %s263_s13 = int_to_ptr.hbm [resolvable:$true] %s262_s13 }
  0x15   : > { %6073 = dma.hbm_to_vmem [thread:$0]  (!%p6489_p10), %s220_s11, 1024, %s222_s14, [#allocation7], %s9099_s19, %s9099_s19, %s9100_s20  }
  0x16   : > { %6079 = dma.hbm_to_vmem [thread:$0]  (!%p6489_p10), %s246_s18, 9216, %s248_s22, [#allocation10], %s9099_s19, %s9099_s19, %s9100_s20  }
  0x17   : > { %s6393_s14 = smov [#allocation8]   ;;  %s6394_s17 = smov [#allocation11]  }
  0x18   : > { %s236_s16 = sshll.u32 %s6393_s14, 4  ;;  %s264_s21 = sshll.u32 %s6394_s17, 4  ;;  %s237_s16 = int_to_ptr.vmem [resolvable:$true] %s236_s16  ;;  %s265_s21 = int_to_ptr.vmem [resolvable:$true] %s264_s21 }
  0x19   : > { %6076 = dma.hbm_to_vmem [thread:$0]  (!%p6489_p10), %s235_s9, 32, %s237_s16, [#allocation7]  }
  0x1a   : > { %6082 = dma.hbm_to_vmem [thread:$0]  (!%p6489_p10), %s263_s13, 1024, %s265_s21, [#allocation10], %s9099_s19, %s9099_s19, %s9100_s20  }
  0x1b   : > { %s6521_s18 = sadd.s32 1, %s6387_s27   ;;  %s32_s22 = sadd.s32 1, %s6383_s26 }
  0x1c   : > { %s29_s23 = ssub.s32 %s6387_s27, %s6521_s18  ;;  %p39_p12 = scmp.ne.s32.totalorder %s6383_s26, %s6379_s25 }
  0x1d   : > { %p30_p13 = scmp.eq.s32.totalorder %s29_s23, 0  ;;  %p40_p0 = scmp.eq.s32.totalorder %s6387_s27, 0 }
  0x1e   : > { %p6531_p3 = por %p195_p2, %p39_p12  ;;  %p6095_p5 = scmp.lt.s32.totalorder %s6387_s27, 2 }
  0x1f   : > { %s6537_s9 = scalar_select %p30_p13, %s6383_s26, %s32_s22  }
  0x20   : > { %p41_p7 = por %p40_p0, %p39_p12  ;;  %s281_s15 = sand.u32 1, %s6383_s26  }
  0x21   : > { %s5054_s10 = sshll.u32 %s281_s15, 7  ;;  %s5617_s11 = sshll.u32 %s6387_s27, 7 }
  0x22   : > { %s290_s16 = scalar_lea.hbm %s9091_s0, %s5617_s11  ;;  %s285_s17 = scalar_lea.vmem [#allocation3], %s5054_s10 }
  0x23   : > { %s293_s21 = sshll.u32 %s285_s17, 4  ;;  %s291_s23 = sshll.u32 %s290_s16, 4  ;;  %s294_s21 = int_to_ptr.vmem [resolvable:$true] %s293_s21  ;;  %s292_s23 = int_to_ptr.hbm [resolvable:$true] %s291_s23 }
  0x24   : > { %p6544_p2 = pnand %p6095_p5, %p41_p7  ;;  %s282_s22 = scalar_lea.sflag [#allocation4], %s281_s15 }
  0x25   : > { %s6283_s20 = sshra.s32 %s292_s23, 4  ;;  %s6290_s13 = scalar_lea.hbm %s9091_s0, 256  ;;  %s6284_s20 = int_to_ptr.hbm [resolvable:$true] %s6283_s20 }
  0x26   : > { %s6285_s1 = scalar_lea.hbm %s6284_s20, 128  ;;  %p6287_p10 = pneg %p6544_p2 }
  0x27   : > { %p6286_p9 = scmp.ne.s32.totalorder %s6284_s20, %s6285_s1  ;;  %p6291_p0 = scmp.lt.s32.totalorder %s6284_s20, %s9091_s0 }
  0x28   : > { %p6292_p5 = scmp.lt.s32.totalorder %s6290_s13, %s6285_s1 }
  0x29   : > { %p6288_p12 = pnand %p6287_p10, %p6286_p9 }
  0x2a   : > { %p6293_p7 = por %p6292_p5, %p6291_p0 }
  0x2b   : > { %p6289_p13 = pneg %p6288_p12 }
  0x2d   : > { %p6294_p11 = pnand %p6293_p7, %p6289_p13 }
  0x2f   : > { %6297 = shalt.err (!%p6294_p11)
}
  0x30   : > { %s9261_s15 = smov 4   ;;  %s9262_s17 = smov 64  }
  0x31   : > { %6086 = dma.hbm_to_vmem [thread:$0]  (!%p6544_p2), %s292_s23, 2048, %s294_s21, %s282_s22, %s9262_s17, %s9262_s17, %s9261_s15  }
  0x32   : > { %305 = sbr.rel (%p6481_p8) target bundleno = 1367 (0x557), region = 48 }
  0x37   : > { %s6564_s11 = sand.u32 1, %s6379_s25  }
  0x38   : > { %s5058_s1 = sshll.u32 %s6564_s11, 7  ;;  %s308_s20 = scalar_lea.sflag [#allocation4], %s6564_s11 }
  0x39   : > { %s6570_s10 = scalar_lea.vmem [#allocation3], %s5058_s1 }
  0x3a   : > { %6358 = dma.done.wait (%p6468_p4), %s308_s20, 2048  }
  0x3b   : > { %6360 = vsyncadd (%p6468_p4), %s308_s20, 4294965248 }
  0x3c   : > { %6362 = dma.done.wait (%p46_p1), [#allocation7], 1056  }
  0x3d   : > { %6364 = vsyncadd (%p46_p1), [#allocation7], 4294966240 }
  0x3e   : > { %6366 = dma.done.wait (%p46_p1), [#allocation10], 10240  }
  0x3f   : > { %6368 = vsyncadd (%p46_p1), [#allocation10], 4294957056  ;;  %v5641_v0 = vld [vmem:[#allocation6 + $0x38] sm:$0xff]  ;;  %v5640_v1 = vld [vmem:[#allocation6 + $0x30] sm:$0xff]  ;;  %v6395_v27 = vmov 0   ;;  %s8920_s16 = scalar_lea.vmem [#allocation12], %s5058_s1 }
  0x40   : > { %556 = vmatpush.bf16.msra.mxu0 %v5641_v0  ;;  %6026 = vmatpush.bf16.msra.mxu3 %v5641_v0  ;;  %v5639_v2 = vld [vmem:[#allocation6 + $0x28] sm:$0xff]  ;;  %v5638_v3 = vld [vmem:[#allocation6 + $0x20] sm:$0xff]  ;;  %v5637_v4 = vld [vmem:[#allocation6 + $0x18] sm:$0xff]  ;;  %745 = vst [vmem:[#allocation2] sm:$0xf] %v6395_v27  ;;  %s5755_s30 = sshll.u32 %s6459_s28, 7 }
  0x41   : > { %v5636_v5 = vld [vmem:[#allocation6 + $0x10] sm:$0xff]  ;;  %v5635_v6 = vld [vmem:[#allocation6 + $0x8] sm:$0xff]  ;;  %v5634_v7 = vld [vmem:[#allocation6] sm:$0xff]  ;;  %746 = vst [vmem:[#allocation2 + $0x4] sm:$0xf] %v6395_v27  ;;  %s4932_s21 = scalar_lea.hbm %s9098_s7, %s5755_s30  ;;  %s4921_s28 = scalar_lea.sflag [#allocation5], %s6564_s11 }
  0x42   : > { %v5618_v8 = vld [vmem:[%s6570_s10] sm:$0xff]  ;;  %v5619_v10 = vld [vmem:[%s6570_s10 + $0x8] sm:$0xff]  ;;  %v5620_v12 = vld [vmem:[%s6570_s10 + $0x10] sm:$0xff]  ;;  %747 = vst [vmem:[#allocation2 + $0x88] sm:$0xf] %v6395_v27  ;;  %s4935_s23 = sshll.u32 %s4932_s21, 4  ;;  %s4936_s23 = int_to_ptr.hbm [resolvable:$true] %s4935_s23 }
  0x43   : > { %v5630_v9 = vld [vmem:[%s6570_s10 + $0x60] sm:$0xff]  ;;  %v5631_v11 = vld [vmem:[%s6570_s10 + $0x68] sm:$0xff]  ;;  %v5632_v13 = vld [vmem:[%s6570_s10 + $0x70] sm:$0xff]  ;;  %748 = vst [vmem:[#allocation2 + $0x8c] sm:$0xf] %v6395_v27  ;;  %s6327_s22 = sshra.s32 %s4936_s23, 4  ;;  %s6328_s22 = int_to_ptr.hbm [resolvable:$true] %s6327_s22 }
  0x44   : > { %557 = vmatpush.bf16.msra.mxu0 %v5640_v1  ;;  %6027 = vmatpush.bf16.msra.mxu3 %v5640_v1  ;;  %v5621_v14 = vld [vmem:[%s6570_s10 + $0x18] sm:$0xff]  ;;  %v5622_v16 = vld [vmem:[%s6570_s10 + $0x20] sm:$0xff]  ;;  %v5623_v17 = vld [vmem:[%s6570_s10 + $0x28] sm:$0xff]  ;;  %s6329_s13 = scalar_lea.hbm %s6328_s22, 128  ;;  %s6333_s17 = scalar_lea.hbm %s9098_s7, 256 }
  0x45   : > { %v5633_v15 = vld [vmem:[%s6570_s10 + $0x78] sm:$0xff]  ;;  %v5624_v20 = vld [vmem:[%s6570_s10 + $0x30] sm:$0xff]  ;;  %v6604_v22 = vld [vmem:[#allocation9 + $0x120] sm:$0xff]  ;;  %p6330_p1 = scmp.ne.s32.totalorder %s6328_s22, %s6329_s13  ;;  %p6334_p11 = scmp.lt.s32.totalorder %s6328_s22, %s9098_s7 }
  0x46   : > { %v6594_v18 = vld [vmem:[#allocation9 + $0x138] sm:$0xff]  ;;  %v6597_v19 = vld [vmem:[#allocation9 + $0x130] sm:$0xff]  ;;  %v6601_v21 = vld [vmem:[#allocation9 + $0x128] sm:$0xff]  ;;  %p6335_p2 = scmp.lt.s32.totalorder %s6333_s17, %s6329_s13 }
  0x47   : > { %2702 = vmatpush.bf16.msra.mxu2 %v6594_v18  ;;  %v6607_v23 = vld [vmem:[#allocation9 + $0x118] sm:$0xff]  ;;  %v6610_v24 = vld [vmem:[#allocation9 + $0x110] sm:$0xff]  ;;  %v6614_v26 = vld [vmem:[#allocation9 + $0x108] sm:$0xff]  ;;  %p6331_p4 = pnand %p6330_p1, %p6531_p3 }
  0x48   : > { %558 = vmatpush.bf16.msra.mxu0 %v5639_v2  ;;  %6028 = vmatpush.bf16.msra.mxu3 %v5639_v2  ;;  %v5625_v25 = vld [vmem:[%s6570_s10 + $0x38] sm:$0xff]  ;;  %v6617_v28 = vld [vmem:[#allocation9 + $0x100] sm:$0xff]  ;;  %v6621_v31 = vld [vmem:[#allocation8] ss:$0 sm:$0xff]  ;;  %p6336_p9 = por %p6335_p2, %p6334_p11 }
  0x49   : > { %v5626_v29 = vld [vmem:[%s6570_s10 + $0x40] sm:$0xff]  ;;  %v5664_v45 = vld [vmem:[#allocation9 + $0x30] sm:$0xff]  ;;  %v5627_v48 = vld [vmem:[%s6570_s10 + $0x48] sm:$0xff]  ;;  %p6332_p8 = pneg %p6331_p4 }
  0x4a   : > { %v6624_v33 = vld [vmem:[#allocation8 + $0x1] ss:$0 sm:$0xff]  ;;  %v5663_v52 = vld [vmem:[#allocation9 + $0x28] sm:$0xff]  ;;  %v5662_v57 = vld [vmem:[#allocation9 + $0x20] sm:$0xff] }
  0x4b   : > { %2703 = vmatpush.bf16.msra.mxu2 %v6597_v19  ;;  %v5665_v39 = vld [vmem:[#allocation9 + $0x38] sm:$0xff]  ;;  %p6337_p10 = pnand %p6336_p9, %p6332_p8 }
  0x4c   : > { %559 = vmatpush.bf16.msra.mxu0 %v5638_v3  ;;  %6029 = vmatpush.bf16.msra.mxu3 %v5638_v3  ;;  %v5690_v63 = vld [vmem:[#allocation9 + $0xf8] sm:$0xff] }
  0x4d   : > { %v5661_v0 = vld [vmem:[#allocation9 + $0x18] sm:$0xff]  ;;  %2613 = vmatpush.bf16.msra.mxu1 %v5690_v63 }
  0x4f   : > { %2704 = vmatpush.bf16.msra.mxu2 %v6601_v21 }
  0x50   : > { %560 = vmatpush.bf16.msra.mxu0 %v5637_v4  ;;  %6030 = vmatpush.bf16.msra.mxu3 %v5637_v4 }
  0x53   : > { %2705 = vmatpush.bf16.msra.mxu2 %v6604_v22 }
  0x54   : > { %561 = vmatpush.bf16.msra.mxu0 %v5636_v5  ;;  %6031 = vmatpush.bf16.msra.mxu3 %v5636_v5 }
  0x57   : > { %2706 = vmatpush.bf16.msra.mxu2 %v6607_v23 }
  0x58   : > { %562 = vmatpush.bf16.msra.mxu0 %v5635_v6  ;;  %6032 = vmatpush.bf16.msra.mxu3 %v5635_v6  ;;  %v5689_v6 = vld [vmem:[#allocation9 + $0xf0] sm:$0xff] }
  0x59   : > { %2614 = vmatpush.bf16.msra.mxu1 %v5689_v6 }
  0x5b   : > { %2707 = vmatpush.bf16.msra.mxu2 %v6610_v24 }
  0x5c   : > { %563 = vmatpush.bf16.msra.mxu0 %v5634_v7  ;;  %6033 = vmatpush.bf16.msra.mxu3 %v5634_v7  ;;  %v5660_v7 = vld [vmem:[#allocation9 + $0x10] sm:$0xff] }
  0x5f   : > { %564 = vmatmul.bf16.vlgmr.msra.gmra.mxu0 %v5618_v8  ;;  %624 = vmatmul.bf16.vlgmr.msra.gmra.mxu3 %v5630_v9 }
  0x60   : > { %2708 = vmatpush.bf16.msra.mxu2 %v6614_v26  ;;  %3024 = vmatpush.bf16.msrb.mxu0 %v5665_v39 }
  0x61   : > { %6034 = vmatpush.bf16.msrb.mxu3 %v5690_v63  ;;  %v9264_v63 = vmov 0 }
  0x64   : > { %2709 = vmatpush.bf16.msra.mxu2 %v6617_v28  ;;  %3025 = vmatpush.bf16.msrb.mxu0 %v5664_v45 }
  0x65   : > { %6035 = vmatpush.bf16.msrb.mxu3 %v5689_v6  ;;  %v9267_v6 = vmov 0 }
  0x68   : > { %3026 = vmatpush.bf16.msrb.mxu0 %v5663_v52 }
  0x6c   : > { %3027 = vmatpush.bf16.msrb.mxu0 %v5662_v57 }
  0x6f   : > { %569 = vmatmul.bf16.gmra.mxu0 %v5619_v10  ;;  %629 = vmatmul.bf16.gmra.mxu3 %v5631_v11  ;;  %v5628_v10 = vld [vmem:[%s6570_s10 + $0x50] sm:$0xff] }
  0x70   : > { %3028 = vmatpush.bf16.msrb.mxu0 %v5661_v0 }
  0x74   : > { %3029 = vmatpush.bf16.msrb.mxu0 %v5660_v7  ;;  %v5684_v7 = vld [vmem:[#allocation9 + $0xc8] sm:$0xff] }
  0x7f   : > { %574 = vmatmul.bf16.gmra.mxu0 %v5620_v12  ;;  %634 = vmatmul.bf16.gmra.mxu3 %v5632_v13  ;;  %v813_v12 = vlaneseq }
  0x8f   : > { %579 = vmatmul.bf16.gmra.mxu0 %v5621_v14  ;;  %639 = vmatmul.bf16.gmra.mxu3 %v5633_v15  ;;  %v5688_v15 = vld [vmem:[#allocation9 + $0xe8] sm:$0xff] }
  0x90   : > { %2615 = vmatpush.bf16.msra.mxu1 %v5688_v15  ;;  %6036 = vmatpush.bf16.msrb.mxu3 %v5688_v15 }
  0x9f   : > { %584 = vmatmul.bf16.gmra.mxu0 %v5622_v16  ;;  %v5659_v16 = vld [vmem:[#allocation9 + $0x8] sm:$0xff] }
  0xa0   : > { %3030 = vmatpush.bf16.msrb.mxu0 %v5659_v16 }
  0xaf   : > { %589 = vmatmul.bf16.gmra.mxu0 %v5623_v17 }
  0xbf   : > { %594 = vmatmul.bf16.gmra.mxu0 %v5624_v20 }
  0xcf   : > { %599 = vmatmul.bf16.gmra.mxu0 %v5625_v25  ;;  %v6644_v25 = vshrl.u32 %v813_v12, 7  ;;  %v6699_v12 = vld [vmem:[#allocation2] sm:$0xff]  }
  0xd1   : > { %vm9136_vm0 = vcmp.lt.s32.totalorder %v6644_v25, 7  ;;  %vm9131_vm3 = vcmp.lt.s32.totalorder %v6644_v25, 1 }
  0xdc   : > { %v565_v30 = vpop.f32.mrf.mxu0 }
  0xdd   : > { %v647_v32 = vmul.f32 %v6621_v31, %v565_v30 }
  0xdf   : > { %604 = vmatmul.bf16.gmra.mxu0 %v5626_v29  ;;  %v681_v36 = vadd.f32 %v6624_v33, %v647_v32  ;;  %v5687_v32 = vld [vmem:[#allocation9 + $0xe0] sm:$0xff] }
  0xe0   : > { %2616 = vmatpush.bf16.msra.mxu1 %v5687_v32  ;;  %6037 = vmatpush.bf16.msrb.mxu3 %v5687_v32 }
  0xe1   : > { %v713_v41 = vmax.f32 %v681_v36, 0.0 }
  0xe2   : > { %v625_v34 = vpop.f32.mrf.mxu3 }
  0xe3   : > { %v671_v37 = vmul.f32 %v6621_v31, %v625_v34  ;;  %v5658_v34 = vld [vmem:[#allocation9] sm:$0xff] }
  0xe4   : > { %v567_v35 = vpop.f32.mrf.mxu0  ;;  %3031 = vmatpush.bf16.msrb.mxu0 %v5658_v34  ;;  %v9102_v34 = vunpack.c.l.bf16 %v6699_v12 }
  0xe5   : > { %v648_v38 = vmul.f32 %v6621_v31, %v567_v35  ;;  %v705_v42 = vadd.f32 %v6624_v33, %v671_v37  ;;  %v817_v37 = vadd.s32 24, %v6644_v25 }
  0xe7   : > { %v682_v40 = vadd.f32 %v6624_v33, %v648_v38  ;;  %v737_v50 = vmax.f32 %v705_v42, 0.0  ;;  %v815_v42 = vadd.s32 8, %v6644_v25 }
  0xe9   : > { %v714_v43 = vmax.f32 %v682_v40, 0.0  ;;  %v857_v57 = vand.u32 15, %v815_v42 }
  0xea   : > { %v627_v44 = vpop.f32.mrf.mxu3 }
  0xeb   : > { %v5759_v46 = vpack.c.bf16 %v714_v43, %v713_v41  ;;  %v672_v47 = vmul.f32 %v6621_v31, %v627_v44  ;;  %vm6691_vm2 = vcmp.le.s32.totalorder %v857_v57, 14 }
  0xec   : > { %v570_v49 = vpop.f32.mrf.mxu0  ;;  %v9268_v6 = vsel %vm6691_vm2, 4294967295, %v9267_v6 }
  0xed   : > { %5980 = vst [vmem:[#allocation2 + $0x8] sm:$0xff] %v5759_v46   ;;  %v706_v51 = vadd.f32 %v6624_v33, %v672_v47  ;;  %v649_v55 = vmul.f32 %v6621_v31, %v570_v49  ;;  %v5686_v47 = vld [vmem:[#allocation9 + $0xd8] sm:$0xff] }
  0xee   : > { %2617 = vmatpush.bf16.msra.mxu1 %v5686_v47  ;;  %6038 = vmatpush.bf16.msrb.mxu3 %v5686_v47  ;;  %9269 = vst [vmem:[#allocation19_spill] sm:$0xff] %v9268_v6 }
  0xef   : > { %v738_v53 = vmax.f32 %v706_v51, 0.0  ;;  %609 = vmatmul.bf16.gmra.mxu0 %v5627_v48  ;;  %v683_v60 = vadd.f32 %v6624_v33, %v649_v55 }
  0xf1   : > { %v5819_v54 = vpack.c.bf16 %v738_v53, %v737_v50  ;;  %v715_v2 = vmax.f32 %v683_v60, 0.0  ;;  %v871_v50 = vand.u32 15, %v817_v37 }
  0xf2   : > { %v630_v56 = vpop.f32.mrf.mxu3 }
  0xf3   : > { %5992 = vst [vmem:[#allocation2 + $0x68] sm:$0xff] %v5819_v54   ;;  %v673_v61 = vmul.f32 %v6621_v31, %v630_v56  ;;  %vm6676_vm1 = vcmp.le.s32.totalorder %v871_v50, 14  ;;  %v1358_v50 = vrot.slane %v9102_v34, 7 }
  0xf4   : > { %v572_v58 = vpop.f32.mrf.mxu0  ;;  %v5643_v59 = vld [vmem:[#allocation2 + $0x8] sm:$0xff]  ;;  %v9265_v63 = vsel %vm6676_vm1, 4294967295, %v9264_v63 }
  0xf5   : > { %v650_v62 = vmul.f32 %v6621_v31, %v572_v58  ;;  %2710 = vmatmul.bf16.vlgmr.msra.gmra.mxu2 %v5643_v59  ;;  %v707_v3 = vadd.f32 %v6624_v33, %v673_v61  ;;  %v6646_v27 = vld [vmem:[#allocation2 + $0x8] sm:$0xff]   ;;  %9266 = vst [vmem:[#allocation18_spill] sm:$0xff] %v9265_v63 }
  0xf6   : > { %v1328_v35 = vunpack.c.l.bf16 %v6646_v27  ;;  %v1329_v36 = vunpack.c.h.bf16 %v6646_v27  ;;  %v5685_v59 = vld [vmem:[#allocation9 + $0xd0] sm:$0xff] }
  0xf7   : > { %v684_v1 = vadd.f32 %v6624_v33, %v650_v62  ;;  %v739_v13 = vmax.f32 %v707_v3, 0.0  ;;  %v5629_v62 = vld [vmem:[%s6570_s10 + $0x58] sm:$0xff]  ;;  %2618 = vmatpush.bf16.msra.mxu1 %v5685_v59  ;;  %6039 = vmatpush.bf16.msrb.mxu3 %v5685_v59 }
  0xf8   : > { %v6662_v49 = vrot.slane %v1328_v35, 1  ;;  %v1522_v51 = vrot.slane %v1329_v36, 1 }
  0xf9   : > { %v716_v4 = vmax.f32 %v684_v1, 0.0 }
  0xfa   : > { %v632_v5 = vpop.f32.mrf.mxu3  ;;  %9263 = vst [vmem:[#allocation17_spill] sm:$0xff] %v6662_v49  ;;  %v1580_v0 = vsel %vm9136_vm0, %v6662_v49, %v1522_v51 }
  0xfb   : > { %v5764_v8 = vpack.c.bf16 %v716_v4, %v715_v2  ;;  %v674_v9 = vmul.f32 %v6621_v31, %v632_v5  ;;  %2619 = vmatpush.bf16.msra.mxu1 %v5684_v7  ;;  %6040 = vmatpush.bf16.msrb.mxu3 %v5684_v7  ;;  %v819_v7 = vadd.s32 40, %v6644_v25 }
  0xfc   : > { %v575_v11 = vpop.f32.mrf.mxu0 }
  0xfd   : > { %5981 = vst [vmem:[#allocation2 + $0x10] sm:$0xff] %v5764_v8   ;;  %v708_v14 = vadd.f32 %v6624_v33, %v674_v9  ;;  %v651_v20 = vmul.f32 %v6621_v31, %v575_v11  ;;  %v1714_v9 = vpack.c.bf16 %v1580_v0, %v1580_v0 }
  0xff   : > { %v740_v17 = vmax.f32 %v708_v14, 0.0  ;;  %614 = vmatmul.bf16.gmra.mxu0 %v5628_v10  ;;  %v685_v38 = vadd.f32 %v6624_v33, %v651_v20  ;;  %v5683_v20 = vld [vmem:[#allocation9 + $0xc0] sm:$0xff] }
 0x100   : > { %2620 = vmatpush.bf16.msra.mxu1 %v5683_v20  ;;  %6041 = vmatpush.bf16.msrb.mxu3 %v5683_v20 }
 0x101   : > { %v5824_v29 = vpack.c.bf16 %v740_v17, %v739_v13  ;;  %v717_v54 = vmax.f32 %v685_v38, 0.0 }
 0x102   : > { %v635_v30 = vpop.f32.mrf.mxu3 }
 0x103   : > { %5993 = vst [vmem:[#allocation2 + $0x70] sm:$0xff] %v5824_v29   ;;  %v675_v43 = vmul.f32 %v6621_v31, %v635_v30  ;;  %v6702_v29 = vunpack.c.l.b16 %v1714_v9 }
 0x104   : > { %v577_v39 = vpop.f32.mrf.mxu0  ;;  %v5644_v40 = vld [vmem:[#allocation2 + $0x10] sm:$0xff]  ;;  %6042 = vmatpush.bf16.msra.mxu3 %v6594_v18 }
 0x105   : > { %v6652_v41 = vld [vmem:[#allocation2 + $0x10] sm:$0xff]   ;;  %v652_v44 = vmul.f32 %v6621_v31, %v577_v39  ;;  %2715 = vmatmul.bf16.gmra.mxu2 %v5644_v40  ;;  %v709_v55 = vadd.f32 %v6624_v33, %v675_v43  ;;  %v9104_v39 = vunpack.c.h.bf16 %v6699_v12  ;;  %v816_v40 = vadd.s32 16, %v6644_v25 }
 0x106   : > { %v1330_v45 = vunpack.c.l.bf16 %v6652_v41  ;;  %v1331_v46 = vunpack.c.h.bf16 %v6652_v41 }
 0x107   : > { %v686_v48 = vadd.f32 %v6624_v33, %v652_v44  ;;  %v741_v4 = vmax.f32 %v709_v55, 0.0  ;;  %v864_v55 = vand.u32 15, %v816_v40 }
 0x108   : > { %v1523_v52 = vrot.slane %v1330_v45, 1  ;;  %v6671_v53 = vrot.slane %v1331_v46, 1  ;;  %6043 = vmatpush.bf16.msra.mxu3 %v6597_v19 }
 0x109   : > { %v718_v56 = vmax.f32 %v686_v48, 0.0  ;;  %vm6742_vm4 = vcmp.ge.s32.totalorder %v864_v55, 1 }
 0x10a   : > { %v637_v58 = vpop.f32.mrf.mxu3  ;;  %v1579_v2 = vsel %vm9136_vm0, %v1522_v51, %v1523_v52  ;;  %v6688_v3 = vsel %vm9136_vm0, %v1523_v52, %v6671_v53  ;;  %v1359_v52 = vrot.slane %v9104_v39, 7 }
 0x10b   : > { %v5769_v60 = vpack.c.bf16 %v718_v56, %v717_v54  ;;  %v676_v61 = vmul.f32 %v6621_v31, %v637_v58  ;;  %v1651_v8 = vsel %vm6676_vm1, %v1579_v2, 0.0  ;;  %v2127_v10 = vsel %vm6691_vm2, %v1579_v2, 0.0 }
 0x10c   : > { %v580_v1 = vpop.f32.mrf.mxu0  ;;  %v1715_v13 = vpack.c.bf16 %v1651_v8, %v1651_v8  ;;  %v2191_v14 = vpack.c.bf16 %v2127_v10, %v2127_v10  ;;  %v6726_v54 = vrot.slane %v1328_v35, 7  ;;  %v1421_v18 = vsel %vm9131_vm3, %v1358_v50, %v1359_v52  ;;  %6044 = vmatpush.bf16.msra.mxu3 %v6601_v21 }
 0x10d   : > { %5982 = vst [vmem:[#allocation2 + $0x18] sm:$0xff] %v5769_v60   ;;  %v710_v5 = vadd.f32 %v6624_v33, %v676_v61  ;;  %v653_v16 = vmul.f32 %v6621_v31, %v580_v1  ;;  %v850_v35 = vand.u32 15, %v6644_v25  ;;  %v1681_v27 = vpack.c.bf16 %v1421_v18, %v1421_v18 }
 0x10e   : > { %v6704_v30 = vunpack.c.l.b16 %v1715_v13  ;;  %v6706_v32 = vunpack.c.l.b16 %v2191_v14  ;;  %v1420_v19 = vsel %vm9131_vm3, %v1359_v52, %v6726_v54  ;;  %v9274_v14 = vmov 0 }
 0x10f   : > { %v742_v11 = vmax.f32 %v710_v5, 0.0  ;;  %619 = vmatmul.bf16.gmra.mxu0 %v5629_v62  ;;  %v687_v44 = vadd.f32 %v6624_v33, %v653_v16  ;;  %v9271_v5 = vmov 0  ;;  %vm6758_vm5 = vcmp.ge.s32.totalorder %v850_v35, 1  ;;  %v6799_v35 = vld [vmem:[#allocation2 + $0x6c] sm:$0xff]  }
 0x110   : > { %9270 = vst [vmem:[#allocation20_spill] sm:$0xff] %v6706_v32  ;;  %v9272_v5 = vsel %vm6742_vm4, 4294967295, %v9271_v5  ;;  %v9275_v14 = vsel %vm6758_vm5, 4294967295, %v9274_v14  ;;  %v1489_v20 = vsel %vm6742_vm4, %v1420_v19, 0.0  ;;  %v885_v21 = vand.u32 15, %v819_v7  ;;  %6045 = vmatpush.bf16.msra.mxu3 %v6604_v22 }
 0x111   : > { %v5829_v15 = vpack.c.bf16 %v742_v11, %v741_v4  ;;  %v719_v56 = vmax.f32 %v687_v44, 0.0  ;;  %v1361_v4 = vrot.slane %v1329_v36, 7  ;;  %9273 = vst [vmem:[#allocation21_spill] sm:$0xff] %v9272_v5  ;;  %v818_v36 = vadd.s32 32, %v6644_v25 }
 0x112   : > { %v640_v17 = vpop.f32.mrf.mxu3  ;;  %9276 = vst [vmem:[#allocation22_spill] sm:$0xff] %v9275_v14  ;;  %v1777_v44 = vunpack.c.l.b16 %v1681_v27  ;;  %v1682_v52 = vpack.c.bf16 %v1489_v20, %v1489_v20  ;;  %vm6780_vm6 = vcmp.le.s32.totalorder %v885_v21, 14  ;;  %v6816_v27 = vrot.slane %v1331_v46, 7 }
 0x113   : > { %5994 = vst [vmem:[#allocation2 + $0x78] sm:$0xff] %v5829_v15   ;;  %v677_v47 = vmul.f32 %v6621_v31, %v640_v17  ;;  %v1419_v17 = vsel %vm9131_vm3, %v6726_v54, %v1361_v4  ;;  %v9106_v20 = vunpack.c.h.bf16 %v6799_v35 }
 0x114   : > { %v582_v37 = vpop.f32.mrf.mxu0  ;;  %v5645_v38 = vld [vmem:[#allocation2 + $0x18] sm:$0xff]  ;;  %6046 = vmatpush.bf16.msra.mxu3 %v6607_v23  ;;  %v6805_v19 = vunpack.c.l.b16 %v1682_v52 }
 0x115   : > { %v654_v48 = vmul.f32 %v6621_v31, %v582_v37  ;;  %2720 = vmatmul.bf16.gmra.mxu2 %v5645_v38  ;;  %v711_v57 = vadd.f32 %v6624_v33, %v677_v47  ;;  %v6738_v1 = vld [vmem:[#allocation2 + $0x18] sm:$0xff]   ;;  %v878_v47 = vand.u32 15, %v818_v36  ;;  %v842_v36 = vadd.s32 224, %v6644_v25 }
 0x116   : > { %v1332_v11 = vunpack.c.l.bf16 %v6738_v1 }
 0x117   : > { %v688_v51 = vadd.f32 %v6624_v33, %v654_v48  ;;  %v743_v8 = vmax.f32 %v711_v57, 0.0  ;;  %v1362_v57 = vrot.slane %v1330_v45, 7  ;;  %vm6792_vm7 = vcmp.ge.s32.totalorder %v878_v47, 1 }
 0x118   : > { %v6776_v48 = vrot.slane %v1332_v11, 1  ;;  %v6797_v45 = vadd.s32 48, %v6644_v25  ;;  %6047 = vmatpush.bf16.msra.mxu3 %v6610_v24  ;;  %v1716_v47 = vpack.c.bf16 %v6688_v3, %v6688_v3 }
 0x119   : > { %v720_v58 = vmax.f32 %v688_v51, 0.0  ;;  %v1683_v51 = vpack.c.bf16 %v1419_v17, %v1419_v17  ;;  %v1418_v23 = vsel %vm9131_vm3, %v1361_v4, %v1362_v57  ;;  %v9107_v17 = vunpack.c.l.bf16 %v6799_v35 }
 0x11a   : > { %v642_v59 = vpop.f32.mrf.mxu3  ;;  %v6730_v60 = vld [vmem:[#allocation2 + $0x7c] sm:$0xf]  ;;  %v6788_v22 = vsel %vm9136_vm0, %v6671_v53, %v6776_v48  ;;  %v6839_v52 = vsel %vm9131_vm3, %v1362_v57, %v6816_v27 }
 0x11b   : > { %v5774_v61 = vpack.c.bf16 %v720_v58, %v719_v56  ;;  %v678_v62 = vmul.f32 %v6621_v31, %v642_v59  ;;  %v9103_v0 = vunpack.c.l.bf16 %v6730_v60  ;;  %v9277_v58 = vmov 0 }
 0x11c   : > { %v585_v2 = vpop.f32.mrf.mxu0  ;;  %v9278_v58 = vsel %vm6780_vm6, 4294967295, %v9277_v58  ;;  %v6851_v3 = vrot.slane %v9107_v17, 7  ;;  %6048 = vmatpush.bf16.msra.mxu3 %v6614_v26 }
 0x11d   : > { %5983 = vst [vmem:[#allocation2 + $0x20] sm:$0xff] %v5774_v61   ;;  %v712_v9 = vadd.f32 %v6624_v33, %v678_v62  ;;  %v6753_v10 = vrot.slane %v9103_v0, 7  ;;  %v655_v38 = vmul.f32 %v6621_v31, %v585_v2  ;;  %v9280_v62 = vmov 0 }
 0x11e   : > { %9279 = vst [vmem:[#allocation23_spill] sm:$0xff] %v9278_v58  ;;  %v9281_v62 = vsel %vm6792_vm7, 4294967295, %v9280_v62  ;;  %v6803_v2 = vunpack.c.l.b16 %v1683_v51 }
 0x11f   : > { %v744_v13 = vmax.f32 %v712_v9, 0.0  ;;  %v1422_v15 = vsel %vm9131_vm3, %v6753_v10, %v1358_v50  ;;  %v689_v59 = vadd.f32 %v6624_v33, %v655_v38  ;;  %9282 = vst [vmem:[#allocation24_spill] sm:$0xff] %v9281_v62  ;;  %v1653_v9 = vsel %vm6780_vm6, %v6788_v22, 0.0 }
 0x120   : > { %v1487_v16 = vsel %vm6758_vm5, %v1422_v15, 0.0  ;;  %v1717_v38 = vpack.c.bf16 %v1653_v9, %v1653_v9  ;;  %v1809_v51 = vpack.c.b16 %v6803_v2, %v6805_v19  ;;  %6049 = vmatpush.bf16.msra.mxu3 %v6617_v28 }
 0x121   : > { %v5834_v37 = vpack.c.bf16 %v744_v13, %v743_v8  ;;  %v1680_v40 = vpack.c.bf16 %v1487_v16, %v1487_v16  ;;  %v6809_v8 = vld [vmem:[#allocation2 + $0x74] sm:$0xff]   ;;  %v821_v13 = vadd.s32 56, %v6644_v25  ;;  %v721_v15 = vmax.f32 %v689_v59, 0.0 }
 0x122   : > { %v9105_v46 = vunpack.c.l.bf16 %v6809_v8  ;;  %v6847_v59 = vsel %vm6792_vm7, %v1418_v23, 0.0 }
 0x123   : > { %5995 = vst [vmem:[#allocation2 + $0x80] sm:$0xff] %v5834_v37   ;;  %v1776_v50 = vunpack.c.l.b16 %v1680_v40  ;;  %v1333_v37 = vunpack.c.h.bf16 %v6738_v1 }
 0x124   : > { %v587_v55 = vpop.f32.mrf.mxu0  ;;  %v5646_v56 = vld [vmem:[#allocation2 + $0x20] sm:$0xff]  ;;  %v6857_v57 = vrot.slane %v9105_v46, 7  ;;  %v1684_v46 = vpack.c.bf16 %v6847_v59, %v6847_v59 }
 0x125   : > { %v656_v18 = vmul.f32 %v6621_v31, %v587_v55  ;;  %v1808_v61 = vpack.c.b16 %v1777_v44, %v1776_v50  ;;  %2725 = vmatmul.bf16.gmra.mxu2 %v5646_v56  ;;  %v6807_v7 = vld [vmem:[#allocation2 + $0x20] sm:$0xff]   ;;  %v892_v44 = vand.u32 15, %v6797_v45  ;;  %v1046_v55 = vand.u32 15, %v842_v36 }
 0x126   : > { %v9108_v41 = vunpack.c.l.bf16 %v6807_v7  ;;  %v899_v56 = vand.u32 15, %v821_v13  ;;  %v1685_v36 = vpack.c.bf16 %v6839_v52, %v6839_v52  ;;  %v2091_v13 = vsel %vm6742_vm4, %v1418_v23, 0.0 }
 0x127   : > { %v690_v53 = vadd.f32 %v6624_v33, %v656_v18  ;;  %3032 = vmatmul.bf16.vlgmr.msrb.gmra.mxu0 %v1808_v61  ;;  %v1386_v18 = vrot.slane %v9106_v20, 7  ;;  %v6859_v61 = vunpack.c.l.b16 %v1717_v38  ;;  %vm6879_vm8 = vcmp.ge.s32.totalorder %v1046_v55, 1 }
 0x128   : > { %v1527_v19 = vrot.slane %v9108_v41, 1  ;;  %v9284_v38 = vmov 0  ;;  %vm6883_vm9 = vcmp.le.s32.totalorder %v899_v56, 14  ;;  %vm6952_vm11 = vcmp.ge.s32.totalorder %v892_v44, 1 }
 0x129   : > { %v722_v16 = vmax.f32 %v690_v53, 0.0  ;;  %v1526_v53 = vrot.slane %v1333_v37, 1  ;;  %v9285_v38 = vsel %vm6879_vm8, 4294967295, %v9284_v38  ;;  %v6891_v23 = vsel %vm9131_vm3, %v6851_v3, %v1386_v18 }
 0x12a   : > { %v6824_v21 = vld [vmem:[#allocation2 + $0x84] sm:$0xf]  ;;  %9286 = vst [vmem:[#allocation26_spill] sm:$0xff] %v9285_v38  ;;  %v1393_v55 = vsel %vm9131_vm3, %v1386_v18, %v6857_v57  ;;  %v1515_v34 = vsel %vm6879_vm8, %v6891_v23, 0.0 }
 0x12b   : > { %9283 = vst [vmem:[#allocation25_spill] sm:$0xff] %v6824_v21  ;;  %v5779_v4 = vpack.c.bf16 %v722_v16, %v721_v15  ;;  %v9101_v40 = vunpack.c.l.bf16 %v6824_v21  ;;  %v6874_v15 = vunpack.c.l.b16 %v1716_v47  ;;  %v9109_v16 = vunpack.c.h.bf16 %v6807_v7 }
 0x12c   : > { %v590_v50 = vpop.f32.mrf.mxu0  ;;  %v6900_v56 = vsel %vm9136_vm0, %v1526_v53, %v1527_v19  ;;  %v1709_v20 = vpack.c.bf16 %v1393_v55, %v1393_v55  ;;  %v1708_v59 = vpack.c.bf16 %v1515_v34, %v1515_v34 }
 0x12d   : > { %5984 = vst [vmem:[#allocation2 + $0x28] sm:$0xff] %v5779_v4   ;;  %v6843_v24 = vrot.slane %v9101_v40, 7  ;;  %v9287_v4 = vmov 0  ;;  %v844_v40 = vadd.s32 240, %v6644_v25  ;;  %v1528_v28 = vrot.slane %v9109_v16, 1 }
 0x12e   : > { %v9288_v4 = vsel %vm6883_vm9, 4294967295, %v9287_v4 }
 0x12f   : > { %v2088_v9 = vsel %vm9131_vm3, %v6843_v24, %v6726_v54  ;;  %9289 = vst [vmem:[#allocation27_spill] sm:$0xff] %v9288_v4  ;;  %v657_v54 = vmul.f32 %v6621_v31, %v590_v50  ;;  %v1576_v50 = vsel %vm9136_vm0, %v6776_v48, %v1526_v53  ;;  %v823_v48 = vadd.s32 72, %v6644_v25 }
 0x130   : > { %v2089_v26 = vsel %vm6758_vm5, %v2088_v9, 0.0  ;;  %v2160_v9 = vpack.c.bf16 %v2091_v13, %v2091_v13  ;;  %v1655_v13 = vsel %vm6883_vm9, %v6900_v56, 0.0  ;;  %v1718_v43 = vpack.c.bf16 %v1576_v50, %v1576_v50 }
 0x131   : > { %v2158_v52 = vpack.c.bf16 %v2089_v26, %v2089_v26  ;;  %v1719_v0 = vpack.c.bf16 %v1655_v13, %v1655_v13  ;;  %v691_v53 = vadd.f32 %v6624_v33, %v657_v54  ;;  %v1060_v54 = vand.u32 15, %v844_v40 }
 0x132   : > { %v6924_v17 = vunpack.c.l.b16 %v1718_v43  ;;  %v913_v16 = vand.u32 15, %v823_v48  ;;  %v1574_v43 = vsel %vm9136_vm0, %v1527_v19, %v1528_v28  ;;  %v9290_v40 = vmov 0 }
 0x133   : > { %v2254_v26 = vunpack.c.l.b16 %v2158_v52  ;;  %v6926_v13 = vunpack.c.l.b16 %v1719_v0  ;;  %v723_v0 = vmax.f32 %v691_v53, 0.0  ;;  %v6943_v48 = vunpack.c.l.b16 %v1709_v20 }
 0x134   : > { %v592_v47 = vpop.f32.mrf.mxu0  ;;  %v5647_v18 = vld [vmem:[#allocation2 + $0x28] sm:$0xff]  ;;  %vm6938_vm10 = vcmp.le.s32.totalorder %v913_v16, 14  ;;  %v2256_v19 = vunpack.c.l.b16 %v2160_v9  ;;  %v9293_v16 = vmov 0  ;;  %v1720_v53 = vpack.c.bf16 %v1574_v43, %v1574_v43 }
 0x135   : > { %v6910_v42 = vld [vmem:[#allocation2 + $0x28] sm:$0xff]   ;;  %v658_v52 = vmul.f32 %v6621_v31, %v592_v47  ;;  %v2286_v50 = vpack.c.b16 %v6803_v2, %v2254_v26  ;;  %2730 = vmatmul.bf16.gmra.mxu2 %v5647_v18  ;;  %v9112_v47 = vunpack.c.h.bf16 %v6809_v8  ;;  %v9291_v40 = vsel %vm6938_vm10, 4294967295, %v9290_v40 }
 0x136   : > { %v9111_v39 = vunpack.c.l.bf16 %v6910_v42  ;;  %9292 = vst [vmem:[#allocation28_spill] sm:$0xff] %v9291_v40  ;;  %v6946_v2 = vadd.s32 64, %v6644_v25  ;;  %v9294_v16 = vsel %vm6952_vm11, 4294967295, %v9293_v16  ;;  %vm6960_vm12 = vcmp.ge.s32.totalorder %v1060_v54, 1 }
 0x137   : > { %v692_v41 = vadd.f32 %v6624_v33, %v658_v52  ;;  %2621 = vmatmul.bf16.vlgmr.msra.gmra.mxu1 %v2286_v50  ;;  %3037 = vmatmul.bf16.gmra.mxu0 %v1809_v51  ;;  %v1388_v18 = vrot.slane %v9112_v47, 7  ;;  %v9110_v51 = vunpack.c.h.bf16 %v6910_v42  ;;  %v1781_v50 = vunpack.c.l.b16 %v1685_v36  ;;  %9295 = vst [vmem:[#allocation29_spill] sm:$0xff] %v9294_v16 }
 0x138   : > { %v1529_v26 = vrot.slane %v9111_v39, 1  ;;  %v1780_v36 = vunpack.c.l.b16 %v1684_v46  ;;  %v2129_v54 = vsel %vm6676_vm1, %v6788_v22, 0.0  ;;  %v1364_v43 = vrot.slane %v1332_v11, 7 }
 0x139   : > { %v724_v55 = vmax.f32 %v692_v41, 0.0  ;;  %v1391_v45 = vsel %vm9131_vm3, %v1388_v18, %v6753_v10  ;;  %v6970_v9 = vsel %vm9131_vm3, %v6857_v57, %v1388_v18  ;;  %v1530_v46 = vrot.slane %v9110_v51, 1 }
 0x13a   : > { %v1573_v34 = vsel %vm9136_vm0, %v1528_v28, %v1529_v26  ;;  %v1711_v18 = vpack.c.bf16 %v1391_v45, %v1391_v45  ;;  %v2193_v28 = vpack.c.bf16 %v2129_v54, %v2129_v54  ;;  %v2131_v22 = vsel %vm6780_vm6, %v6900_v56, 0.0 }
 0x13b   : > { %v5784_v52 = vpack.c.bf16 %v724_v55, %v723_v0  ;;  %v1657_v20 = vsel %vm6938_vm10, %v1573_v34, 0.0  ;;  %v6958_v0 = vunpack.c.l.b16 %v1708_v59  ;;  %v9297_v55 = vmov 0 }
 0x13c   : > { %v595_v41 = vpop.f32.mrf.mxu0  ;;  %v9298_v55 = vsel %vm6960_vm12, 4294967295, %v9297_v55  ;;  %v1721_v44 = vpack.c.bf16 %v1657_v20, %v1657_v20  ;;  %v6983_v59 = vrot.slane %v1333_v37, 7  ;;  %v6991_v20 = vsel %vm9136_vm0, %v1529_v26, %v1530_v46 }
 0x13d   : > { %9296 = vst [vmem:[#allocation30_spill] sm:$0xff] %v6958_v0  ;;  %v659_v11 = vmul.f32 %v6621_v31, %v595_v41  ;;  %v1517_v1 = vsel %vm6960_vm12, %v6970_v9, 0.0  ;;  %v2287_v45 = vpack.c.b16 %v1781_v50, %v2256_v19  ;;  %v7002_v51 = vunpack.c.l.b16 %v2193_v28  ;;  %v5678_v0 = vld [vmem:[#allocation9 + $0xa0] sm:$0xff] }
 0x13e   : > { %5985 = vst [vmem:[#allocation2 + $0x30] sm:$0xff] %v5784_v52   ;;  %v6985_v52 = vunpack.c.l.b16 %v1720_v53  ;;  %v6987_v57 = vunpack.c.l.b16 %v1721_v44  ;;  %v2195_v53 = vpack.c.bf16 %v2131_v22, %v2131_v22  ;;  %v1810_v44 = vpack.c.b16 %v1781_v50, %v1780_v36 }
 0x13f   : > { %9299 = vst [vmem:[#allocation31_spill] sm:$0xff] %v9298_v55  ;;  %v2133_v26 = vsel %vm6883_vm9, %v1573_v34, 0.0  ;;  %v1416_v56 = vsel %vm9131_vm3, %v6816_v27, %v1364_v43  ;;  %v825_v41 = vadd.s32 88, %v6644_v25  ;;  %v1415_v50 = vsel %vm9131_vm3, %v1364_v43, %v6983_v59  ;;  %v7019_v34 = vld [vmem:[#allocation2 + $0x80] sm:$0xf] }
 0x140   : > { %9300 = vst [vmem:[#allocation32_spill] sm:$0xff] %v6985_v52  ;;  %v7010_v54 = vunpack.c.l.b16 %v2195_v53  ;;  %v2197_v39 = vpack.c.bf16 %v2133_v26, %v2133_v26  ;;  %v7017_v36 = vunpack.c.l.b16 %v1711_v18  ;;  %v1710_v28 = vpack.c.bf16 %v1517_v1, %v1517_v1 }
 0x141   : > { %9301 = vst [vmem:[#allocation33_spill] sm:$0xff] %v7002_v51  ;;  %v693_v22 = vadd.f32 %v6624_v33, %v659_v11  ;;  %v2093_v43 = vsel %vm6792_vm7, %v1416_v56, 0.0  ;;  %v9118_v11 = vunpack.c.l.bf16 %v7019_v34  ;;  %v927_v37 = vand.u32 15, %v825_v41 }
 0x142   : > { %9302 = vst [vmem:[#allocation34_spill] sm:$0xff] %v7010_v54  ;;  %v7031_v14 = vunpack.c.l.b16 %v1710_v28  ;;  %v7033_v1 = vunpack.c.l.b16 %v2197_v39  ;;  %v9306_v28 = vmov 0  ;;  %v9317_v40 = vunpack.c.h.bf16 %v6799_v35 }
 0x143   : > { %v725_v18 = vmax.f32 %v693_v22, 0.0  ;;  %vm7054_vm13 = vcmp.le.s32.totalorder %v927_v37, 14 }
 0x144   : > { %v597_v47 = vpop.f32.mrf.mxu0  ;;  %9303 = vst [vmem:[#allocation35_spill] sm:$0xff] %v7031_v14  ;;  %v9307_v28 = vsel %vm7054_vm13, 4294967295, %v9306_v28 }
 0x145   : > { %v5648_v5 = vld [vmem:[#allocation2 + $0x30] sm:$0xff]  ;;  %v660_v53 = vmul.f32 %v6621_v31, %v597_v47  ;;  %9304 = vst [vmem:[#allocation36_spill] sm:$0xff] %v7033_v1  ;;  %v1493_v47 = vsel %vm6952_vm11, %v1416_v56, 0.0 }
 0x146   : > { %v7015_v19 = vld [vmem:[#allocation2 + $0x30] sm:$0xff]   ;;  %2735 = vmatmul.bf16.gmra.mxu2 %v5648_v5  ;;  %v1687_v5 = vpack.c.bf16 %v1415_v50, %v1415_v50  ;;  %v1686_v50 = vpack.c.bf16 %v1493_v47, %v1493_v47  ;;  %9308 = vst [vmem:[#allocation37_spill] sm:$0xff] %v9307_v28 }
 0x147   : > { %v9117_v26 = vunpack.c.l.bf16 %v7015_v19  ;;  %v694_v27 = vadd.f32 %v6624_v33, %v660_v53  ;;  %2626 = vmatmul.bf16.gmra.mxu1 %v2287_v45  ;;  %3042 = vmatmul.bf16.gmra.mxu0 %v1810_v44  ;;  %v2162_v45 = vpack.c.bf16 %v2093_v43, %v2093_v43  ;;  %v2084_v44 = vrot.slane %v9118_v11, 7 }
 0x148   : > { %v9305_v56 = vunpack.c.h.bf16 %v7015_v19  ;;  %v1783_v47 = vunpack.c.l.b16 %v1687_v5  ;;  %v1722_v11 = vpack.c.bf16 %v6991_v20, %v6991_v20  ;;  %v9310_v20 = vmov 0 }
 0x149   : > { %v1531_v62 = vrot.slane %v9117_v26, 1  ;;  %v726_v53 = vmax.f32 %v694_v27, 0.0  ;;  %v2087_v26 = vsel %vm9131_vm3, %v6753_v10, %v2084_v44  ;;  %v2086_v27 = vsel %vm9131_vm3, %v2084_v44, %v6843_v24 }
 0x14a   : > { %v7049_v4 = vrot.slane %v9305_v56, 1  ;;  %v2119_v43 = vsel %vm6960_vm12, %v2087_v26, 0.0  ;;  %v906_v10 = vand.u32 15, %v6946_v2  ;;  %v2189_v56 = vpack.c.bf16 %v2086_v27, %v2086_v27 }
 0x14b   : > { %v5789_v41 = vpack.c.bf16 %v726_v53, %v725_v18  ;;  %v1571_v18 = vsel %vm9136_vm0, %v1530_v46, %v1531_v62  ;;  %v2258_v53 = vunpack.c.l.b16 %v2162_v45  ;;  %v2188_v37 = vpack.c.bf16 %v2119_v43, %v2119_v43 }
 0x14c   : > { %v600_v22 = vpop.f32.mrf.mxu0  ;;  %v1659_v39 = vsel %vm7054_vm13, %v1571_v18, 0.0  ;;  %v1570_v24 = vsel %vm9136_vm0, %v1531_v62, %v7049_v4  ;;  %v1782_v26 = vunpack.c.l.b16 %v1686_v50  ;;  %v9309_v46 = vunpack.c.l.bf16 %v6807_v7 }
 0x14d   : > { %5986 = vst [vmem:[#allocation2 + $0x38] sm:$0xff] %v5789_v41   ;;  %v7075_v5 = vunpack.c.l.b16 %v2188_v37  ;;  %v661_v2 = vmul.f32 %v6621_v31, %v600_v22  ;;  %v7078_v45 = vunpack.c.l.b16 %v2189_v56  ;;  %v1723_v41 = vpack.c.bf16 %v1659_v39, %v1659_v39 }
 0x14e   : > { %v1366_v44 = vrot.slane %v9309_v46, 7  ;;  %v827_v27 = vadd.s32 104, %v6644_v25  ;;  %v2288_v43 = vpack.c.b16 %v1783_v47, %v2258_v53  ;;  %vm7081_vm14 = vcmp.ge.s32.totalorder %v906_v10, 1 }
 0x14f   : > { %v9311_v20 = vsel %vm7081_vm14, 4294967295, %v9310_v20  ;;  %v2135_v62 = vsel %vm6938_vm10, %v1571_v18, 0.0  ;;  %v9313_v50 = vunpack.c.h.bf16 %v6807_v7  ;;  %v7093_v37 = vunpack.c.l.b16 %v1722_v11 }
 0x150   : > { %9312 = vst [vmem:[#allocation38_spill] sm:$0xff] %v9311_v20  ;;  %v7095_v39 = vunpack.c.l.b16 %v1723_v41  ;;  %v1811_v56 = vpack.c.b16 %v1783_v47, %v1782_v26  ;;  %v2199_v53 = vpack.c.bf16 %v2135_v62, %v2135_v62  ;;  %v9316_v10 = vunpack.c.l.bf16 %v6799_v35 }
 0x151   : > { %v7089_v46 = vrot.slane %v9313_v50, 7  ;;  %9314 = vst [vmem:[#allocation39_spill] sm:$0xff] %v7093_v37  ;;  %v1547_v18 = vrot.slane %v9317_v40, 1  ;;  %v695_v7 = vadd.f32 %v6624_v33, %v661_v2  ;;  %v1414_v11 = vsel %vm9131_vm3, %v6983_v59, %v1366_v44 }
 0x152   : > { %9315 = vst [vmem:[#allocation40_spill] sm:$0xff] %v7095_v39  ;;  %v7099_v55 = vrot.slane %v9316_v10, 1  ;;  %v941_v26 = vand.u32 15, %v827_v27  ;;  %v7114_v40 = vunpack.c.l.b16 %v2199_v53  ;;  %v2095_v10 = vsel %vm6952_vm11, %v1414_v11, 0.0 }
 0x153   : > { %v1413_v2 = vsel %vm9131_vm3, %v1366_v44, %v7089_v46  ;;  %v1495_v44 = vsel %vm7081_vm14, %v1414_v11, 0.0  ;;  %v2164_v58 = vpack.c.bf16 %v2095_v10, %v2095_v10  ;;  %v1724_v11 = vpack.c.bf16 %v1570_v24, %v1570_v24 }
 0x154   : > { %v602_v50 = vpop.f32.mrf.mxu0  ;;  %v5649_v21 = vld [vmem:[#allocation2 + $0x38] sm:$0xff]  ;;  %9318 = vst [vmem:[#allocation41_spill] sm:$0xff] %v7114_v40  ;;  %v7122_v59 = vsel %vm9136_vm0, %v7099_v55, %v1547_v18  ;;  %vm7132_vm15 = vcmp.le.s32.totalorder %v941_v26, 14  ;;  %v1689_v16 = vpack.c.bf16 %v1413_v2, %v1413_v2  ;;  %v1688_v63 = vpack.c.bf16 %v1495_v44, %v1495_v44 }
 0x155   : > { %v7107_v22 = vld [vmem:[#allocation2 + $0x38] sm:$0xff]   ;;  %v662_v41 = vmul.f32 %v6621_v31, %v602_v50  ;;  %v9319_v50 = vmov 0  ;;  %v9322_v2 = vunpack.c.l.bf16 %v6809_v8  ;;  %v824_v24 = vadd.s32 80, %v6644_v25 }
 0x156   : > { %v9123_v62 = vunpack.c.l.bf16 %v7107_v22  ;;  %v9128_v35 = vunpack.c.h.bf16 %v7107_v22  ;;  %2740 = vmatmul.bf16.gmra.mxu2 %v5649_v21  ;;  %v843_v21 = vadd.s32 232, %v6644_v25  ;;  %v9320_v50 = vsel %vm7132_vm15, 4294967295, %v9319_v50 }
 0x157   : > { %v696_v27 = vadd.f32 %v6624_v33, %v662_v41  ;;  %2631 = vmatmul.bf16.gmra.mxu1 %v2288_v43  ;;  %3047 = vmatmul.bf16.gmra.mxu0 %v1811_v56  ;;  %9321 = vst [vmem:[#allocation42_spill] sm:$0xff] %v9320_v50  ;;  %v727_v56 = vmax.f32 %v695_v7, 0.0  ;;  %v2260_v10 = vunpack.c.l.b16 %v2164_v58  ;;  %v7155_v44 = vunpack.c.l.b16 %v1724_v11 }
 0x158   : > { %v1533_v53 = vrot.slane %v9123_v62, 1  ;;  %v7138_v41 = vrot.slane %v9128_v35, 1  ;;  %v1053_v54 = vand.u32 15, %v843_v21  ;;  %v1784_v43 = vunpack.c.l.b16 %v1688_v63 }
 0x159   : > { %v728_v47 = vmax.f32 %v696_v27, 0.0  ;;  %v1548_v27 = vrot.slane %v9322_v2, 1  ;;  %9323 = vst [vmem:[#allocation43_spill] sm:$0xff] %v7155_v44  ;;  %v9326_v40 = vunpack.c.l.bf16 %v6910_v42  ;;  %v920_v11 = vand.u32 15, %v824_v24 }
 0x15a   : > { %v1569_v62 = vsel %vm9136_vm0, %v7049_v4, %v1533_v53  ;;  %v7150_v7 = vsel %vm9136_vm0, %v1533_v53, %v7138_v41  ;;  %v1785_v4 = vunpack.c.l.b16 %v1689_v16  ;;  %vm7166_vm3 = vcmp.le.s32.totalorder %v1053_v54, 14 }
 0x15b   : > { %v5794_v26 = vpack.c.bf16 %v728_v47, %v727_v56  ;;  %v1661_v1 = vsel %vm7132_vm15, %v1569_v62, 0.0  ;;  %v5673_v47 = vld [vmem:[#allocation9 + $0x78] sm:$0xff]  ;;  %v1368_v2 = vrot.slane %v9326_v40, 7  ;;  %v9327_v16 = vmov 0 }
 0x15c   : > { %v605_v35 = vpop.f32.mrf.mxu0  ;;  %v1725_v51 = vpack.c.bf16 %v1661_v1, %v1661_v1  ;;  %v9325_v1 = vunpack.c.h.bf16 %v6809_v8  ;;  %3113 = vmatpush.bf16.msrb.mxu1 %v5673_v47  ;;  %v9328_v16 = vsel %vm7166_vm3, 4294967295, %v9327_v16  ;;  %v2137_v8 = vsel %vm7054_vm13, %v1569_v62, 0.0 }
 0x15d   : > { %5987 = vst [vmem:[#allocation2 + $0x40] sm:$0xff] %v5794_v26   ;;  %v663_v53 = vmul.f32 %v6621_v31, %v605_v35  ;;  %v2201_v35 = vpack.c.bf16 %v2137_v8, %v2137_v8  ;;  %v1554_v54 = vsel %vm9136_vm0, %v1547_v18, %v1548_v27  ;;  %v2289_v40 = vpack.c.b16 %v1785_v4, %v2260_v10 }
 0x15e   : > { %v7157_v56 = vunpack.c.l.b16 %v1725_v51  ;;  %v7161_v21 = vrot.slane %v9325_v1, 1  ;;  %9329 = vst [vmem:[#allocation45_spill] sm:$0xff] %v9328_v16  ;;  %v829_v51 = vadd.s32 120, %v6644_v25  ;;  %v1740_v47 = vpack.c.bf16 %v1554_v54, %v1554_v54 }
 0x15f   : > { %v1812_v1 = vpack.c.b16 %v1785_v4, %v1784_v43  ;;  %v9330_v58 = vunpack.c.h.bf16 %v6910_v42  ;;  %v7189_v28 = vunpack.c.l.b16 %v2201_v35  ;;  %v697_v8 = vadd.f32 %v6624_v33, %v663_v53 }
 0x160   : > { %9324 = vst [vmem:[#allocation44_spill] sm:$0xff] %v7157_v56  ;;  %v7178_v63 = vsel %vm9136_vm0, %v1548_v27, %v7161_v21  ;;  %vm9332_vm0 = vcmp.lt.s32.totalorder %v6644_v25, 1  ;;  %v955_v24 = vand.u32 15, %v829_v51  ;;  %v7197_v10 = vunpack.c.l.b16 %v1740_v47 }
 0x161   : > { %v1677_v26 = vsel %vm7166_vm3, %v7178_v63, 0.0  ;;  %v7187_v62 = vrot.slane %v9330_v58, 7  ;;  %9331 = vst [vmem:[#allocation46_spill] sm:$0xff] %v7189_v28  ;;  %v1412_v18 = vsel %vm9332_vm0, %v7089_v46, %v1368_v2  ;;  %vm7204_vm12 = vcmp.ge.s32.totalorder %v920_v11, 1 }
 0x162   : > { %v1741_v32 = vpack.c.bf16 %v1677_v26, %v1677_v26  ;;  %9333 = vst [vmem:[#allocation47_spill] sm:$0xff] %v7197_v10  ;;  %v9334_v58 = vmov 0  ;;  %vm7218_vm11 = vcmp.le.s32.totalorder %v955_v24, 14  ;;  %v9338_v35 = vmov 0 }
 0x163   : > { %v9335_v58 = vsel %vm7204_vm12, 4294967295, %v9334_v58  ;;  %v9339_v35 = vsel %vm7218_vm11, 4294967295, %v9338_v35  ;;  %v729_v54 = vmax.f32 %v697_v8, 0.0  ;;  %v1726_v26 = vpack.c.bf16 %v7150_v7, %v7150_v7 }
 0x164   : > { %v607_v14 = vpop.f32.mrf.mxu0  ;;  %v5650_v56 = vld [vmem:[#allocation2 + $0x40] sm:$0xff]  ;;  %9336 = vst [vmem:[#allocation48_spill] sm:$0xff] %v9335_v58  ;;  %v7208_v46 = vunpack.c.l.b16 %v1741_v32  ;;  %v9347_v50 = vunpack.c.h.bf16 %v7015_v19  ;;  %v9361_v44 = vunpack.c.l.bf16 %v7107_v22  ;;  %v835_v16 = vadd.s32 168, %v6644_v25 }
 0x165   : > { %v7195_v27 = vld [vmem:[#allocation2 + $0x40] sm:$0xff]   ;;  %v664_v42 = vmul.f32 %v6621_v31, %v607_v14  ;;  %v1411_v31 = vsel %vm9332_vm0, %v1368_v2, %v7187_v62  ;;  %9340 = vst [vmem:[#allocation50_spill] sm:$0xff] %v9339_v35  ;;  %v1497_v2 = vsel %vm7204_vm12, %v1412_v18, 0.0  ;;  %vm9341_vm0 = vcmp.lt.s32.totalorder %v6644_v25, 7 }
 0x166   : > { %v9141_v43 = vunpack.c.l.bf16 %v7195_v27  ;;  %v9140_v4 = vunpack.c.h.bf16 %v7195_v27  ;;  %2745 = vmatmul.bf16.gmra.mxu2 %v5650_v56  ;;  %9337 = vst [vmem:[#allocation49_spill] sm:$0xff] %v7208_v46  ;;  %v2097_v56 = vsel %vm7081_vm14, %v1412_v18, 0.0  ;;  %vm9342_vm14 = vmmov %vm9341_vm0  ;;  %v7239_v18 = vunpack.c.l.b16 %v1726_v26 }
 0x167   : > { %v698_v51 = vadd.f32 %v6624_v33, %v664_v42  ;;  %2636 = vmatmul.bf16.gmra.mxu1 %v2289_v40  ;;  %3052 = vmatmul.bf16.gmra.mxu0 %v1812_v1  ;;  %v1691_v1 = vpack.c.bf16 %v1411_v31, %v1411_v31  ;;  %v2166_v24 = vpack.c.bf16 %v2097_v56, %v2097_v56  ;;  %v826_v31 = vadd.s32 96, %v6644_v25 }
 0x168   : > { %v1535_v14 = vrot.slane %v9141_v43, 1  ;;  %v1536_v32 = vrot.slane %v9140_v4, 1  ;;  %v1690_v33 = vpack.c.bf16 %v1497_v2, %v1497_v2  ;;  %9343 = vst [vmem:[#allocation51_spill] sm:$0xff] %v7239_v18  ;;  %v833_v35 = vadd.s32 152, %v6644_v25 }
 0x169   : > { %v730_v40 = vmax.f32 %v698_v51, 0.0  ;;  %v1787_v4 = vunpack.c.l.b16 %v1691_v1  ;;  %v2262_v7 = vunpack.c.l.b16 %v2166_v24  ;;  %v9345_v1 = vunpack.c.l.bf16 %v7015_v19 }
 0x16a   : > { %v1567_v11 = vsel %vm9341_vm0, %v7138_v41, %v1535_v14  ;;  %v7237_v51 = vsel %vm9342_vm14, %v1535_v14, %v1536_v32  ;;  %v1786_v56 = vunpack.c.l.b16 %v1690_v33  ;;  %v7249_v14 = vld [vmem:[#allocation8] ss:$0 sm:$0xff]  ;;  %vm9348_vm14 = vcmp.lt.s32.totalorder %v6644_v25, 1 }
 0x16b   : > { %v5799_v47 = vpack.c.bf16 %v730_v40, %v729_v54  ;;  %v1663_v42 = vsel %vm7218_vm11, %v1567_v11, 0.0  ;;  %v831_v40 = vadd.s32 136, %v6644_v25  ;;  %v2139_v2 = vsel %vm7132_vm15, %v1567_v11, 0.0  ;;  %vm9352_vm15 = vmmov %vm9348_vm14 }
 0x16c   : > { %v610_v53 = vpop.f32.mrf.mxu0  ;;  %v1727_v8 = vpack.c.bf16 %v1663_v42, %v1663_v42  ;;  %v2203_v42 = vpack.c.bf16 %v2139_v2, %v2139_v2  ;;  %v1370_v24 = vrot.slane %v9345_v1, 7  ;;  %v2290_v54 = vpack.c.b16 %v1787_v4, %v2262_v7 }
 0x16d   : > { %5988 = vst [vmem:[#allocation2 + $0x48] sm:$0xff] %v5799_v47   ;;  %v665_v26 = vmul.f32 %v7249_v14, %v610_v53  ;;  %v5672_v47 = vld [vmem:[#allocation9 + $0x70] sm:$0xff]  ;;  %v1813_v46 = vpack.c.b16 %v1787_v4, %v1786_v56  ;;  %v1371_v11 = vrot.slane %v9347_v50, 7  ;;  %v7260_v53 = vld [vmem:[#allocation8 + $0x1] ss:$0 sm:$0xff]  ;;  %v9349_v7 = vmov 0 }
 0x16e   : > { %v7241_v41 = vunpack.c.l.b16 %v1727_v8  ;;  %v934_v8 = vand.u32 15, %v826_v31  ;;  %3114 = vmatpush.bf16.msrb.mxu1 %v5672_v47  ;;  %v7254_v33 = vunpack.c.l.b16 %v2203_v42  ;;  %v1410_v19 = vsel %vm9348_vm14, %v7187_v62, %v1370_v24  ;;  %v5681_v50 = vld [vmem:[#allocation9 + $0xb8] sm:$0xff] }
 0x16f   : > { %v699_v2 = vadd.f32 %v7260_v53, %v665_v26  ;;  %v1409_v56 = vsel %vm9352_vm15, %v1370_v24, %v1371_v11  ;;  %3202 = vmatpush.bf16.msrb.mxu2 %v5681_v50  ;;  %v9353_v62 = vmov 0  ;;  %v2099_v26 = vsel %vm7204_vm12, %v1410_v19, 0.0 }
 0x170   : > { %9344 = vst [vmem:[#allocation52_spill] sm:$0xff] %v7241_v41  ;;  %v969_v41 = vand.u32 15, %v831_v40  ;;  %vm7271_vm0 = vcmp.ge.s32.totalorder %v934_v8, 1  ;;  %vm9356_vm14 = vcmp.lt.s32.totalorder %v6644_v25, 7  ;;  %v5680_v8 = vld [vmem:[#allocation9 + $0xb0] sm:$0xff]  ;;  %v828_v50 = vadd.s32 112, %v6644_v25 }
 0x171   : > { %9346 = vst [vmem:[#allocation53_spill] sm:$0xff] %v7254_v33  ;;  %v9350_v7 = vsel %vm7271_vm0, 4294967295, %v9349_v7  ;;  %v731_v40 = vmax.f32 %v699_v2, 0.0  ;;  %v1499_v24 = vsel %vm7271_vm0, %v1410_v19, 0.0  ;;  %vm9360_vm15 = vmmov %vm9356_vm14  ;;  %vm9369_vm12 = vcmp.lt.s32.totalorder %v6644_v25, 1 }
 0x172   : > { %9351 = vst [vmem:[#allocation54_spill] sm:$0xff] %v9350_v7  ;;  %vm7280_vm7 = vcmp.le.s32.totalorder %v969_v41, 14  ;;  %v1728_v41 = vpack.c.bf16 %v7237_v51, %v7237_v51  ;;  %v1692_v33 = vpack.c.bf16 %v1499_v24, %v1499_v24  ;;  %v5679_v51 = vld [vmem:[#allocation9 + $0xa8] sm:$0xff]  ;;  %v9389_v10 = vunpack.c.h.bf16 %v7195_v27 }
 0x173   : > { %v9354_v62 = vsel %vm7280_vm7, 4294967295, %v9353_v62  ;;  %3203 = vmatpush.bf16.msrb.mxu2 %v5680_v8 }
 0x174   : > { %v612_v43 = vpop.f32.mrf.mxu0  ;;  %v5651_v20 = vld [vmem:[#allocation2 + $0x48] sm:$0xff]  ;;  %9355 = vst [vmem:[#allocation55_spill] sm:$0xff] %v9354_v62 }
 0x175   : > { %v7258_v28 = vld [vmem:[#allocation2 + $0x48] sm:$0xff]   ;;  %v666_v1 = vmul.f32 %v7249_v14, %v612_v43 }
 0x176   : > { %v9149_v31 = vunpack.c.l.bf16 %v7258_v28  ;;  %2750 = vmatmul.bf16.gmra.mxu2 %v5651_v20  ;;  %v2168_v20 = vpack.c.bf16 %v2099_v26, %v2099_v26  ;;  %v9357_v58 = vunpack.c.h.bf16 %v7258_v28 }
 0x177   : > { %v700_v4 = vadd.f32 %v7260_v53, %v666_v1  ;;  %2641 = vmatmul.bf16.gmra.mxu1 %v2290_v54  ;;  %3057 = vmatmul.bf16.gmra.mxu0 %v1813_v46 }
 0x178   : > { %v1537_v43 = vrot.slane %v9149_v31, 1  ;;  %v7284_v46 = vpop.f32.mrf.mxu2  ;;  %v1693_v31 = vpack.c.bf16 %v1409_v56, %v1409_v56  ;;  %v7300_v19 = vrot.slane %v9357_v58, 1  ;;  %v948_v56 = vand.u32 15, %v828_v50  ;;  %3204 = vmatpush.bf16.msrb.mxu2 %v5679_v51 }
 0x179   : > { %v732_v54 = vmax.f32 %v700_v4, 0.0  ;;  %v841_v4 = vadd.s32 216, %v6644_v25  ;;  %v1372_v58 = vrot.slane %v9361_v44, 7 }
 0x17a   : > { %v1565_v42 = vsel %vm9356_vm14, %v1536_v32, %v1537_v43  ;;  %v7309_v18 = vsel %vm9360_vm15, %v1537_v43, %v7300_v19  ;;  %v1789_v8 = vunpack.c.l.b16 %v1693_v31  ;;  %v9362_v43 = vunpack.c.h.bf16 %v7107_v22 }
 0x17b   : > { %v5804_v1 = vpack.c.bf16 %v732_v54, %v731_v40  ;;  %v1665_v2 = vsel %vm7280_vm7, %v1565_v42, 0.0  ;;  %v7302_v40 = vunpack.c.l.b16 %v1728_v41  ;;  %v1039_v26 = vand.u32 15, %v841_v4 }
 0x17c   : > { %v615_v47 = vpop.f32.mrf.mxu0  ;;  %v1729_v32 = vpack.c.bf16 %v1665_v2, %v1665_v2  ;;  %v2264_v2 = vunpack.c.l.b16 %v2168_v20  ;;  %v7320_v37 = vrot.slane %v9362_v43, 7  ;;  %v9363_v31 = vmov 0  ;;  %3205 = vmatpush.bf16.msrb.mxu2 %v5678_v0 }
 0x17d   : > { %5989 = vst [vmem:[#allocation2 + $0x50] sm:$0xff] %v5804_v1   ;;  %v667_v41 = vmul.f32 %v7249_v14, %v615_v47  ;;  %vm7322_vm14 = vcmp.le.s32.totalorder %v1039_v26, 14  ;;  %vm7326_vm15 = vcmp.ge.s32.totalorder %v948_v56, 1  ;;  %v9366_v4 = vmov 0  ;;  %v5677_v56 = vld [vmem:[#allocation9 + $0x98] sm:$0xff] }
 0x17e   : > { %9358 = vst [vmem:[#allocation56_spill] sm:$0xff] %v7302_v40  ;;  %v7304_v54 = vunpack.c.l.b16 %v1729_v32  ;;  %v1788_v32 = vunpack.c.l.b16 %v1692_v33  ;;  %v9364_v31 = vsel %vm7322_vm14, 4294967295, %v9363_v31  ;;  %v2291_v44 = vpack.c.b16 %v1789_v8, %v2264_v2 }
 0x17f   : > { %9365 = vst [vmem:[#allocation58_spill] sm:$0xff] %v9364_v31  ;;  %v9367_v4 = vsel %vm7326_vm15, 4294967295, %v9366_v4  ;;  %v1408_v47 = vsel %vm9369_vm12, %v1371_v11, %v1372_v58  ;;  %v2141_v22 = vsel %vm7218_vm11, %v1565_v42, 0.0  ;;  %v701_v33 = vadd.f32 %v7260_v53, %v667_v41 }
 0x180   : > { %9359 = vst [vmem:[#allocation57_spill] sm:$0xff] %v7304_v54  ;;  %v7316_v1 = vpop.f32.mrf.mxu2  ;;  %v1814_v26 = vpack.c.b16 %v1789_v8, %v1788_v32  ;;  %v2205_v2 = vpack.c.bf16 %v2141_v22, %v2141_v22  ;;  %v2153_v24 = vsel %vm7322_vm14, %v7178_v63, 0.0  ;;  %v1407_v0 = vsel %vm9369_vm12, %v1372_v58, %v7320_v37  ;;  %v5671_v8 = vld [vmem:[#allocation9 + $0x68] sm:$0xff]  ;;  %3206 = vmatpush.bf16.msrb.mxu2 %v5677_v56 }
 0x181   : > { %9368 = vst [vmem:[#allocation59_spill] sm:$0xff] %v9367_v4  ;;  %v1501_v42 = vsel %vm7326_vm15, %v1408_v47, 0.0  ;;  %v2101_v32 = vsel %vm7271_vm0, %v1408_v47, 0.0  ;;  %3115 = vmatpush.bf16.msrb.mxu1 %v5671_v8  ;;  %vm9380_vm0 = vcmp.lt.s32.totalorder %v6644_v25, 7  ;;  %v7417_v40 = vrot.slane %v9389_v10, 7 }
 0x182   : > { %v7347_v41 = vunpack.c.l.b16 %v2205_v2  ;;  %v5676_v2 = vld [vmem:[#allocation9 + $0x90] sm:$0xff]  ;;  %v2170_v47 = vpack.c.bf16 %v2101_v32, %v2101_v32  ;;  %v1694_v56 = vpack.c.bf16 %v1501_v42, %v1501_v42  ;;  %v9375_v42 = vunpack.c.l.bf16 %v6730_v60  ;;  %vm9381_vm11 = vmmov %vm9380_vm0 }
 0x184   : > { %v617_v20 = vpop.f32.mrf.mxu0  ;;  %v5652_v50 = vld [vmem:[#allocation2 + $0x50] sm:$0xff]  ;;  %9370 = vst [vmem:[#allocation60_spill] sm:$0xff] %v7347_v41  ;;  %3207 = vmatpush.bf16.msrb.mxu2 %v5676_v2  ;;  %v1730_v2 = vpack.c.bf16 %v7309_v18, %v7309_v18 }
 0x185   : > { %v668_v51 = vmul.f32 %v7249_v14, %v617_v20  ;;  %v7336_v43 = vld [vmem:[#allocation2 + $0x50] sm:$0xff]  }
 0x186   : > { %2755 = vmatmul.bf16.gmra.mxu2 %v5652_v50  ;;  %v733_v50 = vmax.f32 %v701_v33, 0.0  ;;  %v983_v33 = vand.u32 15, %v833_v35  ;;  %v9373_v8 = vunpack.c.h.bf16 %v7336_v43 }
 0x187   : > { %v702_v11 = vadd.f32 %v7260_v53, %v668_v51  ;;  %2646 = vmatmul.bf16.gmra.mxu1 %v2291_v44  ;;  %3062 = vmatmul.bf16.gmra.mxu0 %v1814_v26  ;;  %v2217_v44 = vpack.c.bf16 %v2153_v24, %v2153_v24  ;;  %v1695_v26 = vpack.c.bf16 %v1407_v0, %v1407_v0  ;;  %v5675_v24 = vld [vmem:[#allocation9 + $0x88] sm:$0xff]  ;;  %v830_v0 = vadd.s32 128, %v6644_v25 }
 0x188   : > { %v7353_v51 = vpop.f32.mrf.mxu2  ;;  %v7364_v39 = vrot.slane %v9373_v8, 1  ;;  %vm7375_vm12 = vcmp.le.s32.totalorder %v983_v33, 14  ;;  %v2266_v8 = vunpack.c.l.b16 %v2170_v47  ;;  %3208 = vmatpush.bf16.msrb.mxu2 %v5675_v24  ;;  %v9387_v24 = vunpack.c.l.bf16 %v7019_v34 }
 0x189   : > { %v734_v22 = vmax.f32 %v702_v11, 0.0  ;;  %v7358_v54 = vunpack.c.l.b16 %v2217_v44  ;;  %v9372_v11 = vunpack.c.l.bf16 %v7336_v43  ;;  %v7371_v44 = vrot.slane %v9375_v42, 1 }
 0x18b   : > { %v5809_v7 = vpack.c.bf16 %v734_v22, %v733_v50  ;;  %9371 = vst [vmem:[#allocation61_spill] sm:$0xff] %v7358_v54  ;;  %v1539_v20 = vrot.slane %v9372_v11, 1  ;;  %v9374_v50 = vunpack.c.h.bf16 %v6699_v12  ;;  %v9377_v22 = vmov 0 }
 0x18c   : > { %v620_v63 = vpop.f32.mrf.mxu0  ;;  %9376 = vst [vmem:[#allocation62_spill] sm:$0xff] %v7371_v44  ;;  %v9378_v22 = vsel %vm7375_vm12, 4294967295, %v9377_v22  ;;  %v1791_v11 = vunpack.c.l.b16 %v1695_v26  ;;  %v9383_v54 = vunpack.c.l.bf16 %v6699_v12  ;;  %v5674_v26 = vld [vmem:[#allocation9 + $0x80] sm:$0xff] }
 0x18d   : > { %5990 = vst [vmem:[#allocation2 + $0x58] sm:$0xff] %v5809_v7   ;;  %v1520_v32 = vrot.slane %v9374_v50, 1  ;;  %v1563_v7 = vsel %vm9380_vm0, %v7300_v19, %v1539_v20  ;;  %v7387_v60 = vsel %vm9381_vm11, %v1539_v20, %v7364_v39  ;;  %v1790_v50 = vunpack.c.l.b16 %v1694_v56  ;;  %vm9385_vm11 = vmmov %vm9380_vm0  ;;  %3209 = vmatpush.bf16.msrb.mxu2 %v5674_v26 }
 0x18e   : > { %9379 = vst [vmem:[#allocation63_spill] sm:$0xff] %v9378_v22  ;;  %v1667_v33 = vsel %vm7375_vm12, %v1563_v7, 0.0  ;;  %v669_v35 = vmul.f32 %v7249_v14, %v620_v63  ;;  %v9382_v19 = vunpack.c.l.bf16 %v7195_v27  ;;  %v7398_v41 = vrot.slane %v9383_v54, 1 }
 0x18f   : > { %v1731_v42 = vpack.c.bf16 %v1667_v33, %v1667_v33  ;;  %v1552_v20 = vsel %vm9385_vm11, %v7161_v21, %v7371_v44  ;;  %v1581_v47 = vsel %vm9380_vm0, %v1520_v32, %v6662_v49  ;;  %v7407_v63 = vunpack.c.l.b16 %v1730_v2  ;;  %vm9391_vm11 = vmmov %vm9380_vm0 }
 0x190   : > { %v7392_v58 = vpop.f32.mrf.mxu2  ;;  %v1374_v18 = vrot.slane %v9382_v19, 7  ;;  %9384 = vst [vmem:[#allocation64_spill] sm:$0xff] %v7398_v41  ;;  %v7413_v33 = vrot.slane %v9387_v24, 1  ;;  %v2292_v12 = vpack.c.b16 %v1791_v11, %v2266_v8  ;;  %v1815_v54 = vpack.c.b16 %v1791_v11, %v1790_v50 }
 0x191   : > { %9386 = vst [vmem:[#allocation65_spill] sm:$0xff] %v7407_v63  ;;  %v7409_v56 = vunpack.c.l.b16 %v1731_v42  ;;  %v962_v19 = vand.u32 15, %v830_v0  ;;  %v1742_v42 = vpack.c.bf16 %v1552_v20, %v1552_v20  ;;  %v2143_v34 = vsel %vm7280_vm7, %v1563_v7, 0.0  ;;  %vm9393_vm7 = vmmov %vm9391_vm11 }
 0x192   : > { %9388 = vst [vmem:[#allocation66_spill] sm:$0xff] %v7413_v33  ;;  %v2124_v0 = vsel %vm9391_vm11, %v7371_v44, %v7413_v33  ;;  %v703_v27 = vadd.f32 %v7260_v53, %v669_v35  ;;  %vm9392_vm0 = vcmp.lt.s32.totalorder %v6644_v25, 1  ;;  %v2207_v50 = vpack.c.bf16 %v2143_v34, %v2143_v34 }
 0x193   : > { %v1406_v11 = vsel %vm9392_vm0, %v7320_v37, %v1374_v18  ;;  %v1582_v7 = vsel %vm9393_vm7, %v7398_v41, %v1520_v32  ;;  %v1649_v20 = vsel %vm6691_vm2, %v1581_v47, 0.0  ;;  %v840_v35 = vadd.s32 208, %v6644_v25 }
 0x194   : > { %v622_v21 = vpop.f32.mrf.mxu0  ;;  %v7419_v52 = vld [vmem:[#allocation2 + $0x58] sm:$0xff]  ;;  %vm7446_vm11 = vcmp.ge.s32.totalorder %v962_v19, 1  ;;  %v9394_v37 = vmov 0  ;;  %v1405_v32 = vsel %vm9392_vm0, %v1374_v18, %v7417_v40  ;;  %v7453_v24 = vunpack.c.l.b16 %v2207_v50 }
 0x195   : > { %9390 = vst [vmem:[#allocation67_spill] sm:$0xff] %v7419_v52  ;;  %v670_v10 = vmul.f32 %v7249_v14, %v622_v21  ;;  %v7434_v8 = vld [vmem:[#allocation2 + $0x58] sm:$0xff]   ;;  %v2155_v14 = vsel %vm7166_vm3, %v2124_v0, 0.0  ;;  %v9395_v37 = vsel %vm7446_vm11, 4294967295, %v9394_v37  ;;  %v2103_v47 = vsel %vm7326_vm15, %v1406_v11, 0.0 }
 0x196   : > { %2760 = vmatmul.bf16.gmra.mxu2 %v7419_v52  ;;  %9396 = vst [vmem:[#allocation68_spill] sm:$0xff] %v9395_v37  ;;  %v7461_v0 = vunpack.c.l.b16 %v1742_v42  ;;  %v1503_v18 = vsel %vm7446_vm11, %v1406_v11, 0.0  ;;  %v1712_v50 = vpack.c.bf16 %v1582_v7, %v1582_v7  ;;  %v1713_v2 = vpack.c.bf16 %v1649_v20, %v1649_v20 }
 0x197   : > { %v704_v26 = vadd.f32 %v7260_v53, %v670_v10  ;;  %2651 = vmatmul.bf16.gmra.mxu1 %v2292_v12  ;;  %3067 = vmatmul.bf16.gmra.mxu0 %v1815_v54  ;;  %9397 = vst [vmem:[#allocation69_spill] sm:$0xff] %v7453_v24  ;;  %v2219_v53 = vpack.c.bf16 %v2155_v14, %v2155_v14  ;;  %v735_v12 = vmax.f32 %v703_v27, 0.0  ;;  %v832_v14 = vadd.s32 144, %v6644_v25  ;;  %v5670_v24 = vld [vmem:[#allocation9 + $0x60] sm:$0xff] }
 0x198   : > { %v7459_v19 = vpop.f32.mrf.mxu2  ;;  %9398 = vst [vmem:[#allocation70_spill] sm:$0xff] %v7461_v0  ;;  %v1697_v4 = vpack.c.bf16 %v1405_v32, %v1405_v32  ;;  %v997_v34 = vand.u32 15, %v835_v16  ;;  %v9400_v42 = vunpack.c.l.bf16 %v7434_v8  ;;  %v9401_v10 = vunpack.c.h.bf16 %v7434_v8  ;;  %3116 = vmatpush.bf16.msrb.mxu1 %v5670_v24 }
 0x199   : > { %v736_v54 = vmax.f32 %v704_v26, 0.0  ;;  %v7469_v27 = vunpack.c.l.b16 %v2219_v53  ;;  %v2172_v26 = vpack.c.bf16 %v2103_v47, %v2103_v47  ;;  %v1696_v11 = vpack.c.bf16 %v1503_v18, %v1503_v18 }
 0x19a   : > { %v1541_v62 = vrot.slane %v9400_v42, 1  ;;  %v7475_v33 = vrot.slane %v9401_v10, 1  ;;  %v838_v7 = vadd.s32 192, %v6644_v25  ;;  %v1032_v20 = vand.u32 15, %v840_v35 }
 0x19b   : > { %v5814_v21 = vpack.c.bf16 %v736_v54, %v735_v12  ;;  %9399 = vst [vmem:[#allocation71_spill] sm:$0xff] %v7469_v27  ;;  %vm7480_vm7 = vcmp.le.s32.totalorder %v997_v34, 14  ;;  %v9402_v53 = vmov 0  ;;  %vm9405_vm0 = vcmp.lt.s32.totalorder %v6644_v25, 7 }
 0x19c   : > { %v9403_v53 = vsel %vm7480_vm7, 4294967295, %v9402_v53  ;;  %v1561_v16 = vsel %vm9405_vm0, %v7364_v39, %v1541_v62  ;;  %v1732_v47 = vpack.c.bf16 %v7387_v60, %v7387_v60  ;;  %vm9406_vm3 = vmmov %vm9405_vm0  ;;  %v9407_v35 = vunpack.c.l.bf16 %v7258_v28 }
 0x19d   : > { %5991 = vst [vmem:[#allocation2 + $0x60] sm:$0xff] %v5814_v21   ;;  %v7492_v21 = vsel %vm9406_vm3, %v1541_v62, %v7475_v33  ;;  %v1669_v34 = vsel %vm7480_vm7, %v1561_v16, 0.0  ;;  %v837_v54 = vadd.s32 184, %v6644_v25  ;;  %v839_v10 = vadd.s32 200, %v6644_v25 }
 0x19e   : > { %9404 = vst [vmem:[#allocation72_spill] sm:$0xff] %v9403_v53  ;;  %v1376_v12 = vrot.slane %v9407_v35, 7  ;;  %v1793_v18 = vunpack.c.l.b16 %v1697_v4  ;;  %v2268_v39 = vunpack.c.l.b16 %v2172_v26  ;;  %v976_v42 = vand.u32 15, %v832_v14  ;;  %v9486_v53 = vld [vmem:[#allocation52_spill] sm:$0xff] }
 0x19f   : > { %v1733_v32 = vpack.c.bf16 %v1669_v34, %v1669_v34  ;;  %v1792_v49 = vunpack.c.l.b16 %v1696_v11  ;;  %v9408_v62 = vunpack.c.h.bf16 %v7258_v28  ;;  %v7506_v6 = vunpack.c.l.b16 %v1712_v50 }
 0x1a0   : > { %v7500_v60 = vpop.f32.mrf.mxu2  ;;  %v7508_v35 = vunpack.c.l.b16 %v1713_v2  ;;  %v1018_v52 = vand.u32 15, %v838_v7  ;;  %vm7510_vm3 = vcmp.ge.s32.totalorder %v1032_v20, 1  ;;  %v9409_v0 = vmov 0 }
 0x1a1   : > { %v7504_v27 = vrot.slane %v9408_v62, 7  ;;  %v9410_v0 = vsel %vm7510_vm3, 4294967295, %v9409_v0  ;;  %v7514_v4 = vunpack.c.l.b16 %v1732_v47  ;;  %v7516_v14 = vunpack.c.l.b16 %v1733_v32 }
 0x1a2   : > { %9411 = vst [vmem:[#allocation73_spill] sm:$0xff] %v9410_v0  ;;  %vm9414_vm0 = vcmp.lt.s32.totalorder %v6644_v25, 1  ;;  %v1011_v26 = vand.u32 15, %v837_v54  ;;  %v1025_v50 = vand.u32 15, %v839_v10  ;;  %v1675_v2 = vsel %vm7322_vm14, %v7122_v59, 0.0 }
 0x1a3   : > { %9412 = vst [vmem:[#allocation74_spill] sm:$0xff] %v7514_v4  ;;  %v1404_v28 = vsel %vm9414_vm0, %v7417_v40, %v1376_v12  ;;  %v2293_v7 = vpack.c.b16 %v1793_v18, %v2268_v39  ;;  %vm7528_vm15 = vcmp.ge.s32.totalorder %v976_v42, 1  ;;  %v9417_v32 = vmov 0  ;;  %v6150_v42 = vld [vmem:[#allocation2 + $0x8] sm:$0xff] }
 0x1a4   : > { %9413 = vst [vmem:[#allocation75_spill] sm:$0xff] %v7516_v14  ;;  %v7524_v11 = vpop.f32.mrf.mxu0  ;;  %v7526_v20 = vld [vmem:[#allocation2 + $0x60] sm:$0xff]  ;;  %v9418_v32 = vsel %vm7528_vm15, 4294967295, %v9417_v32  ;;  %v2145_v24 = vsel %vm7375_vm12, %v1561_v16, 0.0  ;;  %v1816_v34 = vpack.c.b16 %v1793_v18, %v1792_v49  ;;  %v1403_v39 = vsel %vm9414_vm0, %v1376_v12, %v7504_v27 }
 0x1a5   : > { %9415 = vst [vmem:[#allocation76_spill] sm:$0xff] %v7524_v11  ;;  %v1319_v47 = vld [vmem:[#allocation2 + $0x64] sm:$0xff]   ;;  %vm7540_vm14 = vcmp.ge.s32.totalorder %v1018_v52, 1  ;;  %v2105_v62 = vsel %vm7446_vm11, %v1404_v28, 0.0  ;;  %v7548_v16 = vld [vmem:[#allocation2 + $0x60] sm:$0xf]  ;;  %v2209_v49 = vpack.c.bf16 %v2145_v24, %v2145_v24  ;;  %v1699_v31 = vpack.c.bf16 %v1403_v39, %v1403_v39 }
 0x1a6   : > { %9416 = vst [vmem:[#allocation77_spill] sm:$0xff] %v7526_v20  ;;  %v1351_v54 = vunpack.c.l.bf16 %v1319_v47  ;;  %v1352_v10 = vunpack.c.h.bf16 %v1319_v47  ;;  %2765 = vmatmul.bf16.gmra.mxu2 %v7526_v20  ;;  %v1505_v52 = vsel %vm7528_vm15, %v1404_v28, 0.0  ;;  %v1739_v47 = vpack.c.bf16 %v1675_v2, %v1675_v2 }
 0x1a7   : > { %9419 = vst [vmem:[#allocation78_spill] sm:$0xff] %v9418_v32  ;;  %2656 = vmatmul.bf16.gmra.mxu1 %v2293_v7  ;;  %3072 = vmatmul.bf16.gmra.mxu0 %v1816_v34  ;;  %v7557_v37 = vsel %vm7510_vm3, %v6891_v23, 0.0  ;;  %vm7559_vm0 = vcmp.le.s32.totalorder %v1011_v26, 14  ;;  %v9422_v40 = vmov 0  ;;  %vm7563_vm11 = vcmp.le.s32.totalorder %v1025_v50, 14  ;;  %v5666_v32 = vld [vmem:[#allocation9 + $0x40] sm:$0xff] }
 0x1a8   : > { %v7550_v18 = vrot.slane %v1351_v54, 7  ;;  %v1384_v12 = vrot.slane %v1352_v10, 7  ;;  %v9423_v40 = vsel %vm7559_vm0, 4294967295, %v9422_v40  ;;  %v9425_v7 = vmov 0  ;;  %v7578_v22 = vpop.f32.mrf.mxu2 }
 0x1a9   : > { %9424 = vst [vmem:[#allocation79_spill] sm:$0xff] %v9423_v40  ;;  %v9426_v7 = vsel %vm7563_vm11, 4294967295, %v9425_v7  ;;  %vm9428_vm12 = vcmp.lt.s32.totalorder %v6644_v25, 1  ;;  %v2174_v2 = vpack.c.bf16 %v2105_v62, %v2105_v62  ;;  %v1698_v39 = vpack.c.bf16 %v1505_v52, %v1505_v52 }
 0x1aa   : > { %9427 = vst [vmem:[#allocation80_spill] sm:$0xff] %v9426_v7  ;;  %v1395_v24 = vsel %vm9428_vm12, %v1384_v12, %v6851_v3  ;;  %vm9429_vm13 = vmmov %vm9428_vm12  ;;  %v7576_v50 = vunpack.c.l.b16 %v2209_v49  ;;  %v7582_v11 = vunpack.c.l.b16 %v1739_v47  ;;  %v7587_v62 = vsel %vm7563_vm11, %v7122_v59, 0.0 }
 0x1ab   : > { %v1396_v28 = vsel %vm9429_vm13, %v7550_v18, %v1384_v12  ;;  %v1707_v34 = vpack.c.bf16 %v1395_v24, %v1395_v24  ;;  %v1795_v52 = vunpack.c.l.b16 %v1699_v31  ;;  %v834_v49 = vadd.s32 160, %v6644_v25 }
 0x1ac   : > { %v2113_v26 = vsel %vm7540_vm14, %v1396_v28, 0.0  ;;  %9430 = vst [vmem:[#allocation81_spill] sm:$0xff] %v7576_v50  ;;  %v1513_v3 = vsel %vm7510_vm3, %v1396_v28, 0.0  ;;  %v7589_v12 = vpop.f32.mrf.mxu0  ;;  %v9432_v0 = vunpack.c.l.bf16 %v7548_v16  ;;  %v1544_v47 = vrot.slane %v1351_v54, 1 }
 0x1ad   : > { %v2182_v20 = vpack.c.bf16 %v2113_v26, %v2113_v26  ;;  %9431 = vst [vmem:[#allocation82_spill] sm:$0xff] %v7589_v12  ;;  %v7591_v24 = vunpack.c.l.b16 %v1707_v34  ;;  %v1706_v23 = vpack.c.bf16 %v1513_v3, %v1513_v3  ;;  %v2270_v26 = vunpack.c.l.b16 %v2174_v2 }
 0x1ae   : > { %v1543_v28 = vrot.slane %v9432_v0, 1  ;;  %v1794_v41 = vunpack.c.l.b16 %v1698_v39  ;;  %v1545_v63 = vrot.slane %v1352_v10, 1  ;;  %vm9433_vm13 = vcmp.lt.s32.totalorder %v6644_v25, 7 }
 0x1af   : > { %v2278_v44 = vunpack.c.l.b16 %v2182_v20  ;;  %v7596_v14 = vunpack.c.l.b16 %v1706_v23  ;;  %v1734_v20 = vpack.c.bf16 %v7492_v21, %v7492_v21  ;;  %vm9434_vm12 = vmmov %vm9433_vm13  ;;  %v990_v54 = vand.u32 15, %v834_v49 }
 0x1b0   : > { %v1559_v31 = vsel %vm9433_vm13, %v7475_v33, %v1543_v28  ;;  %v1558_v0 = vsel %vm9434_vm12, %v1543_v28, %v1544_v47  ;;  %vm9435_vm3 = vmmov %vm9434_vm12  ;;  %v2294_v3 = vpack.c.b16 %v1795_v52, %v2270_v26  ;;  %v1817_v49 = vpack.c.b16 %v1795_v52, %v1794_v41 }
 0x1b1   : > { %v2298_v34 = vpack.c.b16 %v7591_v24, %v2278_v44  ;;  %v1671_v10 = vsel %vm7559_vm0, %v1559_v31, 0.0  ;;  %v1557_v44 = vsel %vm9435_vm3, %v1544_v47, %v1545_v63  ;;  %v1736_v39 = vpack.c.bf16 %v1558_v0, %v1558_v0  ;;  %vm9436_vm13 = vmmov %vm9435_vm3 }
 0x1b2   : > { %v1735_v23 = vpack.c.bf16 %v1671_v10, %v1671_v10  ;;  %v1673_v33 = vsel %vm7563_vm11, %v1557_v44, 0.0  ;;  %v1556_v21 = vsel %vm9436_vm13, %v1545_v63, %v7099_v55  ;;  %v9437_v2 = vunpack.c.l.bf16 %v7336_v43  ;;  %v7637_v63 = vpop.f32.mrf.mxu2 }
 0x1b3   : > { %2681 = vmatmul.bf16.vlgmr.msrb.gmra.mxu3 %v2298_v34  ;;  %v1737_v28 = vpack.c.bf16 %v1673_v33, %v1673_v33  ;;  %v1738_v59 = vpack.c.bf16 %v1556_v21, %v1556_v21  ;;  %v7621_v12 = vunpack.c.l.b16 %v1734_v20  ;;  %v7625_v34 = vunpack.c.l.b16 %v1736_v39 }
 0x1b4   : > { %v1378_v50 = vrot.slane %v9437_v2, 7  ;;  %v7623_v47 = vunpack.c.l.b16 %v1735_v23  ;;  %v2622_v10 = vpop.f32.mrf.mxu1  ;;  %v7627_v7 = vpop.f32.mrf.mxu0  ;;  %v2147_v55 = vsel %vm7480_vm7, %v1559_v31, 0.0  ;;  %v2149_v41 = vsel %vm7559_vm0, %v1557_v44, 0.0 }
 0x1b5   : > { %v7629_v0 = vunpack.c.l.b16 %v1737_v28  ;;  %v7631_v4 = vunpack.c.l.b16 %v1738_v59  ;;  %v7640_v52 = vadd.f32 %v7284_v46, %v2622_v10  ;;  %v2211_v20 = vpack.c.bf16 %v2147_v55, %v2147_v55 }
 0x1b6   : > { %v2213_v2 = vpack.c.bf16 %v2149_v41, %v2149_v41  ;;  %v9438_v59 = vpack.c.b16 %v7508_v35, %v7506_v6  ;;  %v2184_v31 = vpack.c.bf16 %v7557_v37, %v7557_v37  ;;  %v9439_v23 = vunpack.c.h.bf16 %v7336_v43  ;;  %v5669_v37 = vld [vmem:[#allocation9 + $0x58] sm:$0xff] }
 0x1b7   : > { %2661 = vmatmul.bf16.gmra.mxu1 %v2294_v3  ;;  %3077 = vmatmul.bf16.gmra.mxu0 %v1817_v49  ;;  %vm7655_vm3 = vcmp.ge.s32.totalorder %v990_v54, 1  ;;  %v9440_v39 = vmov 0  ;;  %vm9443_vm12 = vcmp.lt.s32.totalorder %v6644_v25, 1  ;;  %v7662_v35 = vunpack.c.l.b16 %v2211_v20 }
 0x1b8   : > { %3210 = vmatmul.bf16.vlgmr.msrb.gmra.mxu2 %v9438_v59  ;;  %v1379_v44 = vrot.slane %v9439_v23, 7  ;;  %v9441_v39 = vsel %vm7655_vm3, 4294967295, %v9440_v39  ;;  %v1402_v6 = vsel %vm9443_vm12, %v7504_v27, %v1378_v50  ;;  %v7664_v43 = vunpack.c.l.b16 %v2213_v2  ;;  %3117 = vmatpush.bf16.msrb.mxu1 %v5669_v37  ;;  %vm9444_vm13 = vmmov %vm9443_vm12 }
 0x1b9   : > { %9442 = vst [vmem:[#allocation83_spill] sm:$0xff] %v9441_v39  ;;  %v2215_v21 = vpack.c.bf16 %v7587_v62, %v7587_v62  ;;  %v1507_v27 = vsel %vm7655_vm3, %v1402_v6, 0.0  ;;  %v2107_v28 = vsel %vm7528_vm15, %v1402_v6, 0.0  ;;  %v2280_v10 = vunpack.c.l.b16 %v2184_v31 }
 0x1ba   : > { %v1401_v49 = vsel %vm9444_vm13, %v1378_v50, %v1379_v44  ;;  %v2176_v59 = vpack.c.bf16 %v2107_v28, %v2107_v28  ;;  %v1700_v23 = vpack.c.bf16 %v1507_v27, %v1507_v27  ;;  %v7685_v37 = vpop.f32.mrf.mxu2  ;;  %v836_v54 = vadd.s32 176, %v6644_v25 }
 0x1bb   : > { %v7680_v62 = vunpack.c.l.b16 %v2215_v21  ;;  %v1701_v2 = vpack.c.bf16 %v1401_v49, %v1401_v49  ;;  %v2299_v50 = vpack.c.b16 %v6943_v48, %v2280_v10  ;;  %v2117_v27 = vsel %vm6879_vm8, %v6970_v9, 0.0  ;;  %vm9451_vm8 = vmmov %vm9444_vm13 }
 0x1bc   : > { %v2624_v55 = vpop.f32.mrf.mxu1  ;;  %v7678_v41 = vpop.f32.mrf.mxu0  ;;  %v2272_v3 = vunpack.c.l.b16 %v2176_v59  ;;  %v1796_v21 = vunpack.c.l.b16 %v1700_v23  ;;  %v1004_v46 = vand.u32 15, %v836_v54  ;;  %v9447_v54 = vunpack.c.h.bf16 %v7434_v8 }
 0x1bd   : > { %v7683_v20 = vadd.f32 %v7316_v1, %v2624_v55  ;;  %v1797_v6 = vunpack.c.l.b16 %v1701_v2  ;;  %v9445_v1 = vunpack.c.l.bf16 %v7434_v8  ;;  %v9446_v2 = vpack.c.b16 %v6704_v30, %v6702_v29 }
 0x1be   : > { %v1381_v59 = vrot.slane %v9447_v54, 7  ;;  %v2186_v23 = vpack.c.bf16 %v2117_v27, %v2117_v27  ;;  %vm7706_vm12 = vcmp.ge.s32.totalorder %v1004_v46, 1  ;;  %v5668_v27 = vld [vmem:[#allocation9 + $0x50] sm:$0xff]  ;;  %v5667_v54 = vld [vmem:[#allocation9 + $0x48] sm:$0xff] }
 0x1bf   : > { %v1380_v55 = vrot.slane %v9445_v1, 7  ;;  %v2295_v33 = vpack.c.b16 %v1797_v6, %v2272_v3  ;;  %v1818_v31 = vpack.c.b16 %v1797_v6, %v1796_v21  ;;  %v7722_v6 = vld [vmem:[#allocation2 + $0x68] sm:$0xff]   ;;  %3118 = vmatpush.bf16.msrb.mxu1 %v5668_v27 }
 0x1c0   : > { %9452 = vst [vmem:[#allocation85_spill] sm:$0xff] %v7722_v6 }
 0x1c1   : > { %v1400_v9 = vsel %vm9444_vm13, %v1379_v44, %v1380_v55  ;;  %v1399_v3 = vsel %vm9451_vm8, %v1380_v55, %v1381_v59  ;;  %v7727_v55 = vld [vmem:[#allocation2 + $0x70] sm:$0xff]   ;;  %vm9460_vm13 = vmmov %vm9451_vm8 }
 0x1c2   : > { %v1509_v30 = vsel %vm7706_vm12, %v1400_v9, 0.0  ;;  %v2109_v8 = vsel %vm7655_vm3, %v1400_v9, 0.0  ;;  %v1703_v44 = vpack.c.bf16 %v1399_v3, %v1399_v3  ;;  %9453 = vst [vmem:[#allocation86_spill] sm:$0xff] %v7727_v55  ;;  %vm9461_vm3 = vmmov %vm9451_vm8 }
 0x1c3   : > { %2686 = vmatmul.bf16.gmra.mxu3 %v2299_v50  ;;  %v9448_v50 = vmov 0  ;;  %v2178_v1 = vpack.c.bf16 %v2109_v8, %v2109_v8  ;;  %3119 = vmatpush.bf16.msrb.mxu1 %v5667_v54  ;;  %v9458_v54 = vunpack.c.h.bf16 %v7727_v55 }
 0x1c4   : > { %v2627_v49 = vpop.f32.mrf.mxu1  ;;  %v7693_v28 = vpop.f32.mrf.mxu0  ;;  %v9449_v50 = vsel %vm7706_vm12, 4294967295, %v9448_v50  ;;  %v1799_v26 = vunpack.c.l.b16 %v1703_v44  ;;  %v9456_v44 = vunpack.c.l.bf16 %v7727_v55 }
 0x1c5   : > { %v7699_v10 = vadd.f32 %v7353_v51, %v2627_v49  ;;  %9450 = vst [vmem:[#allocation84_spill] sm:$0xff] %v9449_v50  ;;  %v7712_v51 = vpop.f32.mrf.mxu2  ;;  %v1702_v49 = vpack.c.bf16 %v1509_v30, %v1509_v30  ;;  %v2274_v38 = vunpack.c.l.b16 %v2178_v1  ;;  %v9454_v30 = vunpack.c.l.bf16 %v7548_v16 }
 0x1c6   : > { %v3379_v1 = vrot.slane %v9456_v44, 7  ;;  %v9457_v16 = vpack.c.b16 %v6859_v61, %v6874_v15 }
 0x1c7   : > { %2666 = vmatmul.bf16.gmra.mxu1 %v2295_v33  ;;  %3082 = vmatmul.bf16.gmra.mxu0 %v1818_v31  ;;  %v2282_v33 = vunpack.c.l.b16 %v2186_v23  ;;  %v9212_v23 = vunpack.c.h.bf16 %v7722_v6  ;;  %v1798_v39 = vunpack.c.l.b16 %v1702_v49  ;;  %v5707_v6 = vld [vmem:[#allocation2 + $0x10] sm:$0xff] }
 0x1c8   : > { %3215 = vmatmul.bf16.gmra.mxu2 %v9446_v2  ;;  %3120 = vmatpush.bf16.msrb.mxu1 %v5666_v32 }
 0x1c9   : > { %v2300_v2 = vpack.c.b16 %v7017_v36, %v2282_v33  ;;  %v7739_v33 = vrot.slane %v9212_v23, 7  ;;  %v1819_v3 = vpack.c.b16 %v1799_v26, %v1798_v39 }
 0x1cb   : > { %9455 = vst [vmem:[#allocation87_spill] sm:$0xff] %v7739_v33 }
 0x1cc   : > { %v2629_v31 = vpop.f32.mrf.mxu1  ;;  %v7720_v46 = vpop.f32.mrf.mxu0 }
 0x1cd   : > { %v7725_v21 = vadd.f32 %v7392_v58, %v2629_v31  ;;  %v5706_v58 = vld [vmem:[#allocation9 + $0x178] sm:$0xff]  ;;  %v7733_v8 = vpop.f32.mrf.mxu2  ;;  %v1382_v31 = vrot.slane %v9454_v30, 7  ;;  %v3394_v30 = vsel %vm9451_vm8, %v7739_v33, %v3379_v1  ;;  %vm9462_vm8 = vmmov %vm9461_vm3 }
 0x1ce   : > { %2791 = vmatpush.bf16.msrb.mxu3 %v5706_v58  ;;  %v7753_v58 = vrot.slane %v9458_v54, 7  ;;  %v5746_v33 = vld [vmem:[#allocation9 + $0x238] sm:$0xff] }
 0x1cf   : > { %v1397_v44 = vsel %vm9462_vm8, %v1382_v31, %v7550_v18  ;;  %4270 = vmatpush.bf16.msra.mxu1 %v5746_v33 }
 0x1d0   : > { %9459 = vst [vmem:[#allocation88_spill] sm:$0xff] %v7753_v58  ;;  %v3393_v61 = vsel %vm9461_vm3, %v3379_v1, %v7753_v58 }
 0x1d3   : > { %2691 = vmatmul.bf16.gmra.mxu3 %v2300_v2  ;;  %v2296_v2 = vpack.c.b16 %v1799_v26, %v2274_v38  ;;  %v5705_v38 = vld [vmem:[#allocation9 + $0x170] sm:$0xff]  ;;  %v3443_v26 = vsel %vm7540_vm14, %v3394_v30, 0.0 }
 0x1d4   : > { %v2632_v27 = vpop.f32.mrf.mxu1  ;;  %v7741_v9 = vpop.f32.mrf.mxu0  ;;  %v3571_v39 = vpack.c.bf16 %v3443_v26, %v3443_v26  ;;  %2792 = vmatpush.bf16.msrb.mxu3 %v5705_v38  ;;  %v1705_v38 = vpack.c.bf16 %v1397_v44, %v1397_v44 }
 0x1d5   : > { %v7746_v49 = vadd.f32 %v7459_v19, %v2632_v27  ;;  %v1398_v19 = vsel %vm9460_vm13, %v1381_v59, %v1382_v31  ;;  %v3572_v27 = vpack.c.bf16 %v3393_v61, %v3393_v61  ;;  %v7778_v1 = vpop.f32.mrf.mxu2 }
 0x1d6   : > { %v2111_v59 = vsel %vm7706_vm12, %v1398_v19, 0.0  ;;  %v1801_v26 = vunpack.c.l.b16 %v1705_v38 }
 0x1d7   : > { %2671 = vmatmul.bf16.gmra.mxu1 %v2296_v2  ;;  %3087 = vmatmul.bf16.gmra.mxu0 %v1819_v3  ;;  %v1511_v3 = vsel %vm7540_vm14, %v1398_v19, 0.0  ;;  %v7772_v2 = vunpack.c.l.b16 %v3571_v39  ;;  %v7774_v32 = vunpack.c.l.b16 %v3572_v27  ;;  %v2180_v18 = vpack.c.bf16 %v2111_v59, %v2111_v59  ;;  %v5704_v27 = vld [vmem:[#allocation9 + $0x168] sm:$0xff] }
 0x1d8   : > { %3220 = vmatmul.bf16.gmra.mxu2 %v9457_v16  ;;  %v1704_v31 = vpack.c.bf16 %v1511_v3, %v1511_v3  ;;  %v9465_v19 = vpack.c.b16 %v7078_v45, %v7075_v5  ;;  %2793 = vmatpush.bf16.msrb.mxu3 %v5704_v27  ;;  %v9466_v59 = vpack.c.b16 %v6926_v13, %v6924_v17  ;;  %v5738_v5 = vld [vmem:[#allocation9 + $0x1f8] sm:$0xff]  ;;  %v5703_v45 = vld [vmem:[#allocation9 + $0x160] sm:$0xff]  ;;  %v5736_v13 = vld [vmem:[#allocation9 + $0x1e8] sm:$0xff]  ;;  %vm9546_vm14 = vcmp.lt.s32.totalorder %v6644_v25, 7 }
 0x1d9   : > { %9463 = vst [vmem:[#allocation89_spill] sm:$0xff] %v7772_v2  ;;  %v2276_v61 = vunpack.c.l.b16 %v2180_v18  ;;  %4181 = vmatpush.bf16.msra.mxu0 %v5738_v5  ;;  %v5701_v5 = vld [vmem:[#allocation9 + $0x150] sm:$0xff]  ;;  %v5699_v2 = vld [vmem:[#allocation9 + $0x140] sm:$0xff]  ;;  %vm9569_vm13 = vmmov %vm9546_vm14 }
 0x1da   : > { %9464 = vst [vmem:[#allocation90_spill] sm:$0xff] %v7774_v32  ;;  %v1800_v39 = vunpack.c.l.b16 %v1704_v31  ;;  %v7803_v31 = vld [vmem:[#allocation2 + $0x68] sm:$0xff]  ;;  %v7839_v32 = vld [vmem:[#allocation2 + $0x78] sm:$0xff]  ;;  %vm9571_vm8 = vmmov %vm9569_vm13 }
 0x1db   : > { %v2297_v44 = vpack.c.b16 %v1801_v26, %v2276_v61  ;;  %v5642_v61 = vld [vmem:[#allocation2] sm:$0xff] }
 0x1dc   : > { %v2634_v16 = vpop.f32.mrf.mxu1  ;;  %v7776_v54 = vpop.f32.mrf.mxu0  ;;  %v1820_v3 = vpack.c.b16 %v1801_v26, %v1800_v39  ;;  %2794 = vmatpush.bf16.msrb.mxu3 %v5703_v45  ;;  %v5702_v26 = vld [vmem:[#allocation9 + $0x158] sm:$0xff] }
 0x1dd   : > { %v7781_v30 = vadd.f32 %v7500_v60, %v2634_v16  ;;  %v7796_v16 = vpop.f32.mrf.mxu2  ;;  %v5734_v45 = vld [vmem:[#allocation9 + $0x1d8] sm:$0xff] }
 0x1e0   : > { %2795 = vmatpush.bf16.msrb.mxu3 %v5702_v26  ;;  %v5733_v26 = vld [vmem:[#allocation9 + $0x1d0] sm:$0xff] }
 0x1e3   : > { %2696 = vmatmul.bf16.gmra.mxu3 %v9465_v19 }
 0x1e4   : > { %v2637_v23 = vpop.f32.mrf.mxu1  ;;  %v7791_v60 = vpop.f32.mrf.mxu0  ;;  %2796 = vmatpush.bf16.msrb.mxu3 %v5701_v5  ;;  %v9471_v5 = vld [vmem:[#allocation39_spill] sm:$0xff] }
 0x1e5   : > { %v7789_v58 = vadd.f32 %v7578_v22, %v2637_v23  ;;  %v5737_v23 = vld [vmem:[#allocation9 + $0x1f0] sm:$0xff]  ;;  %v2743_v19 = vpop.f32.mrf.mxu2 }
 0x1e6   : > { %4182 = vmatpush.bf16.msra.mxu0 %v5737_v23 }
 0x1e7   : > { %2676 = vmatmul.bf16.gmra.mxu1 %v2297_v44  ;;  %3092 = vmatmul.bf16.gmra.mxu0 %v1820_v3  ;;  %v9467_v44 = vld [vmem:[#allocation32_spill] sm:$0xff] }
 0x1e8   : > { %3225 = vmatmul.bf16.gmra.mxu2 %v9466_v59  ;;  %v9468_v3 = vpack.c.b16 %v6987_v57, %v9467_v44  ;;  %v9469_v59 = vpack.c.b16 %v7591_v24, %v7596_v14  ;;  %v7820_v57 = vld [vmem:[#allocation2 + $0x70] sm:$0xff]  ;;  %v5700_v14 = vld [vmem:[#allocation9 + $0x148] sm:$0xff] }
 0x1e9   : > { %2797 = vmatpush.bf16.msrb.mxu3 %v5700_v14 }
 0x1ea   : > { %4183 = vmatpush.bf16.msra.mxu0 %v5736_v13 }
 0x1ec   : > { %v2639_v38 = vpop.f32.mrf.mxu1  ;;  %v7801_v18 = vpop.f32.mrf.mxu0 }
 0x1ed   : > { %v7799_v22 = vadd.f32 %v7637_v63, %v2639_v38  ;;  %v5735_v63 = vld [vmem:[#allocation9 + $0x1e0] sm:$0xff]  ;;  %v2746_v23 = vpop.f32.mrf.mxu2  ;;  %2798 = vmatpush.bf16.msrb.mxu3 %v5699_v2 }
 0x1ee   : > { %4184 = vmatpush.bf16.msra.mxu0 %v5735_v63 }
 0x1f2   : > { %4185 = vmatpush.bf16.msra.mxu0 %v5734_v45 }
 0x1f3   : > { %2770 = vmatmul.bf16.vlgmr.msra.gmra.mxu3 %v7803_v31 }
 0x1f4   : > { %v2642_v39 = vpop.f32.mrf.mxu1  ;;  %v7815_v38 = vpop.f32.mrf.mxu0 }
 0x1f5   : > { %v7807_v27 = vadd.f32 %v7685_v37, %v2642_v39  ;;  %v5732_v39 = vld [vmem:[#allocation9 + $0x1c8] sm:$0xff]  ;;  %v2748_v63 = vpop.f32.mrf.mxu2 }
 0x1f6   : > { %4186 = vmatpush.bf16.msra.mxu0 %v5733_v26 }
 0x1f7   : > { %3097 = vmatmul.bf16.gmra.mxu0 %v9469_v59  ;;  %3121 = vmatmul.bf16.vlgmr.msrb.gmra.mxu1 %v5642_v61  ;;  %v5731_v59 = vld [vmem:[#allocation9 + $0x1c0] sm:$0xff] }
 0x1f8   : > { %3230 = vmatmul.bf16.gmra.mxu2 %v9468_v3 }
 0x1fa   : > { %4187 = vmatpush.bf16.msra.mxu0 %v5732_v39 }
 0x1fc   : > { %v2644_v13 = vpop.f32.mrf.mxu1  ;;  %v7823_v24 = vpop.f32.mrf.mxu0 }
 0x1fd   : > { %v7818_v37 = vadd.f32 %v7712_v51, %v2644_v13  ;;  %v9470_v51 = vld [vmem:[#allocation40_spill] sm:$0xff]  ;;  %v9473_v13 = vld [vmem:[#allocation30_spill] sm:$0xff] }
 0x1fe   : > { %v9472_v45 = vpack.c.b16 %v9470_v51, %v9471_v5  ;;  %v9474_v26 = vpack.c.b16 %v6943_v48, %v9473_v13  ;;  %4188 = vmatpush.bf16.msra.mxu0 %v5731_v59  ;;  %v5730_v51 = vld [vmem:[#allocation9 + $0x1b8] sm:$0xff]  ;;  %v9478_v59 = vld [vmem:[#allocation43_spill] sm:$0xff] }
 0x1ff   : > { %4092 = vmatpush.bf16.msra.mxu3 %v5730_v51 }
 0x203   : > { %2775 = vmatmul.bf16.gmra.mxu3 %v7820_v57 }
 0x204   : > { %v2647_v61 = vpop.f32.mrf.mxu1  ;;  %v7834_v39 = vpop.f32.mrf.mxu0 }
 0x205   : > { %v7826_v3 = vadd.f32 %v7733_v8, %v2647_v61  ;;  %9475 = vst [vmem:[#allocation32_spill] sm:$0xff] %v7834_v39  ;;  %v2751_v61 = vpop.f32.mrf.mxu2  ;;  %v9511_v39 = vld [vmem:[#allocation74_spill] sm:$0xff] }
 0x207   : > { %3102 = vmatmul.bf16.gmra.mxu0 %v9474_v26  ;;  %3126 = vmatmul.bf16.gmra.mxu1 %v6150_v42  ;;  %v9477_v42 = vld [vmem:[#allocation44_spill] sm:$0xff] }
 0x208   : > { %3235 = vmatmul.bf16.gmra.mxu2 %v9472_v45  ;;  %v9479_v2 = vpack.c.b16 %v9477_v42, %v9478_v59 }
 0x20c   : > { %v2649_v14 = vpop.f32.mrf.mxu1  ;;  %v7848_v13 = vpop.f32.mrf.mxu0 }
 0x20d   : > { %v7837_v8 = vadd.f32 %v7778_v1, %v2649_v14  ;;  %9480 = vst [vmem:[#allocation39_spill] sm:$0xff] %v7848_v13  ;;  %v9481_v1 = vld [vmem:[#allocation35_spill] sm:$0xff]  ;;  %v6151_v14 = vld [vmem:[#allocation2 + $0x10] sm:$0xff]  ;;  %v2753_v50 = vpop.f32.mrf.mxu2 }
 0x20e   : > { %v9482_v26 = vpack.c.b16 %v7017_v36, %v9481_v1  ;;  %v9487_v36 = vld [vmem:[#allocation51_spill] sm:$0xff] }
 0x20f   : > { %v9488_v1 = vpack.c.b16 %v9486_v53, %v9487_v36 }
 0x213   : > { %2780 = vmatmul.bf16.gmra.mxu3 %v7839_v32 }
 0x214   : > { %v2652_v48 = vpop.f32.mrf.mxu1 }
 0x215   : > { %v7843_v45 = vadd.f32 %v7796_v16, %v2652_v48  ;;  %v5682_v16 = vld [vmem:[#allocation2 + $0x80] sm:$0xff]  ;;  %v7855_v48 = vpop.f32.mrf.mxu0  ;;  %v2756_v42 = vpop.f32.mrf.mxu2 }
 0x216   : > { %9484 = vst [vmem:[#allocation44_spill] sm:$0xff] %v7855_v48  ;;  %v9491_v48 = vld [vmem:[#allocation20_spill] sm:$0xff] }
 0x217   : > { %9476 = vst [vmem:[#allocation40_spill] sm:$0xff] %v7843_v45  ;;  %3107 = vmatmul.bf16.gmra.mxu0 %v9482_v26  ;;  %3131 = vmatmul.bf16.gmra.mxu1 %v6151_v14  ;;  %v6152_v26 = vld [vmem:[#allocation2 + $0x18] sm:$0xff] }
 0x218   : > { %3240 = vmatmul.bf16.gmra.mxu2 %v9479_v2 }
 0x21c   : > { %v2654_v51 = vpop.f32.mrf.mxu1 }
 0x21d   : > { %v7853_v40 = vadd.f32 %v2743_v19, %v2654_v51  ;;  %v7862_v33 = vpop.f32.mrf.mxu0  ;;  %v2758_v14 = vpop.f32.mrf.mxu2 }
 0x21e   : > { %9489 = vst [vmem:[#allocation35_spill] sm:$0xff] %v7862_v33  ;;  %v9496_v33 = vld [vmem:[#allocation56_spill] sm:$0xff] }
 0x21f   : > { %9483 = vst [vmem:[#allocation30_spill] sm:$0xff] %v7853_v40  ;;  %v6154_v40 = vld [vmem:[#allocation2 + $0x28] sm:$0xff] }
 0x223   : > { %2785 = vmatmul.bf16.gmra.mxu3 %v5682_v16  ;;  %v9492_v16 = vpack.c.b16 %v9491_v48, %v6702_v29  ;;  %v5745_v29 = vld [vmem:[#allocation9 + $0x230] sm:$0xff] }
 0x224   : > { %v2657_v2 = vpop.f32.mrf.mxu1  ;;  %4271 = vmatpush.bf16.msra.mxu1 %v5745_v29 }
 0x225   : > { %v7857_v55 = vadd.f32 %v2746_v23, %v2657_v2  ;;  %v5729_v23 = vld [vmem:[#allocation9 + $0x1b0] sm:$0xff]  ;;  %v7871_v53 = vpop.f32.mrf.mxu0 }
 0x226   : > { %4093 = vmatpush.bf16.msra.mxu3 %v5729_v23  ;;  %9493 = vst [vmem:[#allocation51_spill] sm:$0xff] %v7871_v53 }
 0x227   : > { %9485 = vst [vmem:[#allocation43_spill] sm:$0xff] %v7857_v55  ;;  %3136 = vmatmul.bf16.gmra.mxu1 %v6152_v26  ;;  %4189 = vmatmul.bf16.vlgmr.msra.gmra.mxu0 %v5707_v6  ;;  %v5708_v6 = vld [vmem:[#allocation2 + $0x18] sm:$0xff] }
 0x228   : > { %3245 = vmatmul.bf16.gmra.mxu2 %v9488_v1  ;;  %v9495_v26 = vld [vmem:[#allocation57_spill] sm:$0xff] }
 0x229   : > { %v9497_v13 = vpack.c.b16 %v9495_v26, %v9496_v33 }
 0x22c   : > { %v2659_v19 = vpop.f32.mrf.mxu1 }
 0x22d   : > { %v7864_v51 = vadd.f32 %v2748_v63, %v2659_v19  ;;  %v2761_v63 = vpop.f32.mrf.mxu2  ;;  %v6153_v19 = vld [vmem:[#allocation2 + $0x20] sm:$0xff] }
 0x22f   : > { %9490 = vst [vmem:[#allocation52_spill] sm:$0xff] %v7864_v51  ;;  %v7882_v51 = vpop.f32.mrf.mxu0 }
 0x230   : > { %9499 = vst [vmem:[#allocation56_spill] sm:$0xff] %v7882_v51 }
 0x233   : > { %2799 = vmatmul.bf16.vlgmr.msrb.gmra.mxu3 %v9492_v16 }
 0x234   : > { %v2662_v2 = vpop.f32.mrf.mxu1 }
 0x235   : > { %v7873_v1 = vadd.f32 %v2751_v61, %v2662_v2  ;;  %v2763_v61 = vpop.f32.mrf.mxu2  ;;  %v9500_v2 = vld [vmem:[#allocation33_spill] sm:$0xff] }
 0x236   : > { %v7869_v55 = vpop.f32.mrf.mxu3  ;;  %v9501_v53 = vpack.c.b16 %v9500_v2, %v6874_v15  ;;  %v5728_v2 = vld [vmem:[#allocation9 + $0x1a8] sm:$0xff] }
 0x237   : > { %9494 = vst [vmem:[#allocation20_spill] sm:$0xff] %v7873_v1  ;;  %3141 = vmatmul.bf16.gmra.mxu1 %v6153_v19  ;;  %4194 = vmatmul.bf16.gmra.mxu0 %v5708_v6  ;;  %v5709_v6 = vld [vmem:[#allocation2 + $0x20] sm:$0xff]  ;;  %v9503_v19 = vld [vmem:[#allocation65_spill] sm:$0xff] }
 0x238   : > { %3250 = vmatmul.bf16.gmra.mxu2 %v9497_v13  ;;  %v9504_v29 = vpack.c.b16 %v7409_v56, %v9503_v19  ;;  %4094 = vmatpush.bf16.msra.mxu3 %v5728_v2 }
 0x23c   : > { %v2664_v48 = vpop.f32.mrf.mxu1 }
 0x23d   : > { %v7880_v23 = vadd.f32 %v2753_v50, %v2664_v48  ;;  %v7894_v50 = vpop.f32.mrf.mxu0  ;;  %v2766_v48 = vpop.f32.mrf.mxu2 }
 0x23e   : > { %v7878_v16 = vpop.f32.mrf.mxu3  ;;  %9505 = vst [vmem:[#allocation65_spill] sm:$0xff] %v7894_v50  ;;  %v5710_v50 = vld [vmem:[#allocation2 + $0x28] sm:$0xff] }
 0x23f   : > { %9498 = vst [vmem:[#allocation57_spill] sm:$0xff] %v7880_v23 }
 0x243   : > { %2804 = vmatmul.bf16.gmra.mxu3 %v9501_v53  ;;  %v9506_v53 = vld [vmem:[#allocation34_spill] sm:$0xff] }
 0x244   : > { %v2667_v26 = vpop.f32.mrf.mxu1 }
 0x245   : > { %v7889_v1 = vadd.f32 %v2756_v42, %v2667_v26  ;;  %v9507_v42 = vpack.c.b16 %v9506_v53, %v6924_v17  ;;  %v7903_v26 = vpop.f32.mrf.mxu0  ;;  %v5744_v17 = vld [vmem:[#allocation9 + $0x228] sm:$0xff] }
 0x246   : > { %v7887_v13 = vpop.f32.mrf.mxu3  ;;  %9508 = vst [vmem:[#allocation34_spill] sm:$0xff] %v7903_v26  ;;  %4272 = vmatpush.bf16.msra.mxu1 %v5744_v17  ;;  %v9517_v17 = vpack.c.b16 %v7623_v47, %v7621_v12  ;;  %v5727_v47 = vld [vmem:[#allocation9 + $0x1a0] sm:$0xff] }
 0x247   : > { %9502 = vst [vmem:[#allocation33_spill] sm:$0xff] %v7889_v1  ;;  %3146 = vmatmul.bf16.gmra.mxu1 %v6154_v40  ;;  %4199 = vmatmul.bf16.gmra.mxu0 %v5709_v6  ;;  %v2768_v40 = vpop.f32.mrf.mxu2  ;;  %v9510_v1 = vld [vmem:[#allocation75_spill] sm:$0xff] }
 0x248   : > { %3255 = vmatmul.bf16.gmra.mxu2 %v9504_v29  ;;  %v9512_v45 = vpack.c.b16 %v9510_v1, %v9511_v39  ;;  %4095 = vmatpush.bf16.msra.mxu3 %v5727_v47 }
 0x24c   : > { %v2669_v51 = vpop.f32.mrf.mxu1 }
 0x24d   : > { %v7898_v15 = vadd.f32 %v2758_v14, %v2669_v51  ;;  %v6155_v14 = vld [vmem:[#allocation2 + $0x30] sm:$0xff] }
 0x24e   : > { %v7896_v23 = vpop.f32.mrf.mxu3 }
 0x24f   : > { %v7918_v26 = vpop.f32.mrf.mxu2 }
 0x250   : > { %9513 = vst [vmem:[#allocation75_spill] sm:$0xff] %v7918_v26 }
 0x253   : > { %2809 = vmatmul.bf16.gmra.mxu3 %v9507_v42  ;;  %v7914_v42 = vpop.f32.mrf.mxu0 }
 0x254   : > { %v2672_v56 = vpop.f32.mrf.mxu1 }
 0x255   : > { %v7907_v6 = vadd.f32 %v2761_v63, %v2672_v56  ;;  %v9514_v63 = vld [vmem:[#allocation36_spill] sm:$0xff] }
 0x256   : > { %v7905_v29 = vpop.f32.mrf.mxu3  ;;  %v9515_v56 = vpack.c.b16 %v9514_v63, %v9467_v44 }
 0x257   : > { %9509 = vst [vmem:[#allocation91_spill] sm:$0xff] %v7907_v6  ;;  %3151 = vmatmul.bf16.gmra.mxu1 %v6155_v14  ;;  %4204 = vmatmul.bf16.gmra.mxu0 %v5710_v50  ;;  %v5711_v50 = vld [vmem:[#allocation2 + $0x30] sm:$0xff] }
 0x258   : > { %3260 = vmatmul.bf16.gmra.mxu2 %v9512_v45 }
 0x25b   : > { %v7930_v6 = vpop.f32.mrf.mxu0 }
 0x25c   : > { %v2674_v51 = vpop.f32.mrf.mxu1 }
 0x25d   : > { %v7916_v2 = vadd.f32 %v2763_v61, %v2674_v51  ;;  %v6156_v61 = vld [vmem:[#allocation2 + $0x38] sm:$0xff]  ;;  %v7932_v51 = vpop.f32.mrf.mxu2 }
 0x25e   : > { %v7912_v53 = vpop.f32.mrf.mxu3  ;;  %9518 = vst [vmem:[#allocation36_spill] sm:$0xff] %v7932_v51  ;;  %v5712_v51 = vld [vmem:[#allocation2 + $0x38] sm:$0xff] }
 0x263   : > { %2814 = vmatmul.bf16.gmra.mxu3 %v9515_v56  ;;  %v7938_v56 = vpop.f32.mrf.mxu0 }
 0x264   : > { %v2677_v1 = vpop.f32.mrf.mxu1  ;;  %9520 = vst [vmem:[#allocation93_spill] sm:$0xff] %v7938_v56  ;;  %v5715_v56 = vld [vmem:[#allocation2 + $0x50] sm:$0xff] }
 0x265   : > { %v7925_v14 = vadd.f32 %v2766_v48, %v2677_v1  ;;  %v9521_v48 = vld [vmem:[#allocation41_spill] sm:$0xff] }
 0x266   : > { %v7923_v45 = vpop.f32.mrf.mxu3  ;;  %v9522_v1 = vpack.c.b16 %v9521_v48, %v9471_v5  ;;  %v5743_v5 = vld [vmem:[#allocation9 + $0x220] sm:$0xff] }
 0x267   : > { %9516 = vst [vmem:[#allocation74_spill] sm:$0xff] %v7925_v14  ;;  %3156 = vmatmul.bf16.gmra.mxu1 %v6156_v61  ;;  %4209 = vmatmul.bf16.gmra.mxu0 %v5711_v50 }
 0x268   : > { %3265 = vmatmul.bf16.gmra.mxu2 %v9517_v17  ;;  %v7943_v17 = vpop.f32.mrf.mxu2  ;;  %4273 = vmatpush.bf16.msra.mxu1 %v5743_v5  ;;  %v5713_v5 = vld [vmem:[#allocation2 + $0x40] sm:$0xff] }
 0x269   : > { %9523 = vst [vmem:[#allocation41_spill] sm:$0xff] %v7943_v17 }
 0x26b   : > { %v7953_v48 = vpop.f32.mrf.mxu0 }
 0x26c   : > { %v2679_v26 = vpop.f32.mrf.mxu1  ;;  %9526 = vst [vmem:[#allocation95_spill] sm:$0xff] %v7953_v48  ;;  %v9533_v48 = vpack.c.b16 %v7582_v11, %v7631_v4 }
 0x26d   : > { %v7936_v63 = vadd.f32 %v2768_v40, %v2679_v26  ;;  %v9525_v26 = vpack.c.b16 %v7629_v0, %v7625_v34  ;;  %v6157_v40 = vld [vmem:[#allocation2 + $0x40] sm:$0xff] }
 0x26e   : > { %v7934_v44 = vpop.f32.mrf.mxu3 }
 0x26f   : > { %9519 = vst [vmem:[#allocation92_spill] sm:$0xff] %v7936_v63  ;;  %v9554_v63 = vld [vmem:[#allocation70_spill] sm:$0xff] }
 0x270   : > { %v7957_v17 = vpop.f32.mrf.mxu2 }
 0x271   : > { %9527 = vst [vmem:[#allocation96_spill] sm:$0xff] %v7957_v17 }
 0x273   : > { %2819 = vmatmul.bf16.gmra.mxu3 %v9522_v1 }
 0x274   : > { %v7945_v61 = vpop.f32.mrf.mxu1 }
 0x276   : > { %v2771_v14 = vpop.f32.mrf.mxu3 }
 0x277   : > { %v7948_v50 = vadd.f32 %v2771_v14, %v7869_v55  ;;  %3161 = vmatmul.bf16.gmra.mxu1 %v6157_v40  ;;  %4214 = vmatmul.bf16.gmra.mxu0 %v5712_v51  ;;  %v9529_v14 = vld [vmem:[#allocation46_spill] sm:$0xff]  ;;  %v7967_v51 = vpop.f32.mrf.mxu0 }
 0x278   : > { %3270 = vmatmul.bf16.gmra.mxu2 %v9525_v26  ;;  %9531 = vst [vmem:[#allocation46_spill] sm:$0xff] %v7967_v51  ;;  %v7975_v17 = vpop.f32.mrf.mxu2  ;;  %v9544_v51 = vld [vmem:[#allocation64_spill] sm:$0xff] }
 0x279   : > { %9524 = vst [vmem:[#allocation94_spill] sm:$0xff] %v7948_v50  ;;  %v9530_v50 = vpack.c.b16 %v9529_v14, %v9478_v59 }
 0x27a   : > { %9534 = vst [vmem:[#allocation99_spill] sm:$0xff] %v7975_v17 }
 0x27c   : > { %v7955_v47 = vpop.f32.mrf.mxu1 }
 0x27e   : > { %v2773_v1 = vpop.f32.mrf.mxu3 }
 0x27f   : > { %v7960_v55 = vadd.f32 %v2773_v1, %v7878_v16  ;;  %v6158_v16 = vld [vmem:[#allocation2 + $0x48] sm:$0xff]  ;;  %v7982_v14 = vpop.f32.mrf.mxu0 }
 0x280   : > { %9536 = vst [vmem:[#allocation101_spill] sm:$0xff] %v7982_v14 }
 0x281   : > { %9528 = vst [vmem:[#allocation97_spill] sm:$0xff] %v7960_v55 }
 0x283   : > { %2824 = vmatmul.bf16.gmra.mxu3 %v9530_v50 }
 0x284   : > { %v7965_v26 = vpop.f32.mrf.mxu1 }
 0x286   : > { %v2776_v0 = vpop.f32.mrf.mxu3 }
 0x287   : > { %v7970_v40 = vadd.f32 %v2776_v0, %v7887_v13  ;;  %3166 = vmatmul.bf16.gmra.mxu1 %v6158_v16  ;;  %4219 = vmatmul.bf16.gmra.mxu0 %v5713_v5  ;;  %v845_v13 = vadd.s32 248, %v6644_v25  ;;  %v7985_v0 = vpop.f32.mrf.mxu2 }
 0x288   : > { %3275 = vmatmul.bf16.gmra.mxu2 %v9533_v48  ;;  %9537 = vst [vmem:[#allocation102_spill] sm:$0xff] %v7985_v0  ;;  %v5726_v48 = vld [vmem:[#allocation9 + $0x198] sm:$0xff]  ;;  %v9545_v0 = vld [vmem:[#allocation62_spill] sm:$0xff] }
 0x289   : > { %9532 = vst [vmem:[#allocation98_spill] sm:$0xff] %v7970_v40  ;;  %v9538_v40 = vld [vmem:[#allocation53_spill] sm:$0xff]  ;;  %4096 = vmatpush.bf16.msra.mxu3 %v5726_v48  ;;  %v1067_v17 = vand.u32 15, %v845_v13  ;;  %v8006_v13 = vpop.f32.mrf.mxu0  ;;  %v5742_v48 = vld [vmem:[#allocation9 + $0x218] sm:$0xff] }
 0x28a   : > { %v9539_v11 = vpack.c.b16 %v9538_v40, %v9487_v36  ;;  %v1583_v36 = vsel %vm9546_vm14, %v9545_v0, %v9544_v51  ;;  %v6159_v40 = vld [vmem:[#allocation2 + $0x50] sm:$0xff]  ;;  %4274 = vmatpush.bf16.msra.mxu1 %v5742_v48 }
 0x28b   : > { %vm8002_vm3 = vcmp.le.s32.totalorder %v1067_v17, 14 }
 0x28c   : > { %v7977_v50 = vpop.f32.mrf.mxu1 }
 0x28e   : > { %v2778_v59 = vpop.f32.mrf.mxu3 }
 0x28f   : > { %v7980_v1 = vadd.f32 %v2778_v59, %v7896_v23  ;;  %v5714_v23 = vld [vmem:[#allocation2 + $0x48] sm:$0xff]  ;;  %v9541_v59 = vld [vmem:[#allocation49_spill] sm:$0xff] }
 0x290   : > { %9549 = vst [vmem:[#allocation49_spill] sm:$0xff] %v8006_v13 }
 0x291   : > { %9535 = vst [vmem:[#allocation100_spill] sm:$0xff] %v7980_v1  ;;  %v9542_v1 = vld [vmem:[#allocation47_spill] sm:$0xff] }
 0x292   : > { %v9543_v14 = vpack.c.b16 %v9541_v59, %v9542_v1 }
 0x293   : > { %2829 = vmatmul.bf16.gmra.mxu3 %v9539_v11 }
 0x294   : > { %v7990_v5 = vpop.f32.mrf.mxu1 }
 0x296   : > { %v2781_v16 = vpop.f32.mrf.mxu3 }
 0x297   : > { %v7993_v55 = vadd.f32 %v2781_v16, %v7905_v29  ;;  %3171 = vmatmul.bf16.gmra.mxu1 %v6159_v40  ;;  %4224 = vmatmul.bf16.gmra.mxu0 %v5714_v23  ;;  %v1679_v29 = vsel %vm8002_vm3, %v1583_v36, 0.0  ;;  %v8010_v16 = vpop.f32.mrf.mxu2  ;;  %v9552_v23 = vld [vmem:[#allocation60_spill] sm:$0xff] }
 0x298   : > { %3280 = vmatmul.bf16.gmra.mxu2 %v9543_v14  ;;  %9550 = vst [vmem:[#allocation47_spill] sm:$0xff] %v8010_v16  ;;  %v1743_v51 = vpack.c.bf16 %v1679_v29, %v1679_v29  ;;  %v9553_v40 = vpack.c.b16 %v9552_v23, %v9496_v33 }
 0x299   : > { %9540 = vst [vmem:[#allocation53_spill] sm:$0xff] %v7993_v55  ;;  %v8020_v55 = vpop.f32.mrf.mxu0 }
 0x29a   : > { %v1999_v17 = vunpack.c.l.b16 %v1743_v51 }
 0x29c   : > { %v8012_v59 = vpop.f32.mrf.mxu1  ;;  %v2015_v16 = vpack.c.b16 %v1999_v17, %v9554_v63  ;;  %v9560_v17 = vld [vmem:[#allocation69_spill] sm:$0xff] }
 0x29e   : > { %v2783_v14 = vpop.f32.mrf.mxu3 }
 0x29f   : > { %v8015_v0 = vadd.f32 %v2783_v14, %v7912_v53  ;;  %v8028_v29 = vpop.f32.mrf.mxu2  ;;  %v9557_v53 = vld [vmem:[#allocation67_spill] sm:$0xff]  ;;  %v5754_v14 = vld [vmem:[#allocation11 + $0x38] sm:$0xff] }
 0x2a0   : > { %9556 = vst [vmem:[#allocation60_spill] sm:$0xff] %v8028_v29  ;;  %4571 = vmatpush.bf16.msra.mxu2 %v5754_v14 }
 0x2a1   : > { %9551 = vst [vmem:[#allocation64_spill] sm:$0xff] %v8015_v0  ;;  %v8033_v23 = vpop.f32.mrf.mxu0 }
 0x2a2   : > { %9558 = vst [vmem:[#allocation70_spill] sm:$0xff] %v8033_v23  ;;  %v9563_v23 = vld [vmem:[#allocation77_spill] sm:$0xff] }
 0x2a3   : > { %2834 = vmatmul.bf16.gmra.mxu3 %v9553_v40 }
 0x2a4   : > { %v8022_v36 = vpop.f32.mrf.mxu1 }
 0x2a6   : > { %v2786_v13 = vpop.f32.mrf.mxu3 }
 0x2a7   : > { %v8026_v48 = vadd.f32 %v2786_v13, %v7923_v45  ;;  %3176 = vmatmul.bf16.gmra.mxu1 %v9557_v53  ;;  %4229 = vmatmul.bf16.gmra.mxu0 %v5715_v56  ;;  %v9561_v45 = vpack.c.b16 %v9560_v17, %v9503_v19  ;;  %v5725_v13 = vld [vmem:[#allocation9 + $0x190] sm:$0xff]  ;;  %v5716_v53 = vld [vmem:[#allocation2 + $0x58] sm:$0xff] }
 0x2a8   : > { %3285 = vmatmul.bf16.gmra.mxu2 %v2015_v16  ;;  %4097 = vmatpush.bf16.msra.mxu3 %v5725_v13  ;;  %v5741_v19 = vld [vmem:[#allocation9 + $0x210] sm:$0xff]  ;;  %v9564_v13 = vld [vmem:[#allocation82_spill] sm:$0xff] }
 0x2a9   : > { %9555 = vst [vmem:[#allocation62_spill] sm:$0xff] %v8026_v48  ;;  %v8044_v14 = vpop.f32.mrf.mxu0  ;;  %v9562_v48 = vld [vmem:[#allocation76_spill] sm:$0xff]  ;;  %4275 = vmatpush.bf16.msra.mxu1 %v5741_v19 }
 0x2ac   : > { %v8031_v51 = vpop.f32.mrf.mxu1 }
 0x2ae   : > { %v2788_v33 = vpop.f32.mrf.mxu3 }
 0x2af   : > { %v8036_v40 = vadd.f32 %v2788_v33, %v7934_v44 }
 0x2b1   : > { %9559 = vst [vmem:[#allocation67_spill] sm:$0xff] %v8036_v40 }
 0x2b3   : > { %2839 = vmatmul.bf16.gmra.mxu3 %v9561_v45 }
 0x2b4   : > { %v8041_v29 = vpop.f32.mrf.mxu1 }
 0x2b6   : > { %v2800_v16 = vpop.f32.mrf.mxu3 }
 0x2b7   : > { %v2801_v56 = vadd.f32 %v2800_v16, %v7640_v52  ;;  %3181 = vmatmul.bf16.gmra.mxu1 %v9563_v23  ;;  %4234 = vmatmul.bf16.gmra.mxu0 %v5716_v53  ;;  %v8055_v16 = vpop.f32.mrf.mxu0  ;;  %v5717_v53 = vld [vmem:[#allocation2 + $0x60] sm:$0xff] }
 0x2b9   : > { %v3034_v0 = vadd.f32 %v9562_v48, %v2801_v56  ;;  %v9565_v48 = vld [vmem:[#allocation81_spill] sm:$0xff] }
 0x2ba   : > { %v9566_v23 = vpack.c.b16 %v9565_v48, %v9511_v39 }
 0x2bb   : > { %v8049_v44 = vadd.f32 %v7945_v61, %v3034_v0 }
 0x2bc   : > { %v8051_v17 = vpop.f32.mrf.mxu1 }
 0x2be   : > { %v2802_v33 = vpop.f32.mrf.mxu3 }
 0x2bf   : > { %v2803_v45 = vadd.f32 %v2802_v33, %v7683_v20  ;;  %v8071_v33 = vpop.f32.mrf.mxu0 }
 0x2c1   : > { %v3036_v52 = vadd.f32 %v9564_v13, %v2803_v45 }
 0x2c3   : > { %v8058_v40 = vadd.f32 %v7955_v47, %v3036_v52  ;;  %2844 = vmatmul.bf16.gmra.mxu3 %v9566_v23  ;;  %v5753_v47 = vld [vmem:[#allocation11 + $0x30] sm:$0xff] }
 0x2c4   : > { %v8063_v0 = vpop.f32.mrf.mxu1  ;;  %4572 = vmatpush.bf16.msra.mxu2 %v5753_v47 }
 0x2c6   : > { %v2805_v61 = vpop.f32.mrf.mxu3 }
 0x2c7   : > { %v2806_v56 = vadd.f32 %v2805_v61, %v7699_v10  ;;  %3186 = vmatmul.bf16.gmra.mxu1 %v7803_v31  ;;  %4239 = vmatmul.bf16.gmra.mxu0 %v5717_v53  ;;  %v5740_v31 = vld [vmem:[#allocation9 + $0x208] sm:$0xff]  ;;  %v8085_v61 = vpop.f32.mrf.mxu0 }
 0x2c8   : > { %4276 = vmatpush.bf16.msra.mxu1 %v5740_v31 }
 0x2c9   : > { %v3039_v19 = vadd.f32 %v7627_v7, %v2806_v56  ;;  %v9567_v7 = vpack.c.b16 %v7662_v35, %v7621_v12  ;;  %v5718_v56 = vld [vmem:[#allocation2 + $0x68] sm:$0xff]  ;;  %v5739_v35 = vld [vmem:[#allocation9 + $0x200] sm:$0xff] }
 0x2cb   : > { %v8069_v20 = vadd.f32 %v7965_v26, %v3039_v19  ;;  %v5724_v26 = vld [vmem:[#allocation9 + $0x188] sm:$0xff] }
 0x2cc   : > { %v8073_v45 = vpop.f32.mrf.mxu1  ;;  %4098 = vmatpush.bf16.msra.mxu3 %v5724_v26  ;;  %4277 = vmatpush.bf16.msra.mxu1 %v5739_v35  ;;  %v8095_v19 = vld [vmem:[#allocation2 + $0x18] sm:$0xff]  }
 0x2cd   : > { %v5723_v35 = vld [vmem:[#allocation9 + $0x180] sm:$0xff] }
 0x2ce   : > { %v2807_v39 = vpop.f32.mrf.mxu3 }
 0x2cf   : > { %v2808_v13 = vadd.f32 %v2807_v39, %v7725_v21  ;;  %v8098_v39 = vld [vmem:[#allocation2 + $0x10] sm:$0xff]  }
 0x2d0   : > { %v9230_v26 = vunpack.c.l.bf16 %v8098_v39  ;;  %4099 = vmatpush.bf16.msra.mxu3 %v5723_v35 }
 0x2d1   : > { %v3041_v10 = vadd.f32 %v7678_v41, %v2808_v13  ;;  %v9568_v13 = vpack.c.b16 %v7664_v43, %v7625_v34 }
 0x2d2   : > { %v8125_v43 = vrot.slane %v9230_v26, 1 }
 0x2d3   : > { %v8078_v52 = vadd.f32 %v7977_v50, %v3041_v10  ;;  %2849 = vmatmul.bf16.gmra.mxu3 %v9567_v7  ;;  %v9229_v10 = vunpack.c.h.bf16 %v8098_v39 }
 0x2d4   : > { %v8083_v23 = vpop.f32.mrf.mxu1 }
 0x2d6   : > { %v2810_v48 = vpop.f32.mrf.mxu3 }
 0x2d7   : > { %v2811_v21 = vadd.f32 %v2810_v48, %v7746_v49  ;;  %3191 = vmatmul.bf16.gmra.mxu1 %v7820_v57  ;;  %4244 = vmatmul.bf16.gmra.mxu0 %v5718_v56  ;;  %v8100_v49 = vpop.f32.mrf.mxu0  ;;  %v9223_v57 = vunpack.c.l.bf16 %v8095_v19  ;;  %v5719_v48 = vld [vmem:[#allocation2 + $0x70] sm:$0xff] }
 0x2d9   : > { %v3044_v41 = vadd.f32 %v7693_v28, %v2811_v21 }
 0x2db   : > { %v8091_v12 = vadd.f32 %v7990_v5, %v3044_v41  ;;  %v5752_v41 = vld [vmem:[#allocation11 + $0x28] sm:$0xff] }
 0x2dc   : > { %v8093_v53 = vpop.f32.mrf.mxu1  ;;  %4573 = vmatpush.bf16.msra.mxu2 %v5752_v41 }
 0x2de   : > { %v2812_v50 = vpop.f32.mrf.mxu3 }
 0x2df   : > { %v2813_v47 = vadd.f32 %v2812_v50, %v7781_v30  ;;  %v3453_v30 = vrot.slane %v9223_v57, 1  ;;  %v8127_v56 = vpop.f32.mrf.mxu0 }
 0x2e1   : > { %v3046_v28 = vadd.f32 %v7720_v46, %v2813_v47 }
 0x2e3   : > { %v8105_v5 = vadd.f32 %v8012_v59, %v3046_v28  ;;  %2854 = vmatmul.bf16.gmra.mxu3 %v9568_v13  ;;  %v3452_v59 = vrot.slane %v9229_v10, 1  ;;  %v8139_v28 = vld [vmem:[#allocation2 + $0x20] sm:$0xff]  }
 0x2e4   : > { %v8113_v31 = vpop.f32.mrf.mxu1 }
 0x2e5   : > { %v3512_v34 = vsel %vm9569_vm13, %v3452_v59, %v3453_v30  ;;  %v3513_v47 = vsel %vm9571_vm8, %v8125_v43, %v3452_v59  ;;  %v9227_v59 = vunpack.c.h.bf16 %v8095_v19 }
 0x2e6   : > { %v2815_v7 = vpop.f32.mrf.mxu3  ;;  %v3516_v50 = vsel %vm6691_vm2, %v3512_v34, 0.0  ;;  %v9572_v34 = vpack.c.b16 %v7680_v62, %v7631_v4  ;;  %vm9573_vm2 = vmmov %vm9571_vm8 }
 0x2e7   : > { %v2816_v46 = vadd.f32 %v2815_v7, %v7789_v58  ;;  %3196 = vmatmul.bf16.gmra.mxu1 %v7839_v32  ;;  %4249 = vmatmul.bf16.gmra.mxu0 %v5719_v48  ;;  %v3580_v7 = vpack.c.bf16 %v3516_v50, %v3516_v50  ;;  %v9224_v48 = vunpack.c.l.bf16 %v8139_v28  ;;  %v8151_v57 = vpop.f32.mrf.mxu0  ;;  %v3454_v4 = vrot.slane %v9227_v59, 1  ;;  %vm9575_vm14 = vmmov %vm9573_vm2 }
 0x2e9   : > { %v3049_v21 = vadd.f32 %v7741_v9, %v2816_v46  ;;  %v3579_v46 = vpack.c.bf16 %v3513_v47, %v3513_v47  ;;  %v3836_v41 = vunpack.c.l.b16 %v3580_v7  ;;  %v5720_v47 = vld [vmem:[#allocation2 + $0x78] sm:$0xff] }
 0x2eb   : > { %v8130_v58 = vadd.f32 %v8022_v36, %v3049_v21 }
 0x2ec   : > { %v8134_v32 = vpop.f32.mrf.mxu1 }
 0x2ee   : > { %v2817_v9 = vpop.f32.mrf.mxu3 }
 0x2ef   : > { %v2818_v13 = vadd.f32 %v2817_v9, %v7799_v22  ;;  %v3835_v22 = vunpack.c.l.b16 %v3579_v46 }
 0x2f1   : > { %v3051_v36 = vadd.f32 %v7776_v54, %v2818_v13  ;;  %v3455_v54 = vrot.slane %v9224_v48, 1  ;;  %v3867_v13 = vpack.c.b16 %v3836_v41, %v3835_v22  ;;  %v3511_v41 = vsel %vm9575_vm14, %v3453_v30, %v3454_v4  ;;  %v8172_v22 = vld [vmem:[#allocation2 + $0x28] sm:$0xff]  }
 0x2f3   : > { %v8145_v21 = vadd.f32 %v8031_v51, %v3051_v36  ;;  %2859 = vmatmul.bf16.gmra.mxu3 %v9572_v34  ;;  %v3510_v7 = vsel %vm9573_vm2, %v3454_v4, %v3455_v54  ;;  %v9226_v4 = vunpack.c.h.bf16 %v8139_v28 }
 0x2f4   : > { %v8155_v9 = vpop.f32.mrf.mxu1  ;;  %v3518_v34 = vsel %vm6676_vm1, %v3510_v7, 0.0  ;;  %v9577_v7 = vld [vmem:[#allocation61_spill] sm:$0xff]  ;;  %vm9579_vm1 = vmmov %vm9573_vm2 }
 0x2f5   : > { %v9578_v46 = vpack.c.b16 %v9577_v7, %v9542_v1  ;;  %v5751_v7 = vld [vmem:[#allocation11 + $0x20] sm:$0xff]  ;;  %vm9582_vm13 = vmmov %vm9579_vm1 }
 0x2f6   : > { %v2820_v50 = vpop.f32.mrf.mxu3  ;;  %4574 = vmatpush.bf16.msra.mxu2 %v5751_v7  ;;  %vm9591_vm8 = vmmov %vm9579_vm1 }
 0x2f7   : > { %v2821_v51 = vadd.f32 %v2820_v50, %v7807_v27  ;;  %4254 = vmatmul.bf16.gmra.mxu0 %v5720_v47  ;;  %4278 = vmatmul.bf16.vlgmr.msra.gmra.mxu1 %v3867_v13  ;;  %v9225_v13 = vunpack.c.l.bf16 %v8172_v22  ;;  %vm9594_vm2 = vmmov %vm9579_vm1 }
 0x2f8   : > { %vm9597_vm14 = vmmov %vm9579_vm1 }
 0x2f9   : > { %v3054_v62 = vadd.f32 %v7791_v60, %v2821_v51  ;;  %v8174_v60 = vpop.f32.mrf.mxu0  ;;  %v3582_v51 = vpack.c.bf16 %v3518_v34, %v3518_v34 }
 0x2fb   : > { %v8164_v36 = vadd.f32 %v8041_v29, %v3054_v62  ;;  %v3581_v29 = vpack.c.bf16 %v3511_v41, %v3511_v41  ;;  %v3838_v30 = vunpack.c.l.b16 %v3582_v51  ;;  %v5721_v41 = vld [vmem:[#allocation2 + $0x80] sm:$0xff] }
 0x2fc   : > { %v8168_v27 = vpop.f32.mrf.mxu1 }
 0x2fd   : > { %v3837_v48 = vunpack.c.l.b16 %v3581_v29 }
 0x2fe   : > { %v2822_v35 = vpop.f32.mrf.mxu3 }
 0x2ff   : > { %v2823_v50 = vadd.f32 %v2822_v35, %v7818_v37  ;;  %v3457_v37 = vrot.slane %v9225_v13, 1 }
 0x301   : > { %v3056_v47 = vadd.f32 %v7801_v18, %v2823_v50  ;;  %v3868_v50 = vpack.c.b16 %v3838_v30, %v3837_v48 }
 0x303   : > { %v8180_v62 = vadd.f32 %v8051_v17, %v3056_v47  ;;  %2864 = vmatmul.bf16.gmra.mxu3 %v9578_v46  ;;  %v3456_v17 = vrot.slane %v9226_v4, 1  ;;  %v8193_v47 = vpop.f32.mrf.mxu0  ;;  %v9586_v46 = vld [vmem:[#allocation71_spill] sm:$0xff] }
 0x304   : > { %v8188_v35 = vpop.f32.mrf.mxu1  ;;  %v9587_v59 = vpack.c.b16 %v9586_v46, %v9554_v63  ;;  %v9593_v46 = vld [vmem:[#allocation32_spill] sm:$0xff] }
 0x305   : > { %9576 = vst [vmem:[#allocation69_spill] sm:$0xff] %v8180_v62  ;;  %v3508_v51 = vsel %vm9579_vm1, %v3456_v17, %v3457_v37 }
 0x306   : > { %v2825_v34 = vpop.f32.mrf.mxu3 }
 0x307   : > { %v2826_v18 = vadd.f32 %v2825_v34, %v7826_v3  ;;  %4259 = vmatmul.bf16.gmra.mxu0 %v5721_v41  ;;  %4283 = vmatmul.bf16.gmra.mxu1 %v3868_v50  ;;  %v3520_v3 = vsel %vm6780_vm6, %v3508_v51, 0.0  ;;  %v3509_v34 = vsel %vm9582_vm13, %v3455_v54, %v3456_v17  ;;  %v9583_v50 = vld [vmem:[#allocation25_spill] sm:$0xff]  ;;  %vm9589_vm6 = vmmov %vm9579_vm1 }
 0x308   : > { %v3584_v41 = vpack.c.bf16 %v3520_v3, %v3520_v3  ;;  %v9584_v13 = vunpack.c.l.bf16 %v9583_v50  ;;  %v3583_v4 = vpack.c.bf16 %v3509_v34, %v3509_v34  ;;  %v9588_v17 = vld [vmem:[#allocation17_spill] sm:$0xff]  ;;  %v9231_v3 = vunpack.c.h.bf16 %v8172_v22  ;;  %vm9609_vm13 = vmmov %vm9594_vm2 }
 0x309   : > { %v3059_v1 = vadd.f32 %v7815_v38, %v2826_v18  ;;  %v8207_v38 = vld [vmem:[#allocation2 + $0x30] sm:$0xff]  }
 0x30a   : > { %v9228_v51 = vunpack.c.l.bf16 %v8207_v38  ;;  %v3840_v54 = vunpack.c.l.b16 %v3584_v41 }
 0x30b   : > { %v8199_v29 = vadd.f32 %v8063_v0, %v3059_v1  ;;  %v2122_v0 = vrot.slane %v9584_v13, 1  ;;  %v3839_v13 = vunpack.c.l.b16 %v3583_v4  ;;  %v8236_v4 = vld [vmem:[#allocation2 + $0x8c] sm:$0xf] }
 0x30c   : > { %v8203_v30 = vpop.f32.mrf.mxu1 }
 0x30d   : > { %9580 = vst [vmem:[#allocation76_spill] sm:$0xff] %v8199_v29  ;;  %v3869_v50 = vpack.c.b16 %v3840_v54, %v3839_v13 }
 0x30e   : > { %v2827_v48 = vpop.f32.mrf.mxu3 }
 0x30f   : > { %v2828_v18 = vadd.f32 %v2827_v48, %v7837_v8  ;;  %v2125_v8 = vsel %vm9589_vm6, %v2122_v0, %v9588_v17 }
 0x310   : > { %v2157_v63 = vsel %vm8002_vm3, %v2125_v8, 0.0  ;;  %v9232_v8 = vunpack.c.l.bf16 %v8236_v4 }
 0x311   : > { %v3061_v1 = vadd.f32 %v7823_v24, %v2828_v18  ;;  %v3459_v24 = vrot.slane %v9228_v51, 1  ;;  %v2221_v10 = vpack.c.bf16 %v2157_v63, %v2157_v63  ;;  %v8251_v63 = vld [vmem:[#allocation2 + $0x38] sm:$0xff]  }
 0x313   : > { %v8215_v7 = vadd.f32 %v8073_v45, %v3061_v1  ;;  %2869 = vmatmul.bf16.gmra.mxu3 %v9587_v59  ;;  %v9590_v45 = vld [vmem:[#allocation66_spill] sm:$0xff]  ;;  %v9592_v59 = vld [vmem:[#allocation40_spill] sm:$0xff]  ;;  %v3458_v1 = vrot.slane %v9231_v3, 1 }
 0x314   : > { %v8226_v34 = vpop.f32.mrf.mxu1  ;;  %v2123_v18 = vsel %vm9591_vm8, %v9590_v45, %v2122_v0  ;;  %v2387_v45 = vunpack.c.l.b16 %v2221_v10  ;;  %vm9623_vm8 = vmmov %vm9594_vm2 }
 0x315   : > { %9585 = vst [vmem:[#allocation77_spill] sm:$0xff] %v8215_v7  ;;  %v2220_v51 = vpack.c.bf16 %v2123_v18, %v2123_v18  ;;  %v3506_v26 = vsel %vm9594_vm2, %v3458_v1, %v3459_v24  ;;  %v3507_v18 = vsel %vm9597_vm14, %v3457_v37, %v3458_v1  ;;  %v9233_v7 = vunpack.c.l.bf16 %v8251_v63 }
 0x316   : > { %v2830_v48 = vpop.f32.mrf.mxu3  ;;  %v3522_v54 = vsel %vm6883_vm9, %v3506_v26, 0.0  ;;  %v9601_v26 = vld [vmem:[#allocation39_spill] sm:$0xff]  ;;  %v9602_v37 = vunpack.c.h.bf16 %v8098_v39  ;;  %vm9604_vm9 = vcmp.lt.s32.totalorder %v6644_v25, 1 }
 0x317   : > { %v2831_v41 = vadd.f32 %v2830_v48, %v9592_v59  ;;  %4288 = vmatmul.bf16.gmra.mxu1 %v3869_v50  ;;  %v2386_v13 = vunpack.c.l.b16 %v2220_v51  ;;  %v8258_v48 = vrot.slane %v9232_v8, 7  ;;  %vm9605_vm1 = vmmov %vm9604_vm9 }
 0x318   : > { %v3356_v1 = vrot.slane %v9602_v37, 7  ;;  %v9608_v37 = vld [vmem:[#allocation44_spill] sm:$0xff]  ;;  %vm9619_vm6 = vmmov %vm9605_vm1 }
 0x319   : > { %v3064_v17 = vadd.f32 %v9593_v46, %v2831_v41  ;;  %v9598_v41 = vld [vmem:[#allocation30_spill] sm:$0xff]  ;;  %v3586_v46 = vpack.c.bf16 %v3522_v54, %v3522_v54  ;;  %9600 = vst [vmem:[#allocation81_spill] sm:$0xff] %v8258_v48  ;;  %v2403_v51 = vpack.c.b16 %v2387_v45, %v2386_v13  ;;  %v3461_v13 = vrot.slane %v9233_v7, 1  ;;  %vm9632_vm14 = vmmov %vm9605_vm1 }
 0x31b   : > { %v8242_v0 = vadd.f32 %v8083_v23, %v3064_v17  ;;  %v9599_v23 = vunpack.c.l.bf16 %v8098_v39  ;;  %v3842_v54 = vunpack.c.l.b16 %v3586_v46  ;;  %v9607_v46 = vld [vmem:[#allocation43_spill] sm:$0xff] }
 0x31c   : > { %v8247_v3 = vpop.f32.mrf.mxu1 }
 0x31d   : > { %9595 = vst [vmem:[#allocation82_spill] sm:$0xff] %v8242_v0  ;;  %v3355_v17 = vrot.slane %v9599_v23, 7  ;;  %v3585_v0 = vpack.c.bf16 %v3507_v18, %v3507_v18 }
 0x31e   : > { %v2832_v59 = vpop.f32.mrf.mxu3 }
 0x31f   : > { %v2833_v50 = vadd.f32 %v2832_v59, %v9598_v41  ;;  %v3418_v59 = vsel %vm9604_vm9, %v8258_v48, %v3355_v17  ;;  %v9235_v41 = vunpack.c.h.bf16 %v8207_v38  ;;  %v3841_v23 = vunpack.c.l.b16 %v3585_v0  ;;  %vm9633_vm9 = vmmov %vm9605_vm1 }
 0x320   : > { %v3417_v39 = vsel %vm9605_vm1, %v3355_v17, %v3356_v1  ;;  %v5750_v17 = vld [vmem:[#allocation11 + $0x18] sm:$0xff] }
 0x321   : > { %v3066_v10 = vadd.f32 %v9601_v26, %v2833_v50  ;;  %v3419_v50 = vsel %vm6758_vm5, %v3418_v59, 0.0  ;;  %v3548_v7 = vpack.c.bf16 %v3417_v39, %v3417_v39  ;;  %4575 = vmatpush.bf16.msra.mxu2 %v5750_v17  ;;  %vm9612_vm5 = vmmov %vm9594_vm2  ;;  %v8294_v39 = vld [vmem:[#allocation2 + $0x40] sm:$0xff]   ;;  %v9616_v17 = vunpack.c.h.bf16 %v8095_v19 }
 0x322   : > { %v3547_v8 = vpack.c.bf16 %v3419_v50, %v3419_v50 }
 0x323   : > { %v8265_v29 = vadd.f32 %v8093_v53, %v3066_v10  ;;  %2874 = vmatmul.bf16.gmra.mxu3 %v2403_v51  ;;  %v3870_v10 = vpack.c.b16 %v3842_v54, %v3841_v23  ;;  %v3460_v51 = vrot.slane %v9235_v41, 1  ;;  %v3644_v54 = vunpack.c.l.b16 %v3548_v7  ;;  %v9615_v41 = vld [vmem:[#allocation35_spill] sm:$0xff] }
 0x324   : > { %v8273_v18 = vpop.f32.mrf.mxu1  ;;  %v9236_v7 = vunpack.c.l.bf16 %v8294_v39 }
 0x325   : > { %9603 = vst [vmem:[#allocation19_spill] sm:$0xff] %v8265_v29  ;;  %v3504_v29 = vsel %vm9609_vm13, %v3460_v51, %v3461_v13  ;;  %v3505_v50 = vsel %vm9612_vm5, %v3459_v24, %v3460_v51 }
 0x326   : > { %v2835_v45 = vpop.f32.mrf.mxu3  ;;  %v3524_v59 = vsel %vm6938_vm10, %v3504_v29, 0.0  ;;  %vm9618_vm10 = vmmov %vm9605_vm1 }
 0x327   : > { %v2836_v26 = vadd.f32 %v2835_v45, %v9607_v46  ;;  %4293 = vmatmul.bf16.gmra.mxu1 %v3870_v10  ;;  %v3643_v45 = vunpack.c.l.b16 %v3547_v8  ;;  %v3587_v8 = vpack.c.bf16 %v3505_v50, %v3505_v50 }
 0x329   : > { %v3069_v0 = vadd.f32 %v9608_v37, %v2836_v26  ;;  %v9613_v26 = vld [vmem:[#allocation52_spill] sm:$0xff]  ;;  %v3588_v37 = vpack.c.bf16 %v3524_v59, %v3524_v59  ;;  %v3675_v29 = vpack.c.b16 %v3644_v54, %v3643_v45  ;;  %v9237_v59 = vunpack.c.h.bf16 %v8251_v63 }
 0x32b   : > { %v8286_v48 = vadd.f32 %v8113_v31, %v3069_v0  ;;  %v9614_v31 = vunpack.c.l.bf16 %v8095_v19  ;;  %v3844_v24 = vunpack.c.l.b16 %v3588_v37 }
 0x32c   : > { %v8290_v46 = vpop.f32.mrf.mxu1 }
 0x32d   : > { %9610 = vst [vmem:[#allocation18_spill] sm:$0xff] %v8286_v48  ;;  %v3357_v0 = vrot.slane %v9614_v31, 7  ;;  %v3358_v48 = vrot.slane %v9616_v17, 7  ;;  %v9622_v31 = vld [vmem:[#allocation51_spill] sm:$0xff] }
 0x32e   : > { %v2837_v23 = vpop.f32.mrf.mxu3 }
 0x32f   : > { %v2838_v10 = vadd.f32 %v2837_v23, %v9613_v26  ;;  %v3416_v51 = vsel %vm9618_vm10, %v3356_v1, %v3357_v0  ;;  %v3843_v23 = vunpack.c.l.b16 %v3587_v8  ;;  %v3415_v19 = vsel %vm9619_vm6, %v3357_v0, %v3358_v48  ;;  %v9621_v26 = vld [vmem:[#allocation20_spill] sm:$0xff]  ;;  %v9625_v0 = vld [vmem:[#allocation37_spill] sm:$0xff] }
 0x330   : > { %v3462_v1 = vrot.slane %v9237_v59, 1  ;;  %v3550_v8 = vpack.c.bf16 %v3415_v19, %v3415_v19  ;;  %vm9626_vm2 = vnez %v9625_v0  ;;  %v9628_v19 = vld [vmem:[#allocation57_spill] sm:$0xff] }
 0x331   : > { %v3071_v53 = vadd.f32 %v9615_v41, %v2838_v10  ;;  %v3463_v41 = vrot.slane %v9236_v7, 1  ;;  %v3871_v37 = vpack.c.b16 %v3844_v24, %v3843_v23 }
 0x333   : > { %v8304_v62 = vadd.f32 %v8134_v32, %v3071_v53  ;;  %4100 = vmatmul.bf16.vlgmr.msra.gmra.mxu3 %v3675_v29  ;;  %v3421_v32 = vsel %vm6742_vm4, %v3416_v51, 0.0  ;;  %v3502_v17 = vsel %vm9623_vm8, %v3462_v1, %v3463_v41  ;;  %vm9627_vm4 = vmmov %vm9612_vm5 }
 0x334   : > { %v8311_v54 = vpop.f32.mrf.mxu1  ;;  %v3549_v29 = vpack.c.bf16 %v3421_v32, %v3421_v32  ;;  %v3526_v51 = vsel %vm9626_vm2, %v3502_v17, 0.0  ;;  %vm9638_vm13 = vmmov %vm9627_vm4 }
 0x335   : > { %9617 = vst [vmem:[#allocation61_spill] sm:$0xff] %v8304_v62  ;;  %vm9642_vm10 = vmmov %vm9627_vm4 }
 0x336   : > { %v2840_v45 = vpop.f32.mrf.mxu3  ;;  %v3645_v50 = vunpack.c.l.b16 %v3549_v29  ;;  %vm9647_vm8 = vmmov %vm9619_vm6 }
 0x337   : > { %v2841_v10 = vadd.f32 %v2840_v45, %v9621_v26  ;;  %4298 = vmatmul.bf16.gmra.mxu1 %v3871_v37  ;;  %v3646_v45 = vunpack.c.l.b16 %v3550_v8  ;;  %v3503_v26 = vsel %vm9627_vm4, %v3461_v13, %v3462_v1  ;;  %v3590_v37 = vpack.c.bf16 %v3526_v51, %v3526_v51 }
 0x338   : > { %v3589_v17 = vpack.c.bf16 %v3503_v26, %v3503_v26  ;;  %v9631_v8 = vunpack.c.h.bf16 %v8139_v28  ;;  %v9239_v51 = vunpack.c.h.bf16 %v8294_v39 }
 0x339   : > { %v3074_v53 = vadd.f32 %v9622_v31, %v2841_v10  ;;  %v8332_v10 = vld [vmem:[#allocation2 + $0x48] sm:$0xff]   ;;  %v9629_v31 = vunpack.c.l.bf16 %v8139_v28  ;;  %v3676_v0 = vpack.c.b16 %v3646_v45, %v3645_v50  ;;  %v3846_v13 = vunpack.c.l.b16 %v3590_v37 }
 0x33a   : > { %v9238_v29 = vunpack.c.l.bf16 %v8332_v10 }
 0x33b   : > { %v8324_v7 = vadd.f32 %v8155_v9, %v3074_v53  ;;  %v3359_v9 = vrot.slane %v9629_v31, 7  ;;  %v9630_v53 = vld [vmem:[#allocation56_spill] sm:$0xff]  ;;  %v9637_v31 = vld [vmem:[#allocation65_spill] sm:$0xff] }
 0x33c   : > { %v8328_v23 = vpop.f32.mrf.mxu1  ;;  %v3465_v50 = vrot.slane %v9238_v29, 1 }
 0x33d   : > { %9624 = vst [vmem:[#allocation23_spill] sm:$0xff] %v8324_v7  ;;  %v3360_v7 = vrot.slane %v9631_v8, 7  ;;  %v3414_v1 = vsel %vm9632_vm14, %v3358_v48, %v3359_v9  ;;  %v3464_v48 = vrot.slane %v9239_v51, 1 }
 0x33e   : > { %v2842_v24 = vpop.f32.mrf.mxu3 }
 0x33f   : > { %v2843_v32 = vadd.f32 %v2842_v24, %v9628_v19  ;;  %v3845_v24 = vunpack.c.l.b16 %v3589_v17  ;;  %v3413_v28 = vsel %vm9633_vm9, %v3359_v9, %v3360_v7  ;;  %v9634_v19 = vld [vmem:[#allocation24_spill] sm:$0xff]  ;;  %v3500_v8 = vsel %vm9638_vm13, %v3464_v48, %v3465_v50  ;;  %v5749_v9 = vld [vmem:[#allocation11 + $0x10] sm:$0xff]  ;;  %vm9654_vm9 = vmmov %vm9627_vm4 }
 0x340   : > { %vm9635_vm1 = vnez %v9634_v19  ;;  %v3552_v17 = vpack.c.bf16 %v3413_v28, %v3413_v28  ;;  %v9640_v19 = vld [vmem:[#allocation42_spill] sm:$0xff]  ;;  %4576 = vmatpush.bf16.msra.mxu2 %v5749_v9  ;;  %v8370_v28 = vld [vmem:[#allocation2 + $0x50] sm:$0xff]   ;;  %v9645_v9 = vunpack.c.h.bf16 %v8172_v22 }
 0x341   : > { %v3076_v59 = vadd.f32 %v9630_v53, %v2843_v32  ;;  %v3872_v37 = vpack.c.b16 %v3846_v13, %v3845_v24  ;;  %vm9641_vm5 = vnez %v9640_v19 }
 0x342   : > { %v3648_v13 = vunpack.c.l.b16 %v3552_v17  ;;  %v9240_v17 = vunpack.c.l.bf16 %v8370_v28  ;;  %v3362_v51 = vrot.slane %v9645_v9, 7 }
 0x343   : > { %v8342_v62 = vadd.f32 %v8168_v27, %v3076_v59  ;;  %4105 = vmatmul.bf16.gmra.mxu3 %v3676_v0  ;;  %v3423_v27 = vsel %vm9635_vm1, %v3414_v1, 0.0  ;;  %v9636_v59 = vld [vmem:[#allocation33_spill] sm:$0xff]  ;;  %v3528_v1 = vsel %vm9641_vm5, %v3500_v8, 0.0  ;;  %vm9658_vm1 = vmmov %vm9619_vm6 }
 0x344   : > { %v8349_v26 = vpop.f32.mrf.mxu1  ;;  %v3551_v0 = vpack.c.bf16 %v3423_v27, %v3423_v27  ;;  %v3501_v27 = vsel %vm9642_vm10, %v3463_v41, %v3464_v48  ;;  %v9242_v48 = vunpack.c.h.bf16 %v8332_v10  ;;  %vm9659_vm13 = vmmov %vm9658_vm1 }
 0x345   : > { %vm9664_vm10 = vmmov %vm9627_vm4 }
 0x346   : > { %v2845_v45 = vpop.f32.mrf.mxu3 }
 0x347   : > { %v2846_v32 = vadd.f32 %v2845_v45, %v9636_v59  ;;  %4303 = vmatmul.bf16.gmra.mxu1 %v3872_v37  ;;  %v3647_v45 = vunpack.c.l.b16 %v3551_v0  ;;  %v3592_v37 = vpack.c.bf16 %v3528_v1, %v3528_v1  ;;  %v3591_v0 = vpack.c.bf16 %v3501_v27, %v3501_v27  ;;  %v9648_v27 = vld [vmem:[#allocation29_spill] sm:$0xff] }
 0x348   : > { %vm9649_vm2 = vnez %v9648_v27 }
 0x349   : > { %v3079_v53 = vadd.f32 %v9637_v31, %v2846_v32  ;;  %v3677_v8 = vpack.c.b16 %v3648_v13, %v3647_v45  ;;  %v3848_v41 = vunpack.c.l.b16 %v3592_v37  ;;  %v3847_v1 = vunpack.c.l.b16 %v3591_v0 }
 0x34a   : > { %v3467_v45 = vrot.slane %v9240_v17, 1 }
 0x34b   : > { %v8362_v29 = vadd.f32 %v8188_v35, %v3079_v53  ;;  %v9643_v35 = vunpack.c.l.bf16 %v8172_v22  ;;  %v9644_v53 = vld [vmem:[#allocation34_spill] sm:$0xff] }
 0x34c   : > { %v8366_v59 = vpop.f32.mrf.mxu1 }
 0x34d   : > { %9639 = vst [vmem:[#allocation25_spill] sm:$0xff] %v8362_v29  ;;  %v3361_v31 = vrot.slane %v9643_v35, 7  ;;  %v3873_v35 = vpack.c.b16 %v3848_v41, %v3847_v1 }
 0x34e   : > { %v2847_v24 = vpop.f32.mrf.mxu3 }
 0x34f   : > { %v2848_v32 = vadd.f32 %v2847_v24, %v7898_v15  ;;  %v3412_v15 = vsel %vm9619_vm6, %v3360_v7, %v3361_v31  ;;  %v3411_v22 = vsel %vm9647_vm8, %v3361_v31, %v3362_v51  ;;  %v3466_v7 = vrot.slane %v9242_v48, 1  ;;  %v9652_v31 = vld [vmem:[#allocation50_spill] sm:$0xff]  ;;  %vm9668_vm8 = vmmov %vm9627_vm4 }
 0x350   : > { %vm9653_vm14 = vnez %v9652_v31  ;;  %v9656_v31 = vunpack.c.h.bf16 %v8207_v38 }
 0x351   : > { %v3081_v19 = vadd.f32 %v9644_v53, %v2848_v32  ;;  %v9650_v32 = vld [vmem:[#allocation91_spill] sm:$0xff]  ;;  %v3498_v0 = vsel %vm9627_vm4, %v3466_v7, %v3467_v45  ;;  %vm9675_vm4 = vmmov %vm9658_vm1 }
 0x352   : > { %v3364_v17 = vrot.slane %v9656_v31, 7 }
 0x353   : > { %v8380_v29 = vadd.f32 %v8203_v30, %v3081_v19  ;;  %4110 = vmatmul.bf16.gmra.mxu3 %v3677_v8  ;;  %v3425_v30 = vsel %vm9649_vm2, %v3412_v15, 0.0  ;;  %v3554_v8 = vpack.c.bf16 %v3411_v22, %v3411_v22  ;;  %v3530_v15 = vsel %vm9653_vm14, %v3498_v0, 0.0  ;;  %vm9674_vm2 = vmmov %vm9658_vm1 }
 0x354   : > { %v8387_v24 = vpop.f32.mrf.mxu1  ;;  %v3553_v19 = vpack.c.bf16 %v3425_v30, %v3425_v30  ;;  %v3594_v30 = vpack.c.bf16 %v3530_v15, %v3530_v15  ;;  %v9243_v15 = vunpack.c.h.bf16 %v8370_v28 }
 0x355   : > { %9646 = vst [vmem:[#allocation71_spill] sm:$0xff] %v8380_v29 }
 0x356   : > { %v2850_v13 = vpop.f32.mrf.mxu3  ;;  %v3649_v27 = vunpack.c.l.b16 %v3553_v19 }
 0x357   : > { %v2851_v37 = vadd.f32 %v2850_v13, %v9650_v32  ;;  %4308 = vmatmul.bf16.gmra.mxu1 %v3873_v35  ;;  %v3650_v13 = vunpack.c.l.b16 %v3554_v8  ;;  %v8408_v32 = vld [vmem:[#allocation2 + $0x58] sm:$0xff]   ;;  %v8415_v8 = vpop.f32.mrf.mxu2 }
 0x358   : > { %v9241_v19 = vunpack.c.l.bf16 %v8408_v32 }
 0x359   : > { %v3084_v53 = vadd.f32 %v7914_v42, %v2851_v37  ;;  %v3499_v42 = vsel %vm9654_vm9, %v3465_v50, %v3466_v7  ;;  %v9655_v37 = vunpack.c.l.bf16 %v8207_v38  ;;  %vm9680_vm9 = vmmov %vm9668_vm8 }
 0x35a   : > { %v3593_v0 = vpack.c.bf16 %v3499_v42, %v3499_v42  ;;  %v9660_v42 = vld [vmem:[#allocation38_spill] sm:$0xff] }
 0x35b   : > { %v8400_v9 = vadd.f32 %v8226_v34, %v3084_v53  ;;  %v3363_v34 = vrot.slane %v9655_v37, 7  ;;  %v3678_v53 = vpack.c.b16 %v3650_v13, %v3649_v27  ;;  %v3469_v27 = vrot.slane %v9241_v19, 1 }
 0x35c   : > { %v8404_v1 = vpop.f32.mrf.mxu1  ;;  %vm9661_vm5 = vnez %v9660_v42 }
 0x35d   : > { %9651 = vst [vmem:[#allocation17_spill] sm:$0xff] %v8400_v9  ;;  %v3410_v7 = vsel %vm9658_vm1, %v3362_v51, %v3363_v34  ;;  %v3409_v38 = vsel %vm9659_vm13, %v3363_v34, %v3364_v17  ;;  %v3468_v51 = vrot.slane %v9243_v15, 1  ;;  %v5748_v34 = vld [vmem:[#allocation11 + $0x8] sm:$0xff]  ;;  %vm9684_vm13 = vmmov %vm9668_vm8  ;;  %v9687_v9 = vld [vmem:[#allocation101_spill] sm:$0xff] }
 0x35e   : > { %v2852_v41 = vpop.f32.mrf.mxu3  ;;  %v3556_v31 = vpack.c.bf16 %v3409_v38, %v3409_v38  ;;  %4577 = vmatpush.bf16.msra.mxu2 %v5748_v34  ;;  %v8448_v38 = vld [vmem:[#allocation2 + $0x60] sm:$0xff]   ;;  %v9672_v34 = vunpack.c.h.bf16 %v8251_v63 }
 0x35f   : > { %v2853_v22 = vadd.f32 %v2852_v41, %v7916_v2  ;;  %v3850_v2 = vunpack.c.l.b16 %v3594_v30  ;;  %v3496_v19 = vsel %vm9664_vm10, %v3468_v51, %v3469_v27  ;;  %v8442_v42 = vpop.f32.mrf.mxu2  ;;  %vm9691_vm10 = vmmov %vm9674_vm2 }
 0x361   : > { %v3086_v35 = vadd.f32 %v7930_v6, %v2853_v22  ;;  %v3849_v6 = vunpack.c.l.b16 %v3593_v0  ;;  %v9662_v22 = vld [vmem:[#allocation74_spill] sm:$0xff] }
 0x363   : > { %v8420_v50 = vadd.f32 %v8247_v3, %v3086_v35  ;;  %4115 = vmatmul.bf16.gmra.mxu3 %v3678_v53  ;;  %v3427_v3 = vsel %vm9661_vm5, %v3410_v7, 0.0  ;;  %v3874_v37 = vpack.c.b16 %v3850_v2, %v3849_v6  ;;  %v9663_v35 = vld [vmem:[#allocation93_spill] sm:$0xff]  ;;  %v9666_v7 = vld [vmem:[#allocation55_spill] sm:$0xff]  ;;  %vm9690_vm5 = vmmov %vm9674_vm2 }
 0x364   : > { %v8427_v41 = vpop.f32.mrf.mxu1  ;;  %v3555_v0 = vpack.c.bf16 %v3427_v3, %v3427_v3  ;;  %vm9667_vm6 = vnez %v9666_v7  ;;  %v3497_v3 = vsel %vm9668_vm8, %v3467_v45, %v3468_v51 }
 0x365   : > { %9657 = vst [vmem:[#allocation66_spill] sm:$0xff] %v8420_v50  ;;  %v3532_v2 = vsel %vm9667_vm6, %v3496_v19, 0.0  ;;  %v3366_v50 = vrot.slane %v9672_v34, 7 }
 0x366   : > { %v2855_v13 = vpop.f32.mrf.mxu3  ;;  %v3651_v6 = vunpack.c.l.b16 %v3555_v0  ;;  %v3595_v0 = vpack.c.bf16 %v3497_v3, %v3497_v3  ;;  %v9676_v3 = vld [vmem:[#allocation48_spill] sm:$0xff] }
 0x367   : > { %v2856_v30 = vadd.f32 %v2855_v13, %v9662_v22  ;;  %4313 = vmatmul.bf16.gmra.mxu1 %v3874_v37  ;;  %v3652_v13 = vunpack.c.l.b16 %v3556_v31  ;;  %v9244_v31 = vunpack.c.l.bf16 %v8448_v38  ;;  %vm9677_vm14 = vnez %v9676_v3 }
 0x369   : > { %v3089_v53 = vadd.f32 %v9663_v35, %v2856_v30  ;;  %v9669_v30 = vld [vmem:[#allocation92_spill] sm:$0xff]  ;;  %v3596_v35 = vpack.c.bf16 %v3532_v2, %v3532_v2  ;;  %v3679_v19 = vpack.c.b16 %v3652_v13, %v3651_v6  ;;  %v8467_v6 = vpop.f32.mrf.mxu2 }
 0x36b   : > { %v8440_v48 = vadd.f32 %v8273_v18, %v3089_v53  ;;  %v9670_v18 = vunpack.c.l.bf16 %v8251_v63  ;;  %v3852_v51 = vunpack.c.l.b16 %v3596_v35 }
 0x36c   : > { %v8453_v15 = vpop.f32.mrf.mxu1 }
 0x36d   : > { %9665 = vst [vmem:[#allocation40_spill] sm:$0xff] %v8440_v48  ;;  %v3365_v53 = vrot.slane %v9670_v18, 7  ;;  %v9671_v48 = vld [vmem:[#allocation95_spill] sm:$0xff] }
 0x36e   : > { %v2857_v22 = vpop.f32.mrf.mxu3 }
 0x36f   : > { %v2858_v37 = vadd.f32 %v2857_v22, %v9669_v30  ;;  %v3408_v2 = vsel %vm9674_vm2, %v3364_v17, %v3365_v53  ;;  %v9245_v22 = vunpack.c.h.bf16 %v8408_v32  ;;  %v3851_v30 = vunpack.c.l.b16 %v3595_v0  ;;  %vm9697_vm2 = vmmov %vm9668_vm8 }
 0x370   : > { %v3407_v63 = vsel %vm9675_vm4, %v3365_v53, %v3366_v50 }
 0x371   : > { %v3091_v7 = vadd.f32 %v9671_v48, %v2858_v37  ;;  %v3471_v48 = vrot.slane %v9244_v31, 1  ;;  %v9678_v37 = vld [vmem:[#allocation94_spill] sm:$0xff]  ;;  %v3875_v18 = vpack.c.b16 %v3852_v51, %v3851_v30  ;;  %v3470_v17 = vrot.slane %v9245_v22, 1  ;;  %v8491_v22 = vpop.f32.mrf.mxu2 }
 0x372   : > { %v3558_v34 = vpack.c.bf16 %v3407_v63, %v3407_v63 }
 0x373   : > { %v8460_v45 = vadd.f32 %v8290_v46, %v3091_v7  ;;  %4120 = vmatmul.bf16.gmra.mxu3 %v3679_v19  ;;  %v3429_v46 = vsel %vm9677_vm14, %v3408_v2, 0.0  ;;  %v9679_v7 = vld [vmem:[#allocation46_spill] sm:$0xff]  ;;  %v3494_v31 = vsel %vm9680_vm9, %v3470_v17, %v3471_v48  ;;  %v9682_v2 = vld [vmem:[#allocation63_spill] sm:$0xff]  ;;  %vm9712_vm9 = vmmov %vm9697_vm2 }
 0x374   : > { %v3557_v0 = vpack.c.bf16 %v3429_v46, %v3429_v46  ;;  %vm9683_vm1 = vnez %v9682_v2  ;;  %v3654_v30 = vunpack.c.l.b16 %v3558_v34 }
 0x375   : > { %9673 = vst [vmem:[#allocation32_spill] sm:$0xff] %v8460_v45  ;;  %v8479_v45 = vpop.f32.mrf.mxu1 }
 0x376   : > { %v2860_v13 = vpop.f32.mrf.mxu3  ;;  %v3653_v51 = vunpack.c.l.b16 %v3557_v0  ;;  %v9688_v0 = vunpack.c.h.bf16 %v8294_v39 }
 0x377   : > { %v2861_v35 = vadd.f32 %v2860_v13, %v9678_v37  ;;  %4318 = vmatmul.bf16.gmra.mxu1 %v3875_v18  ;;  %v3534_v13 = vsel %vm9683_vm1, %v3494_v31, 0.0  ;;  %v3495_v37 = vsel %vm9684_vm13, %v3469_v27, %v3470_v17  ;;  %v9686_v18 = vunpack.c.l.bf16 %v8294_v39  ;;  %vm9714_vm1 = vmmov %vm9697_vm2 }
 0x378   : > { %v3598_v63 = vpack.c.bf16 %v3534_v13, %v3534_v13  ;;  %v9246_v31 = vunpack.c.h.bf16 %v8448_v38  ;;  %v3368_v34 = vrot.slane %v9688_v0, 7  ;;  %v8502_v13 = vld [vmem:[#allocation2 + $0x68] sm:$0xff]  }
 0x379   : > { %v3094_v19 = vadd.f32 %v9679_v7, %v2861_v35  ;;  %v9685_v35 = vld [vmem:[#allocation97_spill] sm:$0xff]  ;;  %v3367_v7 = vrot.slane %v9686_v18, 7 }
 0x37a   : > { %v3854_v27 = vunpack.c.l.b16 %v3598_v63 }
 0x37b   : > { %v8482_v53 = vadd.f32 %v8311_v54, %v3094_v19  ;;  %v3680_v19 = vpack.c.b16 %v3654_v30, %v3653_v51  ;;  %v3406_v17 = vsel %vm9690_vm5, %v3366_v50, %v3367_v7  ;;  %v3472_v30 = vrot.slane %v9246_v31, 1 }
 0x37d   : > { %9681 = vst [vmem:[#allocation27_spill] sm:$0xff] %v8482_v53  ;;  %v3597_v53 = vpack.c.bf16 %v3495_v37, %v3495_v37  ;;  %v9692_v37 = vld [vmem:[#allocation54_spill] sm:$0xff] }
 0x37e   : > { %v2862_v3 = vpop.f32.mrf.mxu3  ;;  %vm9693_vm6 = vnez %v9692_v37 }
 0x37f   : > { %v2863_v46 = vadd.f32 %v2862_v3, %v9685_v35  ;;  %v9247_v3 = vunpack.c.l.bf16 %v8502_v13  ;;  %v3853_v51 = vunpack.c.l.b16 %v3597_v53  ;;  %v3431_v35 = vsel %vm9693_vm6, %v3406_v17, 0.0  ;;  %v5747_v17 = vld [vmem:[#allocation11] sm:$0xff]  ;;  %vm9728_vm6 = vmmov %vm9714_vm1 }
 0x380   : > { %v3559_v53 = vpack.c.bf16 %v3431_v35, %v3431_v35  ;;  %4578 = vmatpush.bf16.msra.mxu2 %v5747_v17 }
 0x381   : > { %v3096_v54 = vadd.f32 %v9687_v9, %v2863_v46  ;;  %v8505_v9 = vpop.f32.mrf.mxu1  ;;  %v9694_v46 = vld [vmem:[#allocation98_spill] sm:$0xff]  ;;  %v3876_v50 = vpack.c.b16 %v3854_v27, %v3853_v51  ;;  %v3473_v18 = vrot.slane %v9247_v3, 1  ;;  %v3493_v27 = vsel %vm9697_vm2, %v3471_v48, %v3472_v30  ;;  %v9704_v51 = vld [vmem:[#allocation85_spill] sm:$0xff]  ;;  %vm9737_vm2 = vmmov %vm9714_vm1 }
 0x382   : > { %v3655_v37 = vunpack.c.l.b16 %v3559_v53  ;;  %v9701_v48 = vunpack.c.h.bf16 %v8332_v10 }
 0x383   : > { %v8498_v2 = vadd.f32 %v8328_v23, %v3096_v54  ;;  %4125 = vmatmul.bf16.gmra.mxu3 %v3680_v19  ;;  %v3405_v23 = vsel %vm9691_vm10, %v3367_v7, %v3368_v34  ;;  %v9695_v54 = vld [vmem:[#allocation49_spill] sm:$0xff]  ;;  %v3492_v31 = vsel %vm9668_vm8, %v3472_v30, %v3473_v18  ;;  %vm9726_vm10 = vmmov %vm9714_vm1 }
 0x384   : > { %v3560_v0 = vpack.c.bf16 %v3405_v23, %v3405_v23  ;;  %v3370_v30 = vrot.slane %v9701_v48, 7 }
 0x385   : > { %9689 = vst [vmem:[#allocation30_spill] sm:$0xff] %v8498_v2  ;;  %v8519_v2 = vpop.f32.mrf.mxu2 }
 0x386   : > { %v2865_v39 = vpop.f32.mrf.mxu3 }
 0x387   : > { %v2866_v63 = vadd.f32 %v2865_v39, %v9694_v46  ;;  %4323 = vmatmul.bf16.gmra.mxu1 %v3876_v50  ;;  %v3536_v39 = vsel %vm7480_vm7, %v3492_v31, 0.0  ;;  %v3656_v46 = vunpack.c.l.b16 %v3560_v0  ;;  %vm9703_vm7 = vmmov %vm9675_vm4 }
 0x388   : > { %v3600_v3 = vpack.c.bf16 %v3536_v39, %v3536_v39  ;;  %v9705_v39 = vunpack.c.h.bf16 %v9704_v51 }
 0x389   : > { %v3099_v19 = vadd.f32 %v9695_v54, %v2866_v63  ;;  %v8528_v35 = vpop.f32.mrf.mxu1  ;;  %v9699_v63 = vld [vmem:[#allocation100_spill] sm:$0xff]  ;;  %v3599_v54 = vpack.c.bf16 %v3493_v27, %v3493_v27  ;;  %v3681_v29 = vpack.c.b16 %v3656_v46, %v3655_v37 }
 0x38a   : > { %v3856_v0 = vunpack.c.l.b16 %v3600_v3 }
 0x38b   : > { %v8522_v7 = vadd.f32 %v8349_v26, %v3099_v19  ;;  %v9700_v26 = vunpack.c.l.bf16 %v8332_v10  ;;  %v3855_v53 = vunpack.c.l.b16 %v3599_v54 }
 0x38d   : > { %9696 = vst [vmem:[#allocation39_spill] sm:$0xff] %v8522_v7  ;;  %v3369_v19 = vrot.slane %v9700_v26, 7  ;;  %v8541_v27 = vpop.f32.mrf.mxu2 }
 0x38e   : > { %v2867_v23 = vpop.f32.mrf.mxu3 }
 0x38f   : > { %v2868_v50 = vadd.f32 %v2867_v23, %v9699_v63  ;;  %v3404_v17 = vsel %vm9703_vm7, %v3368_v34, %v3369_v19  ;;  %v3474_v23 = vrot.slane %v9705_v39, 1  ;;  %v9706_v63 = vld [vmem:[#allocation86_spill] sm:$0xff]  ;;  %v3403_v10 = vsel %vm9675_vm4, %v3369_v19, %v3370_v30 }
 0x390   : > { %v9711_v34 = vld [vmem:[#allocation70_spill] sm:$0xff]  ;;  %v3562_v51 = vpack.c.bf16 %v3403_v10, %v3403_v10  ;;  %v9716_v10 = vld [vmem:[#allocation64_spill] sm:$0xff] }
 0x391   : > { %v3101_v7 = vadd.f32 %v8020_v55, %v2868_v50  ;;  %v9707_v55 = vunpack.c.l.bf16 %v9706_v63  ;;  %v3877_v50 = vpack.c.b16 %v3856_v0, %v3855_v53  ;;  %v8552_v54 = vpop.f32.mrf.mxu1  ;;  %v3491_v19 = vsel %vm9714_vm1, %v3473_v18, %v3474_v23 }
 0x392   : > { %v3658_v0 = vunpack.c.l.b16 %v3562_v51 }
 0x393   : > { %v8537_v31 = vadd.f32 %v8366_v59, %v3101_v7  ;;  %4130 = vmatmul.bf16.gmra.mxu3 %v3681_v29  ;;  %v3475_v37 = vrot.slane %v9707_v55, 1  ;;  %v9708_v59 = vld [vmem:[#allocation59_spill] sm:$0xff]  ;;  %v9710_v7 = vld [vmem:[#allocation53_spill] sm:$0xff] }
 0x394   : > { %vm9709_vm14 = vnez %v9708_v59 }
 0x395   : > { %9702 = vst [vmem:[#allocation22_spill] sm:$0xff] %v8537_v31  ;;  %v3433_v29 = vsel %vm9709_vm14, %v3404_v17, 0.0  ;;  %v3490_v39 = vsel %vm9712_vm9, %v3474_v23, %v3475_v37  ;;  %v8564_v59 = vpop.f32.mrf.mxu2 }
 0x396   : > { %v2870_v46 = vpop.f32.mrf.mxu3  ;;  %v3561_v48 = vpack.c.bf16 %v3433_v29, %v3433_v29 }
 0x397   : > { %v2871_v3 = vadd.f32 %v2870_v46, %v9710_v7  ;;  %4328 = vmatmul.bf16.gmra.mxu1 %v3877_v50  ;;  %v3538_v46 = vsel %vm7559_vm0, %v3490_v39, 0.0  ;;  %v3601_v50 = vpack.c.bf16 %v3491_v19, %v3491_v19  ;;  %vm9720_vm0 = vmmov %vm9675_vm4 }
 0x398   : > { %v3657_v53 = vunpack.c.l.b16 %v3561_v48  ;;  %v9718_v48 = vunpack.c.h.bf16 %v8370_v28  ;;  %vm9722_vm13 = vmmov %vm9720_vm0 }
 0x399   : > { %v3104_v26 = vadd.f32 %v9711_v34, %v2871_v3  ;;  %v8566_v3 = vld [vmem:[#allocation2 + $0x78] sm:$0xff]   ;;  %v3602_v34 = vpack.c.bf16 %v3538_v46, %v3538_v46  ;;  %v8573_v39 = vpop.f32.mrf.mxu1  ;;  %vm9735_vm8 = vmmov %vm9720_vm0 }
 0x39a   : > { %v3682_v18 = vpack.c.b16 %v3658_v0, %v3657_v53  ;;  %v9248_v23 = vunpack.c.l.bf16 %v8566_v3  ;;  %v3372_v51 = vrot.slane %v9718_v48, 7  ;;  %vm9745_vm4 = vmmov %vm9720_vm0 }
 0x39b   : > { %v8558_v55 = vadd.f32 %v8387_v24, %v3104_v26  ;;  %v9717_v24 = vunpack.c.l.bf16 %v8370_v28  ;;  %v3858_v19 = vunpack.c.l.b16 %v3602_v34  ;;  %vm9746_vm14 = vmmov %vm9720_vm0 }
 0x39c   : > { %v3477_v53 = vrot.slane %v9248_v23, 1 }
 0x39d   : > { %9713 = vst [vmem:[#allocation43_spill] sm:$0xff] %v8558_v55  ;;  %v3371_v26 = vrot.slane %v9717_v24, 7  ;;  %v8591_v34 = vpop.f32.mrf.mxu2 }
 0x39e   : > { %v2872_v7 = vpop.f32.mrf.mxu3 }
 0x39f   : > { %v2873_v29 = vadd.f32 %v2872_v7, %v9716_v10  ;;  %v3857_v7 = vunpack.c.l.b16 %v3601_v50  ;;  %v3402_v46 = vsel %vm9720_vm0, %v3370_v30, %v3371_v26  ;;  %v9721_v10 = vunpack.c.h.bf16 %v9706_v63 }
 0x3a0   : > { %v3401_v28 = vsel %vm9722_vm13, %v3371_v26, %v3372_v51 }
 0x3a1   : > { %v3106_v55 = vadd.f32 %v8044_v14, %v2873_v29  ;;  %v3476_v14 = vrot.slane %v9721_v10, 1  ;;  %v9723_v29 = vld [vmem:[#allocation68_spill] sm:$0xff]  ;;  %v3878_v50 = vpack.c.b16 %v3858_v19, %v3857_v7  ;;  %v8599_v26 = vpop.f32.mrf.mxu1 }
 0x3a2   : > { %vm9724_vm5 = vnez %v9723_v29 }
 0x3a3   : > { %v8578_v17 = vadd.f32 %v8404_v1, %v3106_v55  ;;  %4135 = vmatmul.bf16.gmra.mxu3 %v3682_v18  ;;  %v3435_v1 = vsel %vm9724_vm5, %v3402_v46, 0.0  ;;  %v9725_v55 = vld [vmem:[#allocation62_spill] sm:$0xff]  ;;  %v3564_v18 = vpack.c.bf16 %v3401_v28, %v3401_v28  ;;  %v3488_v48 = vsel %vm9726_vm10, %v3476_v14, %v3477_v53  ;;  %vm9756_vm5 = vmmov %vm9745_vm4 }
 0x3a4   : > { %v3563_v63 = vpack.c.bf16 %v3435_v1, %v3435_v1  ;;  %v3489_v46 = vsel %vm9728_vm6, %v3475_v37, %v3476_v14  ;;  %v3540_v7 = vsel %vm7563_vm11, %v3488_v48, 0.0  ;;  %v9730_v1 = vunpack.c.l.bf16 %v8408_v32  ;;  %vm9733_vm11 = vmmov %vm9720_vm0 }
 0x3a5   : > { %9719 = vst [vmem:[#allocation44_spill] sm:$0xff] %v8578_v17  ;;  %v3660_v29 = vunpack.c.l.b16 %v3564_v18  ;;  %v9732_v37 = vunpack.c.h.bf16 %v8408_v32  ;;  %vm9751_vm0 = vmmov %vm9714_vm1 }
 0x3a6   : > { %v2875_v0 = vpop.f32.mrf.mxu3  ;;  %v3659_v19 = vunpack.c.l.b16 %v3563_v63  ;;  %v3373_v28 = vrot.slane %v9730_v1, 7  ;;  %v8614_v63 = vpop.f32.mrf.mxu2  ;;  %vm9760_vm10 = vmmov %vm9745_vm4 }
 0x3a7   : > { %v2876_v24 = vadd.f32 %v2875_v0, %v9725_v55  ;;  %4333 = vmatmul.bf16.gmra.mxu1 %v3878_v50  ;;  %v8607_v55 = vld [vmem:[#allocation2 + $0x80] sm:$0xff]   ;;  %v3374_v14 = vrot.slane %v9732_v37, 7  ;;  %vm9761_vm6 = vmmov %vm9751_vm0 }
 0x3a8   : > { %v9249_v48 = vunpack.c.l.bf16 %v8607_v55  ;;  %v3400_v18 = vsel %vm9733_vm11, %v3372_v51, %v3373_v28  ;;  %v9738_v37 = vld [vmem:[#allocation75_spill] sm:$0xff] }
 0x3a9   : > { %v3109_v30 = vadd.f32 %v8055_v16, %v2876_v24  ;;  %v9731_v24 = vld [vmem:[#allocation67_spill] sm:$0xff]  ;;  %v3399_v32 = vsel %vm9735_vm8, %v3373_v28, %v3374_v14 }
 0x3ab   : > { %v8597_v10 = vadd.f32 %v8427_v41, %v3109_v30  ;;  %v3603_v41 = vpack.c.bf16 %v3489_v46, %v3489_v46  ;;  %v3604_v30 = vpack.c.bf16 %v3540_v7, %v3540_v7  ;;  %v9250_v7 = vunpack.c.h.bf16 %v8566_v3 }
 0x3ad   : > { %9727 = vst [vmem:[#allocation28_spill] sm:$0xff] %v8597_v10  ;;  %v3683_v10 = vpack.c.b16 %v3660_v29, %v3659_v19  ;;  %v3860_v46 = vunpack.c.l.b16 %v3604_v30  ;;  %v3437_v29 = vsel %vm7528_vm15, %v3400_v18, 0.0  ;;  %v3478_v1 = vrot.slane %v9250_v7, 1  ;;  %vm9739_vm15 = vmmov %vm9714_vm1 }
 0x3ae   : > { %v2877_v16 = vpop.f32.mrf.mxu3  ;;  %v3212_v18 = vadd.f32 %v9738_v37, %v8049_v44  ;;  %v8640_v19 = vpop.f32.mrf.mxu2  ;;  %v9743_v37 = vld [vmem:[#allocation36_spill] sm:$0xff] }
 0x3af   : > { %v2878_v50 = vadd.f32 %v2877_v16, %v9731_v24  ;;  %v3859_v16 = vunpack.c.l.b16 %v3603_v41  ;;  %v3566_v41 = vpack.c.bf16 %v3399_v32, %v3399_v32  ;;  %v3487_v17 = vsel %vm9739_vm15, %v3477_v53, %v3478_v1  ;;  %v8656_v53 = vld [vmem:[#allocation2 + $0x88] sm:$0xf] }
 0x3b1   : > { %v3111_v23 = vadd.f32 %v8071_v33, %v2878_v50  ;;  %v8622_v33 = vpop.f32.mrf.mxu0  ;;  %v3879_v24 = vpack.c.b16 %v3860_v46, %v3859_v16  ;;  %v3565_v50 = vpack.c.bf16 %v3437_v29, %v3437_v29  ;;  %v3662_v7 = vunpack.c.l.b16 %v3566_v41 }
 0x3b3   : > { %v8619_v0 = vadd.f32 %v8453_v15, %v3111_v23  ;;  %4140 = vmatmul.bf16.gmra.mxu3 %v3683_v10  ;;  %v3479_v15 = vrot.slane %v9249_v48, 1  ;;  %v8632_v23 = vpop.f32.mrf.mxu1  ;;  %v3661_v48 = vunpack.c.l.b16 %v3565_v50 }
 0x3b5   : > { %9734 = vst [vmem:[#allocation52_spill] sm:$0xff] %v8619_v0  ;;  %v3486_v28 = vsel %vm9737_vm2, %v3478_v1, %v3479_v15  ;;  %v3684_v41 = vpack.c.b16 %v3662_v7, %v3661_v48 }
 0x3b6   : > { %v4101_v51 = vpop.f32.mrf.mxu3 }
 0x3b7   : > { %v4191_v10 = vadd.f32 %v8085_v61, %v4101_v51  ;;  %4338 = vmatmul.bf16.gmra.mxu1 %v3879_v24  ;;  %v9740_v61 = vld [vmem:[#allocation58_spill] sm:$0xff]  ;;  %v3605_v51 = vpack.c.bf16 %v3487_v17, %v3487_v17  ;;  %v9742_v24 = vunpack.c.l.bf16 %v8448_v38 }
 0x3b8   : > { %vm9741_vm7 = vnez %v9740_v61 }
 0x3b9   : > { %v4280_v30 = vadd.f32 %v8479_v45, %v4191_v10  ;;  %v3542_v16 = vsel %vm9741_vm7, %v3486_v28, 0.0  ;;  %v8649_v45 = vld [vmem:[%s9095_s4] ss:$0 sm:$0xff]  ;;  %v8651_v29 = vpop.f32.mrf.mxu0  ;;  %v3375_v50 = vrot.slane %v9742_v24, 7  ;;  %v8664_v28 = vld [vmem:[%s9095_s4 + $0x1] ss:$0 sm:$0xff]  ;;  %v3861_v7 = vunpack.c.l.b16 %v3605_v51 }
 0x3ba   : > { %v3606_v10 = vpack.c.bf16 %v3542_v16, %v3542_v16  ;;  %v9251_v16 = vunpack.c.h.bf16 %v8607_v55 }
 0x3bb   : > { %v4359_v46 = vadd.f32 %v4280_v30, %v3212_v18  ;;  %v8658_v1 = vpop.f32.mrf.mxu1  ;;  %v9744_v18 = vunpack.c.h.bf16 %v8448_v38  ;;  %v3398_v24 = vsel %vm9745_vm4, %v3374_v14, %v3375_v50 }
 0x3bc   : > { %v3480_v31 = vrot.slane %v9251_v16, 1 }
 0x3bd   : > { %v4393_v30 = vmul.f32 %v8649_v45, %v4359_v46  ;;  %v3376_v61 = vrot.slane %v9744_v18, 7  ;;  %v3862_v46 = vunpack.c.l.b16 %v3606_v10 }
 0x3be   : > { %v4103_v32 = vpop.f32.mrf.mxu3 }
 0x3bf   : > { %v4193_v44 = vadd.f32 %v8100_v49, %v4103_v32  ;;  %v3214_v49 = vadd.f32 %v9743_v37, %v8058_v40  ;;  %v9252_v32 = vunpack.c.l.bf16 %v8656_v53  ;;  %v4427_v40 = vadd.f32 %v8664_v28, %v4393_v30 }
 0x3c0   : > { %v3397_v38 = vsel %vm9746_vm14, %v3375_v50, %v3376_v61 }
 0x3c1   : > { %v4282_v17 = vadd.f32 %v8505_v9, %v4193_v44  ;;  %v8681_v44 = vpop.f32.mrf.mxu2  ;;  %v3481_v10 = vrot.slane %v9252_v32, 1  ;;  %v3568_v30 = vpack.c.bf16 %v3397_v38, %v3397_v38  ;;  %v4459_v50 = vmax.f32 %v4427_v40, 0.0  ;;  %v9750_v32 = vld [vmem:[#allocation41_spill] sm:$0xff] }
 0x3c2   : > { %9747 = vst [vmem:[#allocation35_spill] sm:$0xff] %v8681_v44 }
 0x3c3   : > { %v4360_v48 = vadd.f32 %v4282_v17, %v3214_v49  ;;  %4145 = vmatmul.bf16.gmra.mxu3 %v3684_v41  ;;  %v9748_v49 = vld [vmem:[#allocation83_spill] sm:$0xff]  ;;  %v3880_v17 = vpack.c.b16 %v3862_v46, %v3861_v7  ;;  %v3484_v18 = vsel %vm9714_vm1, %v3480_v31, %v3481_v10  ;;  %v9752_v7 = vld [vmem:[#allocation45_spill] sm:$0xff] }
 0x3c4   : > { %vm9749_vm9 = vnez %v9748_v49  ;;  %v8694_v49 = vpop.f32.mrf.mxu1  ;;  %vm9753_vm13 = vnez %v9752_v7 }
 0x3c5   : > { %v4394_v9 = vmul.f32 %v8649_v45, %v4360_v48  ;;  %v3439_v51 = vsel %vm9749_vm9, %v3398_v24, 0.0  ;;  %v8691_v48 = vpop.f32.mrf.mxu0  ;;  %v3544_v46 = vsel %vm9753_vm13, %v3484_v18, 0.0 }
 0x3c6   : > { %v4106_v37 = vpop.f32.mrf.mxu3  ;;  %v3567_v24 = vpack.c.bf16 %v3439_v51, %v3439_v51 }
 0x3c7   : > { %v4428_v14 = vadd.f32 %v8664_v28, %v4394_v9  ;;  %v4196_v41 = vadd.f32 %v8127_v56, %v4106_v37  ;;  %4343 = vmatmul.bf16.gmra.mxu1 %v3880_v17  ;;  %v3217_v9 = vadd.f32 %v9750_v32, %v8069_v20  ;;  %v3485_v56 = vsel %vm9751_vm0, %v3479_v15, %v3480_v31  ;;  %v9755_v31 = vld [vmem:[#allocation96_spill] sm:$0xff] }
 0x3c8   : > { %v3663_v40 = vunpack.c.l.b16 %v3567_v24  ;;  %v3664_v37 = vunpack.c.l.b16 %v3568_v30  ;;  %v3607_v51 = vpack.c.bf16 %v3485_v56, %v3485_v56  ;;  %v9754_v20 = vunpack.c.l.bf16 %v8502_v13 }
 0x3c9   : > { %v4460_v16 = vmax.f32 %v4428_v14, 0.0  ;;  %v4285_v0 = vadd.f32 %v8528_v35, %v4196_v41  ;;  %v3608_v41 = vpack.c.bf16 %v3544_v46, %v3544_v46  ;;  %v8703_v17 = vpop.f32.mrf.mxu2  ;;  %v3219_v15 = vadd.f32 %v9755_v31, %v8078_v52 }
 0x3ca   : > { %v9757_v13 = vunpack.c.l.bf16 %v8236_v4 }
 0x3cb   : > { %v4491_v44 = vpack.c.bf16 %v4460_v16, %v4459_v50  ;;  %v4361_v38 = vadd.f32 %v4285_v0, %v3217_v9  ;;  %v3377_v16 = vrot.slane %v9754_v20, 7  ;;  %v3864_v50 = vunpack.c.l.b16 %v3608_v41 }
 0x3cc   : > { %v8715_v9 = vpop.f32.mrf.mxu1  ;;  %v3482_v56 = vrot.slane %v9757_v13, 1 }
 0x3cd   : > { %4579 = vmatmul.bf16.vlgmr.msra.gmra.mxu2 %v4491_v44  ;;  %v4395_v32 = vmul.f32 %v8649_v45, %v4361_v38  ;;  %v3685_v44 = vpack.c.b16 %v3664_v37, %v3663_v40  ;;  %v8711_v18 = vpop.f32.mrf.mxu0  ;;  %v3396_v24 = vsel %vm9756_vm5, %v3376_v61, %v3377_v16 }
 0x3ce   : > { %v4108_v14 = vpop.f32.mrf.mxu3  ;;  %v3441_v38 = vsel %vm7706_vm12, %v3396_v24, 0.0  ;;  %v3514_v4 = vsel %vm9761_vm6, %v3482_v56, %v8125_v43  ;;  %vm9763_vm12 = vmmov %vm9751_vm0 }
 0x3cf   : > { %v4198_v35 = vadd.f32 %v8151_v57, %v4108_v14  ;;  %v3863_v57 = vunpack.c.l.b16 %v3607_v51  ;;  %v4429_v52 = vadd.f32 %v8664_v28, %v4395_v32  ;;  %v3569_v32 = vpack.c.bf16 %v3441_v38, %v3441_v38 }
 0x3d1   : > { %v4287_v0 = vadd.f32 %v8552_v54, %v4198_v35  ;;  %v3881_v37 = vpack.c.b16 %v3864_v50, %v3863_v57  ;;  %v9759_v35 = vld [vmem:[#allocation87_spill] sm:$0xff]  ;;  %v4461_v41 = vmax.f32 %v4429_v52, 0.0  ;;  %v8732_v31 = vpop.f32.mrf.mxu2  ;;  %v3665_v57 = vunpack.c.l.b16 %v3569_v32 }
 0x3d2   : > { %v3395_v61 = vsel %vm9760_vm10, %v3377_v16, %v9759_v35  ;;  %v3483_v16 = vsel %vm9763_vm12, %v3481_v10, %v3482_v56  ;;  %v9764_v10 = vld [vmem:[#allocation102_spill] sm:$0xff] }
 0x3d3   : > { %v4362_v30 = vadd.f32 %v4287_v0, %v3219_v15  ;;  %4150 = vmatmul.bf16.gmra.mxu3 %v3685_v44  ;;  %v3570_v44 = vpack.c.bf16 %v3395_v61, %v3395_v61  ;;  %v3224_v56 = vadd.f32 %v9764_v10, %v8105_v5 }
 0x3d4   : > { %v8742_v50 = vpop.f32.mrf.mxu1 }
 0x3d5   : > { %v4396_v7 = vmul.f32 %v8649_v45, %v4362_v30  ;;  %v3546_v30 = vsel %vm8002_vm3, %v3514_v4, 0.0  ;;  %v8740_v43 = vpop.f32.mrf.mxu0  ;;  %vm9770_vm3 = vmmov %vm9745_vm4 }
 0x3d6   : > { %v4111_v54 = vpop.f32.mrf.mxu3  ;;  %v3610_v52 = vpack.c.bf16 %v3546_v30, %v3546_v30  ;;  %vm9776_vm8 = vmmov %vm9770_vm3 }
 0x3d7   : > { %v4201_v40 = vadd.f32 %v8174_v60, %v4111_v54  ;;  %v4430_v14 = vadd.f32 %v8664_v28, %v4396_v7  ;;  %4348 = vmatmul.bf16.gmra.mxu1 %v3881_v37  ;;  %v9762_v60 = vld [vmem:[#allocation99_spill] sm:$0xff]  ;;  %v3666_v7 = vunpack.c.l.b16 %v3570_v44  ;;  %vm9780_vm2 = vmmov %vm9770_vm3 }
 0x3d8   : > { %v3222_v15 = vadd.f32 %v9762_v60, %v8091_v12  ;;  %v3609_v12 = vpack.c.bf16 %v3483_v16, %v3483_v16  ;;  %v3866_v37 = vunpack.c.l.b16 %v3610_v52  ;;  %vm9783_vm7 = vmmov %vm9780_vm2 }
 0x3d9   : > { %v4290_v51 = vadd.f32 %v8573_v39, %v4201_v40  ;;  %v4462_v20 = vmax.f32 %v4430_v14, 0.0  ;;  %v3686_v46 = vpack.c.b16 %v3666_v7, %v3665_v57  ;;  %v8749_v14 = vpop.f32.mrf.mxu2  ;;  %v9767_v7 = vld [vmem:[#allocation60_spill] sm:$0xff]  ;;  %vm9787_vm4 = vmmov %vm9780_vm2 }
 0x3da   : > { %v3865_v40 = vunpack.c.l.b16 %v3609_v12  ;;  %v3229_v12 = vadd.f32 %v9767_v7, %v8145_v21  ;;  %vm9791_vm9 = vmmov %vm9780_vm2 }
 0x3db   : > { %v4492_v0 = vpack.c.bf16 %v4462_v20, %v4461_v41  ;;  %v4363_v39 = vadd.f32 %v4290_v51, %v3222_v15  ;;  %v9765_v15 = vld [vmem:[#allocation47_spill] sm:$0xff] }
 0x3dc   : > { %v3882_v41 = vpack.c.b16 %v3866_v37, %v3865_v40 }
 0x3dd   : > { %4584 = vmatmul.bf16.gmra.mxu2 %v4492_v0  ;;  %v4397_v54 = vmul.f32 %v8649_v45, %v4363_v39  ;;  %v8753_v4 = vpop.f32.mrf.mxu0  ;;  %v3227_v0 = vadd.f32 %v9765_v15, %v8130_v58 }
 0x3de   : > { %v4113_v24 = vpop.f32.mrf.mxu3 }
 0x3df   : > { %v4203_v13 = vadd.f32 %v8193_v47, %v4113_v24  ;;  %v4431_v47 = vadd.f32 %v8664_v28, %v4397_v54  ;;  %v9768_v54 = vunpack.c.h.bf16 %v8566_v3 }
 0x3e1   : > { %v4292_v11 = vadd.f32 %v8599_v26, %v4203_v13  ;;  %v8757_v26 = vpop.f32.mrf.mxu1  ;;  %v4463_v32 = vmax.f32 %v4431_v47, 0.0  ;;  %v8762_v30 = vpop.f32.mrf.mxu2  ;;  %v3382_v10 = vrot.slane %v9768_v54, 7 }
 0x3e3   : > { %v4364_v38 = vadd.f32 %v4292_v11, %v3224_v56  ;;  %4155 = vmatmul.bf16.gmra.mxu3 %v3686_v46  ;;  %v9769_v56 = vld [vmem:[#allocation88_spill] sm:$0xff] }
 0x3e5   : > { %v4398_v35 = vmul.f32 %v8649_v45, %v4364_v38  ;;  %v8767_v13 = vpop.f32.mrf.mxu0  ;;  %v9772_v38 = vld [vmem:[#allocation89_spill] sm:$0xff] }
 0x3e6   : > { %v4116_v61 = vpop.f32.mrf.mxu3 }
 0x3e7   : > { %v4206_v51 = vadd.f32 %v8622_v33, %v4116_v61  ;;  %v4432_v5 = vadd.f32 %v8664_v28, %v4398_v35  ;;  %4353 = vmatmul.bf16.gmra.mxu1 %v3882_v41  ;;  %v9766_v33 = vunpack.c.l.bf16 %v8566_v3  ;;  %v9774_v35 = vld [vmem:[#allocation73_spill] sm:$0xff] }
 0x3e8   : > { %vm9775_vm11 = vnez %v9774_v35 }
 0x3e9   : > { %v4295_v20 = vadd.f32 %v8632_v23, %v4206_v51  ;;  %v4464_v60 = vmax.f32 %v4432_v5, 0.0  ;;  %v3381_v57 = vrot.slane %v9766_v33, 7  ;;  %v8773_v52 = vpop.f32.mrf.mxu1  ;;  %v8791_v41 = vpop.f32.mrf.mxu2 }
 0x3eb   : > { %v4493_v44 = vpack.c.bf16 %v4464_v60, %v4463_v32  ;;  %v4365_v16 = vadd.f32 %v4295_v20, %v3227_v0  ;;  %v3392_v11 = vsel %vm9770_vm3, %v9769_v56, %v3381_v57  ;;  %v3391_v3 = vsel %vm9776_vm8, %v3381_v57, %v3382_v10 }
 0x3ec   : > { %v3574_v15 = vpack.c.bf16 %v3391_v3, %v3391_v3 }
 0x3ed   : > { %4589 = vmatmul.bf16.gmra.mxu2 %v4493_v44  ;;  %v4399_v23 = vmul.f32 %v8649_v45, %v4365_v16  ;;  %v8794_v0 = vpop.f32.mrf.mxu0  ;;  %v3232_v44 = vadd.f32 %v8415_v8, %v8164_v36 }
 0x3ee   : > { %v4118_v39 = vpop.f32.mrf.mxu3  ;;  %v3670_v57 = vunpack.c.l.b16 %v3574_v15 }
 0x3ef   : > { %v4208_v24 = vadd.f32 %v8651_v29, %v4118_v39  ;;  %v9771_v29 = vld [vmem:[#allocation90_spill] sm:$0xff]  ;;  %v4433_v21 = vadd.f32 %v8664_v28, %v4399_v23  ;;  %v9777_v23 = vunpack.c.l.bf16 %v8607_v55 }
 0x3f0   : > { %v9773_v40 = vpack.c.b16 %v9771_v29, %v9772_v38 }
 0x3f1   : > { %v4297_v58 = vadd.f32 %v8658_v1, %v4208_v24  ;;  %v3445_v1 = vsel %vm9775_vm11, %v3392_v11, 0.0  ;;  %v4465_v32 = vmax.f32 %v4433_v21, 0.0  ;;  %v8798_v39 = vpop.f32.mrf.mxu1  ;;  %v3383_v7 = vrot.slane %v9777_v23, 7  ;;  %v8807_v56 = vpop.f32.mrf.mxu2  ;;  %v5722_v21 = vld [vmem:[#allocation2 + $0x88] sm:$0xff] }
 0x3f2   : > { %v3573_v5 = vpack.c.bf16 %v3445_v1, %v3445_v1  ;;  %v9779_v11 = vunpack.c.h.bf16 %v8607_v55  ;;  %4264 = vmatmul.bf16.gmra.mxu0 %v5722_v21 }
 0x3f3   : > { %v4366_v46 = vadd.f32 %v4297_v58, %v3229_v12  ;;  %4160 = vmatmul.bf16.gmra.mxu3 %v9773_v40  ;;  %v9778_v58 = vld [vmem:[#allocation69_spill] sm:$0xff]  ;;  %v3390_v29 = vsel %vm9780_vm2, %v3382_v10, %v3383_v7 }
 0x3f4   : > { %v3234_v54 = vadd.f32 %v8442_v42, %v9778_v58  ;;  %v9781_v42 = vld [vmem:[#allocation26_spill] sm:$0xff] }
 0x3f5   : > { %v4400_v37 = vmul.f32 %v8649_v45, %v4366_v46  ;;  %v3384_v46 = vrot.slane %v9779_v11, 7  ;;  %v8813_v40 = vpop.f32.mrf.mxu0  ;;  %vm9782_vm15 = vnez %v9781_v42 }
 0x3f6   : > { %v4121_v47 = vpop.f32.mrf.mxu3 }
 0x3f7   : > { %v4211_v61 = vadd.f32 %v8691_v48, %v4121_v47  ;;  %v4434_v51 = vadd.f32 %v8664_v28, %v4400_v37  ;;  %v3669_v48 = vunpack.c.l.b16 %v3573_v5  ;;  %v3389_v55 = vsel %vm9783_vm7, %v3383_v7, %v3384_v46 }
 0x3f9   : > { %v4300_v20 = vadd.f32 %v8694_v49, %v4211_v61  ;;  %v4466_v60 = vmax.f32 %v4434_v51, 0.0  ;;  %v3688_v8 = vpack.c.b16 %v3670_v57, %v3669_v48  ;;  %v8819_v35 = vpop.f32.mrf.mxu1  ;;  %v9785_v57 = vunpack.c.l.bf16 %v8656_v53 }
 0x3fb   : > { %v4494_v16 = vpack.c.bf16 %v4466_v60, %v4465_v32  ;;  %v4367_v33 = vadd.f32 %v4300_v20, %v3232_v44  ;;  %v3576_v20 = vpack.c.bf16 %v3389_v55, %v3389_v55  ;;  %v9784_v32 = vld [vmem:[#allocation76_spill] sm:$0xff]  ;;  %v8828_v44 = vpop.f32.mrf.mxu2 }
 0x3fc   : > { %v3237_v60 = vadd.f32 %v8467_v6, %v9784_v32 }
 0x3fd   : > { %4594 = vmatmul.bf16.gmra.mxu2 %v4494_v16  ;;  %v4401_v12 = vmul.f32 %v8649_v45, %v4367_v33  ;;  %v3672_v48 = vunpack.c.l.b16 %v3576_v20  ;;  %v4227_v23 = vpop.f32.mrf.mxu0 }
 0x3fe   : > { %v4123_v24 = vpop.f32.mrf.mxu3 }
 0x3ff   : > { %v4213_v49 = vadd.f32 %v8711_v18, %v4123_v24  ;;  %v4435_v37 = vadd.f32 %v8664_v28, %v4401_v12  ;;  %v3385_v24 = vrot.slane %v9785_v57, 7  ;;  %v9786_v12 = vld [vmem:[#allocation77_spill] sm:$0xff] }
 0x400   : > { %v3239_v6 = vadd.f32 %v8491_v22, %v9786_v12 }
 0x401   : > { %v4302_v36 = vadd.f32 %v8715_v9, %v4213_v49  ;;  %v3447_v9 = vsel %vm9782_vm15, %v3390_v29, 0.0  ;;  %v4467_v51 = vmax.f32 %v4435_v37, 0.0  ;;  %v4316_v7 = vpop.f32.mrf.mxu1  ;;  %v9788_v29 = vld [vmem:[#allocation31_spill] sm:$0xff]  ;;  %v9790_v37 = vld [vmem:[#allocation81_spill] sm:$0xff] }
 0x402   : > { %v3575_v3 = vpack.c.bf16 %v3447_v9, %v3447_v9  ;;  %vm9789_vm14 = vnez %v9788_v29  ;;  %v3387_v22 = vsel %vm9791_vm9, %v3385_v24, %v9790_v37  ;;  %v9795_v37 = vld [vmem:[#allocation61_spill] sm:$0xff] }
 0x403   : > { %v4368_v38 = vadd.f32 %v4302_v36, %v3234_v54  ;;  %4165 = vmatmul.bf16.gmra.mxu3 %v3688_v8  ;;  %v3388_v36 = vsel %vm9787_vm4, %v3384_v46, %v3385_v24 }
 0x404   : > { %v3671_v33 = vunpack.c.l.b16 %v3575_v3  ;;  %v9792_v3 = vld [vmem:[#allocation82_spill] sm:$0xff] }
 0x405   : > { %v4402_v18 = vmul.f32 %v8649_v45, %v4368_v38  ;;  %v8843_v38 = vpop.f32.mrf.mxu2  ;;  %v4230_v9 = vpop.f32.mrf.mxu0 }
 0x406   : > { %v4126_v1 = vpop.f32.mrf.mxu3  ;;  %v3689_v54 = vpack.c.b16 %v3672_v48, %v3671_v33 }
 0x407   : > { %v4216_v10 = vadd.f32 %v8740_v43, %v4126_v1  ;;  %v4436_v47 = vadd.f32 %v8664_v28, %v4402_v18 }
 0x409   : > { %v4305_v61 = vadd.f32 %v8742_v50, %v4216_v10  ;;  %v4468_v5 = vmax.f32 %v4436_v47, 0.0  ;;  %v3578_v10 = vpack.c.bf16 %v3387_v22, %v3387_v22  ;;  %v4319_v47 = vpop.f32.mrf.mxu1  ;;  %v3249_v22 = vadd.f32 %v8591_v34, %v9795_v37  ;;  %v9800_v37 = vld [vmem:[#allocation52_spill] sm:$0xff] }
 0x40b   : > { %v4495_v15 = vpack.c.bf16 %v4468_v5, %v4467_v51  ;;  %v4369_v16 = vadd.f32 %v4305_v61, %v3237_v60  ;;  %v3242_v61 = vadd.f32 %v8519_v2, %v9792_v3  ;;  %v3674_v20 = vunpack.c.l.b16 %v3578_v10 }
 0x40d   : > { %4599 = vmatmul.bf16.gmra.mxu2 %v4495_v15  ;;  %v4403_v49 = vmul.f32 %v8649_v45, %v4369_v16  ;;  %v8854_v60 = vpop.f32.mrf.mxu2 }
 0x40e   : > { %v4128_v43 = vpop.f32.mrf.mxu3 }
 0x40f   : > { %v4218_v50 = vadd.f32 %v8753_v4, %v4128_v43  ;;  %v4437_v11 = vadd.f32 %v8664_v28, %v4403_v49  ;;  %v3449_v4 = vsel %vm9789_vm14, %v3388_v36, 0.0  ;;  %v4232_v43 = vpop.f32.mrf.mxu0 }
 0x410   : > { %v3577_v42 = vpack.c.bf16 %v3449_v4, %v3449_v4 }
 0x411   : > { %v4307_v58 = vadd.f32 %v8757_v26, %v4218_v50  ;;  %v4469_v1 = vmax.f32 %v4437_v11, 0.0  ;;  %v4321_v57 = vpop.f32.mrf.mxu1 }
 0x412   : > { %v3673_v25 = vunpack.c.l.b16 %v3577_v42 }
 0x413   : > { %v4370_v8 = vadd.f32 %v4307_v58, %v3239_v6  ;;  %4170 = vmatmul.bf16.gmra.mxu3 %v3689_v54 }
 0x414   : > { %v3690_v48 = vpack.c.b16 %v3674_v20, %v3673_v25 }
 0x415   : > { %v4404_v53 = vmul.f32 %v8649_v45, %v4370_v8  ;;  %v8865_v54 = vpop.f32.mrf.mxu2 }
 0x416   : > { %v4131_v18 = vpop.f32.mrf.mxu3 }
 0x417   : > { %v4221_v26 = vadd.f32 %v8767_v13, %v4131_v18  ;;  %v4438_v46 = vadd.f32 %v8664_v28, %v4404_v53  ;;  %v4235_v53 = vpop.f32.mrf.mxu0 }
 0x419   : > { %v4310_v21 = vadd.f32 %v8773_v52, %v4221_v26  ;;  %v4470_v55 = vmax.f32 %v4438_v46, 0.0  ;;  %v9793_v52 = vld [vmem:[#allocation19_spill] sm:$0xff]  ;;  %v4324_v29 = vpop.f32.mrf.mxu1 }
 0x41a   : > { %v3244_v16 = vadd.f32 %v8541_v27, %v9793_v52 }
 0x41b   : > { %v4496_v51 = vpack.c.bf16 %v4470_v55, %v4469_v1  ;;  %v4371_v5 = vadd.f32 %v4310_v21, %v3242_v61 }
 0x41d   : > { %4604 = vmatmul.bf16.gmra.mxu2 %v4496_v51  ;;  %v4405_v15 = vmul.f32 %v8649_v45, %v4371_v5  ;;  %v8872_v46 = vpop.f32.mrf.mxu2  ;;  %v9796_v5 = vld [vmem:[#allocation23_spill] sm:$0xff] }
 0x41e   : > { %v4133_v32 = vpop.f32.mrf.mxu3  ;;  %v3252_v34 = vadd.f32 %v8614_v63, %v9796_v5 }
 0x41f   : > { %v4223_v13 = vadd.f32 %v8794_v0, %v4133_v32  ;;  %v4439_v50 = vadd.f32 %v8664_v28, %v4405_v15  ;;  %v4237_v1 = vpop.f32.mrf.mxu0 }
 0x421   : > { %v4312_v33 = vadd.f32 %v8798_v39, %v4223_v13  ;;  %v4471_v58 = vmax.f32 %v4439_v50, 0.0  ;;  %v9794_v39 = vld [vmem:[#allocation18_spill] sm:$0xff]  ;;  %v4326_v3 = vpop.f32.mrf.mxu1 }
 0x422   : > { %v3247_v36 = vadd.f32 %v8564_v59, %v9794_v39 }
 0x423   : > { %v4372_v2 = vadd.f32 %v4312_v33, %v3244_v16  ;;  %4175 = vmatmul.bf16.gmra.mxu3 %v3690_v48 }
 0x425   : > { %v4406_v24 = vmul.f32 %v8649_v45, %v4372_v2  ;;  %v8879_v20 = vpop.f32.mrf.mxu2 }
 0x426   : > { %v4136_v49 = vpop.f32.mrf.mxu3 }
 0x427   : > { %v4226_v0 = vadd.f32 %v8813_v40, %v4136_v49  ;;  %v4440_v12 = vadd.f32 %v8664_v28, %v4406_v24  ;;  %v4240_v15 = vpop.f32.mrf.mxu0 }
 0x429   : > { %v4315_v6 = vadd.f32 %v8819_v35, %v4226_v0  ;;  %v4472_v27 = vmax.f32 %v4440_v12, 0.0 }
 0x42b   : > { %v4497_v8 = vpack.c.bf16 %v4472_v27, %v4471_v58  ;;  %v4373_v11 = vadd.f32 %v4315_v6, %v3247_v36  ;;  %v9797_v58 = vld [vmem:[#allocation25_spill] sm:$0xff]  ;;  %v9798_v27 = vld [vmem:[#allocation35_spill] sm:$0xff] }
 0x42c   : > { %v3257_v39 = vadd.f32 %v9798_v27, %v9797_v58  ;;  %v9802_v27 = vld [vmem:[#allocation66_spill] sm:$0xff] }
 0x42d   : > { %4609 = vmatmul.bf16.gmra.mxu2 %v4497_v8  ;;  %v4407_v40 = vmul.f32 %v8649_v45, %v4373_v11  ;;  %v3288_v49 = vpop.f32.mrf.mxu2 }
 0x42e   : > { %v4138_v4 = vpop.f32.mrf.mxu3 }
 0x42f   : > { %v4228_v18 = vadd.f32 %v4227_v23, %v4138_v4  ;;  %v4441_v59 = vadd.f32 %v8664_v28, %v4407_v40  ;;  %v4242_v6 = vpop.f32.mrf.mxu0  ;;  %v9799_v4 = vld [vmem:[#allocation71_spill] sm:$0xff] }
 0x431   : > { %v4317_v35 = vadd.f32 %v4316_v7, %v4228_v18  ;;  %v4473_v61 = vmax.f32 %v4441_v59, 0.0  ;;  %v3259_v18 = vadd.f32 %v8703_v17, %v9799_v4  ;;  %v5837_v59 = vld [vmem:[%s6570_s10] sm:$0xff]  }
 0x433   : > { %v4374_v26 = vadd.f32 %v4317_v35, %v3249_v22  ;;  %v8898_v22 = vadd.f32 %v3288_v49, %v9800_v37 }
 0x435   : > { %v4408_v42 = vmul.f32 %v8649_v45, %v4374_v26 }
 0x436   : > { %v4141_v21 = vpop.f32.mrf.mxu3 }
 0x437   : > { %v4231_v55 = vadd.f32 %v4230_v9, %v4141_v21  ;;  %v4442_v10 = vadd.f32 %v8664_v28, %v4408_v42  ;;  %v3254_v9 = vadd.f32 %v8640_v19, %v8342_v62  ;;  %v8904_v42 = vld [vmem:[%s9097_s6 + $0x1] ss:$0 sm:$0xff]  ;;  %v4245_v21 = vpop.f32.mrf.mxu0 }
 0x439   : > { %v4320_v23 = vadd.f32 %v4319_v47, %v4231_v55  ;;  %v4474_v51 = vmax.f32 %v4442_v10, 0.0  ;;  %v4329_v47 = vpop.f32.mrf.mxu1 }
 0x43b   : > { %v4498_v7 = vpack.c.bf16 %v4474_v51, %v4473_v61  ;;  %v4375_v25 = vadd.f32 %v4320_v23, %v3252_v34  ;;  %v5838_v23 = vunpack.c.l.bf16 %v5837_v59  ;;  %v5839_v34 = vunpack.c.h.bf16 %v5837_v59 }
 0x43d   : > { %4614 = vmatmul.bf16.gmra.mxu2 %v4498_v7  ;;  %v4409_v52 = vmul.f32 %v8649_v45, %v4375_v25 }
 0x43e   : > { %v4143_v32 = vpop.f32.mrf.mxu3 }
 0x43f   : > { %v4233_v13 = vadd.f32 %v4232_v43, %v4143_v32  ;;  %v4443_v63 = vadd.f32 %v8664_v28, %v4409_v52 }
 0x441   : > { %v4322_v16 = vadd.f32 %v4321_v57, %v4233_v13  ;;  %v4475_v43 = vmax.f32 %v4443_v63, 0.0  ;;  %v4331_v19 = vpop.f32.mrf.mxu1 }
 0x443   : > { %v4376_v33 = vadd.f32 %v4322_v16, %v3254_v9  ;;  %v9801_v9 = vld [vmem:[#allocation17_spill] sm:$0xff] }
 0x444   : > { %v3262_v16 = vadd.f32 %v8732_v31, %v9801_v9  ;;  %v3264_v31 = vadd.f32 %v8749_v14, %v9802_v27  ;;  %v9804_v9 = vld [vmem:[#allocation32_spill] sm:$0xff] }
 0x445   : > { %v4410_v48 = vmul.f32 %v8649_v45, %v4376_v33 }
 0x446   : > { %v4146_v2 = vpop.f32.mrf.mxu3 }
 0x447   : > { %v4236_v24 = vadd.f32 %v4235_v53, %v4146_v2  ;;  %v4444_v50 = vadd.f32 %v8664_v28, %v4410_v48  ;;  %v8892_v53 = vld [vmem:[%s9097_s6] ss:$0 sm:$0xff] }
 0x449   : > { %v4325_v0 = vadd.f32 %v4324_v29, %v4236_v24  ;;  %v4476_v12 = vmax.f32 %v4444_v50, 0.0  ;;  %v4334_v10 = vpop.f32.mrf.mxu1  ;;  %v4247_v24 = vpop.f32.mrf.mxu0 }
 0x44b   : > { %v4499_v62 = vpack.c.bf16 %v4476_v12, %v4475_v43  ;;  %v4377_v57 = vadd.f32 %v4325_v0, %v3257_v39 }
 0x44d   : > { %4619 = vmatmul.bf16.gmra.mxu2 %v4499_v62  ;;  %v4411_v29 = vmul.f32 %v8649_v45, %v4377_v57 }
 0x44e   : > { %v4148_v36 = vpop.f32.mrf.mxu3 }
 0x44f   : > { %v4238_v8 = vadd.f32 %v4237_v1, %v4148_v36  ;;  %v4445_v55 = vadd.f32 %v8664_v28, %v4411_v29  ;;  %v5996_v36 = vld [vmem:[%s6570_s10 + $0x8] sm:$0xff]  }
 0x450   : > { %v4580_v11 = vpop.f32.mrf.mxu2  ;;  %v5842_v4 = vunpack.c.l.bf16 %v5996_v36 }
 0x451   : > { %v4327_v40 = vadd.f32 %v4326_v3, %v4238_v8  ;;  %v4662_v26 = vmul.f32 %v8892_v53, %v4580_v11  ;;  %v4477_v32 = vmax.f32 %v4445_v55, 0.0  ;;  %v4336_v0 = vpop.f32.mrf.mxu1  ;;  %v4250_v37 = vpop.f32.mrf.mxu0 }
 0x453   : > { %v4378_v35 = vadd.f32 %v4327_v40, %v3259_v18  ;;  %v4696_v3 = vadd.f32 %v8904_v42, %v4662_v26  ;;  %v5843_v40 = vunpack.c.h.bf16 %v5996_v36  ;;  %v9805_v36 = vld [vmem:[#allocation27_spill] sm:$0xff] }
 0x455   : > { %v4412_v1 = vmul.f32 %v8649_v45, %v4378_v35  ;;  %v4792_v52 = vadd.f32 %v5838_v23, %v4696_v3  ;;  %v9803_v3 = vld [vmem:[#allocation40_spill] sm:$0xff] }
 0x456   : > { %v4151_v17 = vpop.f32.mrf.mxu3  ;;  %v3267_v23 = vadd.f32 %v8762_v30, %v9803_v3 }
 0x457   : > { %v4241_v61 = vadd.f32 %v4240_v15, %v4151_v17  ;;  %v4446_v51 = vadd.f32 %v8664_v28, %v4412_v1  ;;  %v4824_v50 = vmax.f32 %v4792_v52, 0.0 }
 0x458   : > { %v4582_v5 = vpop.f32.mrf.mxu2 }
 0x459   : > { %v4330_v7 = vadd.f32 %v4329_v47, %v4241_v61  ;;  %v4663_v25 = vmul.f32 %v8892_v53, %v4582_v5  ;;  %v4478_v13 = vmax.f32 %v4446_v51, 0.0  ;;  %v4339_v55 = vpop.f32.mrf.mxu1 }
 0x45b   : > { %v4697_v33 = vadd.f32 %v8904_v42, %v4663_v25  ;;  %v4500_v48 = vpack.c.bf16 %v4478_v13, %v4477_v32  ;;  %v4379_v63 = vadd.f32 %v4330_v7, %v3262_v16  ;;  %v3269_v16 = vadd.f32 %v8791_v41, %v9804_v9 }
 0x45d   : > { %v4793_v2 = vadd.f32 %v5839_v34, %v4697_v33  ;;  %4624 = vmatmul.bf16.gmra.mxu2 %v4500_v48  ;;  %v4413_v12 = vmul.f32 %v8649_v45, %v4379_v63  ;;  %v4252_v33 = vpop.f32.mrf.mxu0 }
 0x45e   : > { %v4153_v15 = vpop.f32.mrf.mxu3 }
 0x45f   : > { %v4825_v47 = vmax.f32 %v4793_v2, 0.0  ;;  %v4243_v49 = vadd.f32 %v4242_v6, %v4153_v15  ;;  %v4447_v8 = vadd.f32 %v8664_v28, %v4413_v12  ;;  %v5997_v15 = vld [vmem:[%s6570_s10 + $0x10] sm:$0xff]  }
 0x460   : > { %v4585_v43 = vpop.f32.mrf.mxu2 }
 0x461   : > { %v5903_v58 = vpack.c.bf16 %v4825_v47, %v4824_v50  ;;  %v4332_v39 = vadd.f32 %v4331_v19, %v4243_v49  ;;  %v4664_v57 = vmul.f32 %v8892_v53, %v4585_v43  ;;  %v4479_v59 = vmax.f32 %v4447_v8, 0.0  ;;  %v4341_v2 = vpop.f32.mrf.mxu1 }
 0x462   : > { %v5846_v43 = vunpack.c.l.bf16 %v5997_v15 }
 0x463   : > { %5904 = vst [vmem:[%s8920_s16] sm:$0xff] %v5903_v58   ;;  %v4380_v62 = vadd.f32 %v4332_v39, %v3264_v31  ;;  %v4698_v29 = vadd.f32 %v8904_v42, %v4664_v57 }
 0x465   : > { %v4414_v6 = vmul.f32 %v8649_v45, %v4380_v62  ;;  %v4794_v17 = vadd.f32 %v5842_v4, %v4698_v29  ;;  %v4255_v29 = vpop.f32.mrf.mxu0 }
 0x466   : > { %v4156_v11 = vpop.f32.mrf.mxu3 }
 0x467   : > { %v4246_v18 = vadd.f32 %v4245_v21, %v4156_v11  ;;  %v4448_v14 = vadd.f32 %v8664_v28, %v4414_v6  ;;  %v4826_v7 = vmax.f32 %v4794_v17, 0.0  ;;  %v3272_v6 = vadd.f32 %v8807_v56, %v9805_v36 }
 0x468   : > { %v4587_v19 = vpop.f32.mrf.mxu2 }
 0x469   : > { %v4335_v35 = vadd.f32 %v4334_v10, %v4246_v18  ;;  %v4665_v26 = vmul.f32 %v8892_v53, %v4587_v19  ;;  %v4480_v1 = vmax.f32 %v4448_v14, 0.0  ;;  %v4344_v14 = vpop.f32.mrf.mxu1 }
 0x46b   : > { %v4699_v61 = vadd.f32 %v8904_v42, %v4665_v26  ;;  %v4501_v51 = vpack.c.bf16 %v4480_v1, %v4479_v59  ;;  %v4381_v21 = vadd.f32 %v4335_v35, %v3267_v23 }
 0x46d   : > { %v4795_v5 = vadd.f32 %v5843_v40, %v4699_v61  ;;  %4629 = vmatmul.bf16.gmra.mxu2 %v4501_v51  ;;  %v4415_v13 = vmul.f32 %v8649_v45, %v4381_v21  ;;  %v5998_v61 = vld [vmem:[%s6570_s10 + $0x18] sm:$0xff]  }
 0x46e   : > { %v4158_v34 = vpop.f32.mrf.mxu3 }
 0x46f   : > { %v4827_v10 = vmax.f32 %v4795_v5, 0.0  ;;  %v4248_v25 = vadd.f32 %v4247_v24, %v4158_v34  ;;  %v4449_v47 = vadd.f32 %v8664_v28, %v4415_v13  ;;  %v4257_v34 = vpop.f32.mrf.mxu0 }
 0x470   : > { %v4590_v32 = vpop.f32.mrf.mxu2 }
 0x471   : > { %v5908_v52 = vpack.c.bf16 %v4827_v10, %v4826_v7  ;;  %v4337_v30 = vadd.f32 %v4336_v0, %v4248_v25  ;;  %v4666_v63 = vmul.f32 %v8892_v53, %v4590_v32  ;;  %v5847_v0 = vunpack.c.h.bf16 %v5997_v15  ;;  %v4346_v13 = vpop.f32.mrf.mxu1 }
 0x472   : > { %v4481_v39 = vmax.f32 %v4449_v47, 0.0  ;;  %v5850_v10 = vunpack.c.l.bf16 %v5998_v61 }
 0x473   : > { %6011 = vst [vmem:[%s8920_s16 + $0x8] sm:$0xff] %v5908_v52   ;;  %v4382_v48 = vadd.f32 %v4337_v30, %v3269_v16  ;;  %v4700_v49 = vadd.f32 %v8904_v42, %v4666_v63  ;;  %v5851_v52 = vunpack.c.h.bf16 %v5998_v61  ;;  %v9807_v63 = vld [vmem:[#allocation39_spill] sm:$0xff] }
 0x475   : > { %v4416_v50 = vmul.f32 %v8649_v45, %v4382_v48  ;;  %v4796_v57 = vadd.f32 %v5846_v43, %v4700_v49 }
 0x476   : > { %v4161_v24 = vpop.f32.mrf.mxu3 }
 0x477   : > { %v4251_v12 = vadd.f32 %v4250_v37, %v4161_v24  ;;  %v4450_v58 = vadd.f32 %v8664_v28, %v4416_v50  ;;  %v4828_v40 = vmax.f32 %v4796_v57, 0.0 }
 0x478   : > { %v4592_v41 = vpop.f32.mrf.mxu2 }
 0x479   : > { %v4340_v27 = vadd.f32 %v4339_v55, %v4251_v12  ;;  %v4667_v31 = vmul.f32 %v8892_v53, %v4592_v41  ;;  %v4482_v62 = vmax.f32 %v4450_v58, 0.0  ;;  %v9806_v55 = vld [vmem:[#allocation30_spill] sm:$0xff]  ;;  %v4349_v57 = vpop.f32.mrf.mxu1 }
 0x47a   : > { %v3274_v56 = vadd.f32 %v8828_v44, %v9806_v55 }
 0x47b   : > { %v4701_v8 = vadd.f32 %v8904_v42, %v4667_v31  ;;  %v4502_v11 = vpack.c.bf16 %v4482_v62, %v4481_v39  ;;  %v4383_v4 = vadd.f32 %v4340_v27, %v3272_v6  ;;  %v9808_v31 = vld [vmem:[#allocation22_spill] sm:$0xff]  ;;  %v4260_v62 = vpop.f32.mrf.mxu0 }
 0x47c   : > { %v3279_v39 = vadd.f32 %v8854_v60, %v9808_v31 }
 0x47d   : > { %v4797_v18 = vadd.f32 %v5847_v0, %v4701_v8  ;;  %4634 = vmatmul.bf16.gmra.mxu2 %v4502_v11  ;;  %v4417_v59 = vmul.f32 %v8649_v45, %v4383_v4  ;;  %v5999_v8 = vld [vmem:[%s6570_s10 + $0x20] sm:$0xff]  }
 0x47e   : > { %v4163_v19 = vpop.f32.mrf.mxu3 }
 0x47f   : > { %v4829_v37 = vmax.f32 %v4797_v18, 0.0  ;;  %v4253_v35 = vadd.f32 %v4252_v33, %v4163_v19  ;;  %v4451_v21 = vadd.f32 %v8664_v28, %v4417_v59 }
 0x480   : > { %v4595_v26 = vpop.f32.mrf.mxu2 }
 0x481   : > { %v5913_v1 = vpack.c.bf16 %v4829_v37, %v4828_v40  ;;  %v4342_v17 = vadd.f32 %v4341_v2, %v4253_v35  ;;  %v4668_v23 = vmul.f32 %v8892_v53, %v4595_v26  ;;  %v4483_v30 = vmax.f32 %v4451_v21, 0.0 }
 0x482   : > { %v3277_v2 = vadd.f32 %v8843_v38, %v9807_v63  ;;  %v5855_v37 = vunpack.c.h.bf16 %v5999_v8 }
 0x483   : > { %6012 = vst [vmem:[%s8920_s16 + $0x10] sm:$0xff] %v5913_v1   ;;  %v4384_v3 = vadd.f32 %v4342_v17, %v3274_v56  ;;  %v4702_v7 = vadd.f32 %v8904_v42, %v4668_v23  ;;  %v9809_v56 = vld [vmem:[#allocation43_spill] sm:$0xff]  ;;  %v4262_v61 = vpop.f32.mrf.mxu0 }
 0x484   : > { %v3282_v17 = vadd.f32 %v8865_v54, %v9809_v56 }
 0x485   : > { %v4418_v51 = vmul.f32 %v8649_v45, %v4384_v3  ;;  %v4798_v48 = vadd.f32 %v5850_v10, %v4702_v7 }
 0x486   : > { %v4166_v5 = vpop.f32.mrf.mxu3 }
 0x487   : > { %v4256_v25 = vadd.f32 %v4255_v29, %v4166_v5  ;;  %v4452_v32 = vadd.f32 %v8664_v28, %v4418_v51  ;;  %v4830_v43 = vmax.f32 %v4798_v48, 0.0  ;;  %v4351_v51 = vpop.f32.mrf.mxu1  ;;  %v6000_v48 = vld [vmem:[%s6570_s10 + $0x28] sm:$0xff]  }
 0x488   : > { %v4597_v44 = vpop.f32.mrf.mxu2 }
 0x489   : > { %v4345_v9 = vadd.f32 %v4344_v14, %v4256_v25  ;;  %v4669_v16 = vmul.f32 %v8892_v53, %v4597_v44  ;;  %v4484_v33 = vmax.f32 %v4452_v32, 0.0  ;;  %v5854_v14 = vunpack.c.l.bf16 %v5999_v8 }
 0x48b   : > { %v4703_v15 = vadd.f32 %v8904_v42, %v4669_v16  ;;  %v4503_v50 = vpack.c.bf16 %v4484_v33, %v4483_v30  ;;  %v4385_v47 = vadd.f32 %v4345_v9, %v3277_v2  ;;  %v4265_v33 = vpop.f32.mrf.mxu0 }
 0x48d   : > { %v4799_v24 = vadd.f32 %v5851_v52, %v4703_v15  ;;  %4639 = vmatmul.bf16.gmra.mxu2 %v4503_v50  ;;  %v4419_v0 = vmul.f32 %v8649_v45, %v4385_v47  ;;  %v9810_v52 = vld [vmem:[#allocation44_spill] sm:$0xff] }
 0x48e   : > { %v4168_v49 = vpop.f32.mrf.mxu3  ;;  %v3284_v54 = vadd.f32 %v8872_v46, %v9810_v52  ;;  %v6002_v52 = vld [vmem:[%s6570_s10 + $0x38] sm:$0xff]  }
 0x48f   : > { %v4831_v12 = vmax.f32 %v4799_v24, 0.0  ;;  %v4258_v58 = vadd.f32 %v4257_v34, %v4168_v49  ;;  %v4453_v29 = vadd.f32 %v8664_v28, %v4419_v0  ;;  %v4354_v15 = vpop.f32.mrf.mxu1  ;;  %v5858_v24 = vunpack.c.l.bf16 %v6000_v48 }
 0x490   : > { %v4600_v41 = vpop.f32.mrf.mxu2 }
 0x491   : > { %v5918_v27 = vpack.c.bf16 %v4831_v12, %v4830_v43  ;;  %v4347_v38 = vadd.f32 %v4346_v13, %v4258_v58  ;;  %v4670_v6 = vmul.f32 %v8892_v53, %v4600_v41  ;;  %v4485_v59 = vmax.f32 %v4453_v29, 0.0 }
 0x492   : > { %v5859_v12 = vunpack.c.h.bf16 %v6000_v48 }
 0x493   : > { %6013 = vst [vmem:[%s8920_s16 + $0x18] sm:$0xff] %v5918_v27   ;;  %v4386_v36 = vadd.f32 %v4347_v38, %v3279_v39  ;;  %v4704_v18 = vadd.f32 %v8904_v42, %v4670_v6  ;;  %v9811_v39 = vld [vmem:[#allocation28_spill] sm:$0xff] }
 0x495   : > { %v4420_v11 = vmul.f32 %v8649_v45, %v4386_v36  ;;  %v4800_v55 = vadd.f32 %v5854_v14, %v4704_v18  ;;  %v6161_v14 = vld [vmem:[%s9095_s4] ss:$0 sm:$0xff] }
 0x496   : > { %v4171_v4 = vpop.f32.mrf.mxu3 }
 0x497   : > { %v4261_v19 = vadd.f32 %v4260_v62, %v4171_v4  ;;  %v4454_v40 = vadd.f32 %v8664_v28, %v4420_v11  ;;  %v4832_v7 = vmax.f32 %v4800_v55, 0.0  ;;  %v4356_v4 = vpop.f32.mrf.mxu1 }
 0x498   : > { %v4602_v60 = vpop.f32.mrf.mxu2 }
 0x499   : > { %v4350_v35 = vadd.f32 %v4349_v57, %v4261_v19  ;;  %v4671_v26 = vmul.f32 %v8892_v53, %v4602_v60  ;;  %v4486_v1 = vmax.f32 %v4454_v40, 0.0 }
 0x49b   : > { %v4705_v3 = vadd.f32 %v8904_v42, %v4671_v26  ;;  %v4504_v23 = vpack.c.bf16 %v4486_v1, %v4485_v59  ;;  %v4387_v21 = vadd.f32 %v4350_v35, %v3282_v17  ;;  %v6001_v35 = vld [vmem:[%s6570_s10 + $0x30] sm:$0xff]  }
 0x49c   : > { %v6162_v59 = vld [vmem:[%s9095_s4 + $0x1] ss:$0 sm:$0xff]  ;;  %v5862_v56 = vunpack.c.l.bf16 %v6001_v35 }
 0x49d   : > { %v4801_v5 = vadd.f32 %v5855_v37, %v4705_v3  ;;  %4644 = vmatmul.bf16.gmra.mxu2 %v4504_v23  ;;  %v4421_v13 = vmul.f32 %v8649_v45, %v4387_v21 }
 0x49e   : > { %v4173_v34 = vpop.f32.mrf.mxu3 }
 0x49f   : > { %v4833_v10 = vmax.f32 %v4801_v5, 0.0  ;;  %v4263_v25 = vadd.f32 %v4262_v61, %v4173_v34  ;;  %v4455_v2 = vadd.f32 %v8664_v28, %v4421_v13  ;;  %v5863_v61 = vunpack.c.h.bf16 %v6001_v35 }
 0x4a0   : > { %v4605_v32 = vpop.f32.mrf.mxu2 }
 0x4a1   : > { %v5923_v44 = vpack.c.bf16 %v4833_v10, %v4832_v7  ;;  %v4352_v9 = vadd.f32 %v4351_v51, %v4263_v25  ;;  %v4672_v30 = vmul.f32 %v8892_v53, %v4605_v32  ;;  %v4487_v0 = vmax.f32 %v4455_v2, 0.0 }
 0x4a3   : > { %6014 = vst [vmem:[%s8920_s16 + $0x20] sm:$0xff] %v5923_v44   ;;  %v4388_v16 = vadd.f32 %v4352_v9, %v3284_v54  ;;  %v4706_v47 = vadd.f32 %v8904_v42, %v4672_v30  ;;  %v5866_v9 = vunpack.c.l.bf16 %v6002_v52 }
 0x4a5   : > { %v4422_v63 = vmul.f32 %v8649_v45, %v4388_v16  ;;  %v4802_v31 = vadd.f32 %v5858_v24, %v4706_v47  ;;  %v3287_v45 = vadd.f32 %v8879_v20, %v9811_v39 }
 0x4a6   : > { %v4176_v50 = vpop.f32.mrf.mxu3 }
 0x4a7   : > { %v4266_v49 = vadd.f32 %v4265_v33, %v4176_v50  ;;  %v4456_v43 = vadd.f32 %v8664_v28, %v4422_v63  ;;  %v4267_v28 = vpop.f32.mrf.mxu0  ;;  %v4834_v8 = vmax.f32 %v4802_v31, 0.0  ;;  %v5867_v33 = vunpack.c.h.bf16 %v6002_v52 }
 0x4a8   : > { %v4607_v46 = vpop.f32.mrf.mxu2 }
 0x4a9   : > { %v4355_v58 = vadd.f32 %v4354_v15, %v4266_v49  ;;  %v4673_v41 = vmul.f32 %v8892_v53, %v4607_v46  ;;  %v4488_v27 = vmax.f32 %v4456_v43, 0.0  ;;  %v6003_v43 = vld [vmem:[%s6570_s10 + $0x40] sm:$0xff]  }
 0x4ab   : > { %v4707_v38 = vadd.f32 %v8904_v42, %v4673_v41  ;;  %v4505_v62 = vpack.c.bf16 %v4488_v27, %v4487_v0  ;;  %v4389_v57 = vadd.f32 %v4355_v58, %v3287_v45  ;;  %v5871_v0 = vunpack.c.h.bf16 %v6003_v43 }
 0x4ad   : > { %v4803_v36 = vadd.f32 %v5859_v12, %v4707_v38  ;;  %4649 = vmatmul.bf16.gmra.mxu2 %v4505_v62  ;;  %v4423_v20 = vmul.f32 %v6161_v14, %v4389_v57  ;;  %v5870_v12 = vunpack.c.l.bf16 %v6003_v43 }
 0x4ae   : > { %v4178_v6 = vpop.f32.mrf.mxu3 }
 0x4af   : > { %v4835_v11 = vmax.f32 %v4803_v36, 0.0  ;;  %v4268_v29 = vadd.f32 %v4267_v28, %v4178_v6  ;;  %v4457_v1 = vadd.f32 %v6162_v59, %v4423_v20  ;;  %v6004_v28 = vld [vmem:[%s6570_s10 + $0x48] sm:$0xff]  }
 0x4b0   : > { %v4610_v18 = vpop.f32.mrf.mxu2 }
 0x4b1   : > { %v5928_v19 = vpack.c.bf16 %v4835_v11, %v4834_v8  ;;  %v4357_v40 = vadd.f32 %v4356_v4, %v4268_v29  ;;  %v4674_v37 = vmul.f32 %v8892_v53, %v4610_v18  ;;  %v5874_v8 = vunpack.c.l.bf16 %v6004_v28 }
 0x4b2   : > { %v5875_v4 = vunpack.c.h.bf16 %v6004_v28 }
 0x4b3   : > { %6015 = vst [vmem:[%s8920_s16 + $0x28] sm:$0xff] %v5928_v19   ;;  %v4390_v60 = vadd.f32 %v4357_v40, %v8898_v22  ;;  %v4708_v55 = vadd.f32 %v8904_v42, %v4674_v37  ;;  %v4489_v22 = vmax.f32 %v4457_v1, 0.0 }
 0x4b5   : > { %v4424_v26 = vmul.f32 %v6161_v14, %v4390_v60  ;;  %v4804_v21 = vadd.f32 %v5862_v56, %v4708_v55 }
 0x4b7   : > { %v4458_v17 = vadd.f32 %v6162_v59, %v4424_v26  ;;  %v4836_v10 = vmax.f32 %v4804_v21, 0.0  ;;  %v6005_v26 = vld [vmem:[%s6570_s10 + $0x50] sm:$0xff]  }
 0x4b8   : > { %v4612_v3 = vpop.f32.mrf.mxu2  ;;  %v5878_v1 = vunpack.c.l.bf16 %v6005_v26 }
 0x4b9   : > { %v4675_v23 = vmul.f32 %v8892_v53, %v4612_v3  ;;  %v4490_v51 = vmax.f32 %v4458_v17, 0.0  ;;  %v5879_v17 = vunpack.c.h.bf16 %v6005_v26 }
 0x4bb   : > { %v4709_v5 = vadd.f32 %v8904_v42, %v4675_v23  ;;  %v4506_v34 = vpack.c.bf16 %v4490_v51, %v4489_v22 }
 0x4bd   : > { %v4805_v7 = vadd.f32 %v5863_v61, %v4709_v5  ;;  %4654 = vmatmul.bf16.gmra.mxu2 %v4506_v34 }
 0x4bf   : > { %v4837_v25 = vmax.f32 %v4805_v7, 0.0  ;;  %v6006_v7 = vld [vmem:[%s6570_s10 + $0x58] sm:$0xff]  }
 0x4c0   : > { %v4615_v32 = vpop.f32.mrf.mxu2 }
 0x4c1   : > { %v5933_v13 = vpack.c.bf16 %v4837_v25, %v4836_v10  ;;  %v4676_v44 = vmul.f32 %v8892_v53, %v4615_v32  ;;  %v5882_v25 = vunpack.c.l.bf16 %v6006_v7 }
 0x4c3   : > { %6016 = vst [vmem:[%s8920_s16 + $0x30] sm:$0xff] %v5933_v13   ;;  %v4710_v54 = vadd.f32 %v8904_v42, %v4676_v44  ;;  %v5883_v44 = vunpack.c.h.bf16 %v6006_v7 }
 0x4c5   : > { %v4806_v48 = vadd.f32 %v5866_v9, %v4710_v54 }
 0x4c7   : > { %v4838_v15 = vmax.f32 %v4806_v48, 0.0 }
 0x4c8   : > { %v4617_v16 = vpop.f32.mrf.mxu2 }
 0x4c9   : > { %v4677_v30 = vmul.f32 %v8892_v53, %v4617_v16 }
 0x4cb   : > { %v4711_v63 = vadd.f32 %v8904_v42, %v4677_v30 }
 0x4cd   : > { %v4807_v2 = vadd.f32 %v5867_v33, %v4711_v63 }
 0x4cf   : > { %v4839_v50 = vmax.f32 %v4807_v2, 0.0  ;;  %v6007_v2 = vld [vmem:[%s6570_s10 + $0x60] sm:$0xff]  }
 0x4d0   : > { %v4620_v47 = vpop.f32.mrf.mxu2 }
 0x4d1   : > { %v5938_v24 = vpack.c.bf16 %v4839_v50, %v4838_v15  ;;  %v4678_v49 = vmul.f32 %v8892_v53, %v4620_v47  ;;  %v5886_v50 = vunpack.c.l.bf16 %v6007_v2 }
 0x4d3   : > { %6017 = vst [vmem:[%s8920_s16 + $0x38] sm:$0xff] %v5938_v24   ;;  %v4712_v46 = vadd.f32 %v8904_v42, %v4678_v49  ;;  %v5887_v49 = vunpack.c.h.bf16 %v6007_v2 }
 0x4d5   : > { %v4808_v27 = vadd.f32 %v5870_v12, %v4712_v46 }
 0x4d7   : > { %v4840_v45 = vmax.f32 %v4808_v27, 0.0 }
 0x4d8   : > { %v4622_v58 = vpop.f32.mrf.mxu2 }
 0x4d9   : > { %v4679_v41 = vmul.f32 %v8892_v53, %v4622_v58 }
 0x4db   : > { %v4713_v31 = vadd.f32 %v8904_v42, %v4679_v41 }
 0x4dd   : > { %v4809_v39 = vadd.f32 %v5871_v0, %v4713_v31 }
 0x4df   : > { %v4841_v38 = vmax.f32 %v4809_v39, 0.0  ;;  %v6008_v39 = vld [vmem:[%s6570_s10 + $0x68] sm:$0xff]  }
 0x4e0   : > { %v4625_v62 = vpop.f32.mrf.mxu2 }
 0x4e1   : > { %v5943_v57 = vpack.c.bf16 %v4841_v38, %v4840_v45  ;;  %v4680_v36 = vmul.f32 %v8892_v53, %v4625_v62  ;;  %v5890_v38 = vunpack.c.l.bf16 %v6008_v39 }
 0x4e3   : > { %6018 = vst [vmem:[%s8920_s16 + $0x40] sm:$0xff] %v5943_v57   ;;  %v4714_v6 = vadd.f32 %v8904_v42, %v4680_v36  ;;  %v5891_v36 = vunpack.c.h.bf16 %v6008_v39 }
 0x4e5   : > { %v4810_v18 = vadd.f32 %v5874_v8, %v4714_v6 }
 0x4e7   : > { %v4842_v19 = vmax.f32 %v4810_v18, 0.0 }
 0x4e8   : > { %v4627_v11 = vpop.f32.mrf.mxu2 }
 0x4e9   : > { %v4681_v29 = vmul.f32 %v8892_v53, %v4627_v11 }
 0x4eb   : > { %v4715_v14 = vadd.f32 %v8904_v42, %v4681_v29 }
 0x4ed   : > { %v4811_v20 = vadd.f32 %v5875_v4, %v4715_v14 }
 0x4ef   : > { %v4843_v40 = vmax.f32 %v4811_v20, 0.0  ;;  %v6009_v20 = vld [vmem:[%s6570_s10 + $0x70] sm:$0xff]  }
 0x4f0   : > { %v4630_v60 = vpop.f32.mrf.mxu2 }
 0x4f1   : > { %v5948_v37 = vpack.c.bf16 %v4843_v40, %v4842_v19  ;;  %v4682_v35 = vmul.f32 %v8892_v53, %v4630_v60  ;;  %v5894_v40 = vunpack.c.l.bf16 %v6009_v20 }
 0x4f3   : > { %6019 = vst [vmem:[%s8920_s16 + $0x48] sm:$0xff] %v5948_v37   ;;  %v4716_v59 = vadd.f32 %v8904_v42, %v4682_v35  ;;  %v5895_v35 = vunpack.c.h.bf16 %v6009_v20 }
 0x4f5   : > { %v4812_v3 = vadd.f32 %v5878_v1, %v4716_v59 }
 0x4f7   : > { %v4844_v22 = vmax.f32 %v4812_v3, 0.0 }
 0x4f8   : > { %v4632_v55 = vpop.f32.mrf.mxu2 }
 0x4f9   : > { %v4683_v56 = vmul.f32 %v8892_v53, %v4632_v55 }
 0x4fb   : > { %v4717_v23 = vadd.f32 %v8904_v42, %v4683_v56 }
 0x4fd   : > { %v4813_v61 = vadd.f32 %v5879_v17, %v4717_v23 }
 0x4ff   : > { %v4845_v51 = vmax.f32 %v4813_v61, 0.0  ;;  %v6010_v61 = vld [vmem:[%s6570_s10 + $0x78] sm:$0xff]   ;;  %s4933_s10 = sshll.u32 %s8920_s16, 4  ;;  %s4934_s10 = int_to_ptr.vmem [resolvable:$true] %s4933_s10 }
 0x500   : > { %v4635_v21 = vpop.f32.mrf.mxu2 }
 0x501   : > { %v5953_v5 = vpack.c.bf16 %v4845_v51, %v4844_v22  ;;  %v4684_v34 = vmul.f32 %v8892_v53, %v4635_v21  ;;  %v5898_v51 = vunpack.c.l.bf16 %v6010_v61 }
 0x503   : > { %6020 = vst [vmem:[%s8920_s16 + $0x50] sm:$0xff] %v5953_v5   ;;  %v4718_v10 = vadd.f32 %v8904_v42, %v4684_v34  ;;  %v5899_v34 = vunpack.c.h.bf16 %v6010_v61 }
 0x505   : > { %v4814_v52 = vadd.f32 %v5882_v25, %v4718_v10 }
 0x507   : > { %v4846_v16 = vmax.f32 %v4814_v52, 0.0 }
 0x508   : > { %v4637_v32 = vpop.f32.mrf.mxu2 }
 0x509   : > { %v4685_v13 = vmul.f32 %v8892_v53, %v4637_v32 }
 0x50b   : > { %v4719_v54 = vadd.f32 %v8904_v42, %v4685_v13 }
 0x50d   : > { %v4815_v9 = vadd.f32 %v5883_v44, %v4719_v54 }
 0x50f   : > { %v4847_v30 = vmax.f32 %v4815_v9, 0.0 }
 0x510   : > { %v4640_v33 = vpop.f32.mrf.mxu2 }
 0x511   : > { %v5958_v48 = vpack.c.bf16 %v4847_v30, %v4846_v16  ;;  %v4686_v63 = vmul.f32 %v8892_v53, %v4640_v33 }
 0x513   : > { %6021 = vst [vmem:[%s8920_s16 + $0x58] sm:$0xff] %v5958_v48   ;;  %v4720_v15 = vadd.f32 %v8904_v42, %v4686_v63 }
 0x515   : > { %v4816_v43 = vadd.f32 %v5886_v50, %v4720_v15 }
 0x517   : > { %v4848_v58 = vmax.f32 %v4816_v43, 0.0 }
 0x518   : > { %v4642_v47 = vpop.f32.mrf.mxu2 }
 0x519   : > { %v4687_v24 = vmul.f32 %v8892_v53, %v4642_v47 }
 0x51b   : > { %v4721_v46 = vadd.f32 %v8904_v42, %v4687_v24 }
 0x51d   : > { %v4817_v12 = vadd.f32 %v5887_v49, %v4721_v46 }
 0x51f   : > { %v4849_v41 = vmax.f32 %v4817_v12, 0.0 }
 0x520   : > { %v4645_v0 = vpop.f32.mrf.mxu2 }
 0x521   : > { %v5963_v27 = vpack.c.bf16 %v4849_v41, %v4848_v58  ;;  %v4688_v31 = vmul.f32 %v8892_v53, %v4645_v0 }
 0x523   : > { %6022 = vst [vmem:[%s8920_s16 + $0x60] sm:$0xff] %v5963_v27   ;;  %v4722_v45 = vadd.f32 %v8904_v42, %v4688_v31 }
 0x525   : > { %v4818_v28 = vadd.f32 %v5890_v38, %v4722_v45 }
 0x527   : > { %v4850_v11 = vmax.f32 %v4818_v28, 0.0 }
 0x528   : > { %v4647_v62 = vpop.f32.mrf.mxu2 }
 0x529   : > { %v4689_v57 = vmul.f32 %v8892_v53, %v4647_v62 }
 0x52b   : > { %v4723_v6 = vadd.f32 %v8904_v42, %v4689_v57 }
 0x52d   : > { %v4819_v8 = vadd.f32 %v5891_v36, %v4723_v6 }
 0x52f   : > { %v4851_v29 = vmax.f32 %v4819_v8, 0.0 }
 0x530   : > { %v4650_v4 = vpop.f32.mrf.mxu2 }
 0x531   : > { %v5968_v18 = vpack.c.bf16 %v4851_v29, %v4850_v11  ;;  %v4690_v14 = vmul.f32 %v8892_v53, %v4650_v4 }
 0x533   : > { %6023 = vst [vmem:[%s8920_s16 + $0x68] sm:$0xff] %v5968_v18   ;;  %v4724_v19 = vadd.f32 %v8904_v42, %v4690_v14 }
 0x535   : > { %v4820_v26 = vadd.f32 %v5894_v40, %v4724_v19 }
 0x537   : > { %v4852_v55 = vmax.f32 %v4820_v26, 0.0 }
 0x538   : > { %v4652_v60 = vpop.f32.mrf.mxu2 }
 0x539   : > { %v4691_v37 = vmul.f32 %v8892_v53, %v4652_v60 }
 0x53b   : > { %v4725_v59 = vadd.f32 %v8904_v42, %v4691_v37 }
 0x53d   : > { %v4821_v1 = vadd.f32 %v5895_v35, %v4725_v59 }
 0x53f   : > { %v4853_v56 = vmax.f32 %v4821_v1, 0.0 }
 0x540   : > { %v4655_v17 = vpop.f32.mrf.mxu2 }
 0x541   : > { %v5973_v3 = vpack.c.bf16 %v4853_v56, %v4852_v55  ;;  %v4692_v23 = vmul.f32 %v8892_v53, %v4655_v17 }
 0x543   : > { %6024 = vst [vmem:[%s8920_s16 + $0x70] sm:$0xff] %v5973_v3   ;;  %v4726_v22 = vadd.f32 %v8904_v42, %v4692_v23 }
 0x545   : > { %v4822_v7 = vadd.f32 %v5898_v51, %v4726_v22 }
 0x547   : > { %v4854_v32 = vmax.f32 %v4822_v7, 0.0 }
 0x548   : > { %v4657_v21 = vpop.f32.mrf.mxu2 }
 0x549   : > { %v4693_v5 = vmul.f32 %v8892_v53, %v4657_v21 }
 0x54b   : > { %v4727_v10 = vadd.f32 %v8904_v42, %v4693_v5 }
 0x54d   : > { %v4823_v25 = vadd.f32 %v5899_v34, %v4727_v10 }
 0x54f   : > { %v4855_v13 = vmax.f32 %v4823_v25, 0.0 }
 0x551   : > { %v5978_v44 = vpack.c.bf16 %v4855_v13, %v4854_v32 }
 0x553   : > { %6025 = vst [vmem:[%s8920_s16 + $0x78] sm:$0xff] %v5978_v44  }
 0x554   : > { %6340 = shalt.err (!%p6337_p10)
}
 0x555   : > { %s6396_s11 = smov 64   ;;  %s6397_s16 = smov 4  }
 0x556   : > { %6068 = dma.vmem_to_hbm [thread:$0]  (%p6531_p3), %s4934_s10, 2048, %s4936_s23, %s4921_s28, %s6396_s11, %s6396_s11, %s6397_s16  }
 0x557 PF: > { %s4950_s30 = sand.u32 1, %s6375_s24   ;;  %p9812_p12 = scmp.ge.s32.totalorder %s6387_s27, 2 }
 0x558   : > { %s4951_s12 = scalar_lea.sflag [#allocation5], %s4950_s30 }
 0x559   : > { %p6088_p13 = pnand %p9812_p12, %p6473_p6 }
 0x55b   : > { %p6089_p0 = pneg %p6088_p13 }
 0x55d   : > { %6370 = dma.done.wait (%p6089_p0), %s4951_s12, 2048  }
 0x55e   : > { %6372 = vsyncadd (%p6089_p0), %s4951_s12, 4294965248  ;;  %p22_p5 = scmp.ge.s32.totalorder %s6521_s18, 4   ;;  %s9813_s24 = smov %s6379_s25 }
 0x55f   : > { %s9814_s25 = smov %s6383_s26  ;;  %s9815_s26 = smov %s6537_s9 }
 0x560   : > { %s9816_s27 = smov %s6521_s18  ;;  %24 = sbr.rel (!%p22_p5) target bundleno = 9 (0x9), region = 111 }
 0x565   :  { %4957 = vsyncpa [#allocation4], 1 }
 0x566   :  { %4959 = vsyncpa [#allocation4 + $0x1], 1 }
 0x567   :  { %4960 = vsyncpa [#allocation7], 1 }
 0x568   :  { %4961 = vsyncpa [#allocation10], 1 }
 0x569   :  { %4962 = vsyncpa [#allocation5], 1 }
 0x56a   :  { %4964 = vsyncpa [#allocation5 + $0x1], 1 }

</bundles_post_ra>
